<compile_context>
chip_gen: v7x
topology: tpu7x:2x2x1
jax: 0.10.0
libtpu: 0.0.40
codegen_flags: <defaults>
</compile_context>

<pallas_src>
import jax
import jax.numpy as jnp
from jax.experimental import pallas as pl
from jax.experimental.pallas import tpu as pltpu

HIDDEN = 256   # hidden_size from the PyTorch example
VOCAB = 64     # small vocabulary for the self-contained example
SEQ = 8        # tokens processed per kernel launch (whole sequence per call)


def encoder_gru_kernel(
    tok_ref,      # SMEM (T,)   int32  token ids
    emb_ref,      # VMEM (V, H) f32    embedding table (resident)
    w_ih_ref,     # VMEM (H, 3H) bf16  GRU input weights  (gate order r, z, n)
    w_hh_ref,     # VMEM (H, 3H) bf16  GRU hidden weights (gate order r, z, n)
    b_ih_ref,     # VMEM (1, 3H) f32
    b_hh_ref,     # VMEM (1, 3H) f32
    h0_ref,       # VMEM (1, H)  f32   initial hidden state
    out_ref,      # VMEM (T, H)  f32   all hidden states
):
    T, H = out_ref.shape

    # ---- embedding gather: T rows from the resident table, ids from SMEM ----
    rows = [emb_ref[pl.ds(tok_ref[t], 1), :] for t in range(T)]   # each (1, H)
    x = jnp.concatenate(rows, axis=0).astype(jnp.bfloat16)        # (T, H)

    # ---- batched input projection: one (T,H)x(H,3H) MXU pass, out of the loop ----
    gi = jnp.dot(x, w_ih_ref[...],
                 preferred_element_type=jnp.float32) + b_ih_ref[...]   # (T, 3H) f32

    # ---- serial recurrence: h carried in vregs, loop fully unrolled (static T) ----
    w_hh = w_hh_ref[...]
    b_hh = b_hh_ref[...]
    h = h0_ref[...]                                               # (1, H) f32
    hs = []
    for t in range(T):
        gh = jnp.dot(h.astype(jnp.bfloat16), w_hh,
                     preferred_element_type=jnp.float32) + b_hh   # (1, 3H) f32
        gi_t = gi[t:t + 1, :]                                     # static slice
        r = jax.nn.sigmoid(gi_t[:, 0:H] + gh[:, 0:H])
        z = jax.nn.sigmoid(gi_t[:, H:2 * H] + gh[:, H:2 * H])
        n = jnp.tanh(gi_t[:, 2 * H:3 * H] + r * gh[:, 2 * H:3 * H])
        h = (1.0 - z) * n + z * h                                 # (1, H) f32
        hs.append(h)

    # ---- single unmasked (T, H) store ----
    out_ref[...] = jnp.concatenate(hs, axis=0)


def encoder_forward(tokens, hidden, params):
    """tokens: (T,) int32; hidden: (1, 1, H) f32 (EncoderRNN.initHidden()).

    Returns (output, hidden) like running EncoderRNN.forward token-by-token:
      output: (T, 1, H) every hidden state; hidden: (1, 1, H) final state.
    """
    V, H = params["embedding"].shape
    T = int(tokens.shape[0])

    # In-kernel gather has no bounds check; clamp ids defensively (PyTorch would
    # raise on out-of-range ids — here they are clamped to V-1 instead).
    tok = jnp.clip(jnp.asarray(tokens, jnp.int32), 0, V - 1)
    h0 = hidden.reshape((1, H)).astype(jnp.float32)

    vmem = lambda: pl.BlockSpec(memory_space=pltpu.MemorySpace.VMEM)

    outputs = pl.pallas_call(
        encoder_gru_kernel,
        out_shape=jax.ShapeDtypeStruct((T, H), jnp.float32),
        in_specs=[
            pl.BlockSpec(memory_space=pltpu.MemorySpace.SMEM),   # token ids
            vmem(),   # embedding table
            vmem(),   # w_ih
            vmem(),   # w_hh
            vmem(),   # b_ih
            vmem(),   # b_hh
            vmem(),   # h0
        ],
        out_specs=vmem(),
    )(tok, params["embedding"], params["w_ih"], params["w_hh"],
      params["b_ih"], params["b_hh"], h0)

    output = outputs.reshape((T, 1, H))
    final_hidden = outputs[T - 1].reshape((1, 1, H))
    return output, final_hidden


def encoder_reference(tokens, hidden, params):
    """Pure-JAX f32 reference (PyTorch nn.GRU semantics, gate order r, z, n)."""
    emb = params["embedding"]
    w_ih = params["w_ih"].astype(jnp.float32)
    w_hh = params["w_hh"].astype(jnp.float32)
    b_ih = params["b_ih"][0]
    b_hh = params["b_hh"][0]
    H = emb.shape[1]
    h = hidden.reshape((H,)).astype(jnp.float32)
    outs = []
    for t in range(int(tokens.shape[0])):
        x = emb[tokens[t]]
        gi = x @ w_ih + b_ih
        gh = h @ w_hh + b_hh
        r = jax.nn.sigmoid(gi[0:H] + gh[0:H])
        z = jax.nn.sigmoid(gi[H:2 * H] + gh[H:2 * H])
        n = jnp.tanh(gi[2 * H:3 * H] + r * gh[2 * H:3 * H])
        h = (1.0 - z) * n + z * h
        outs.append(h)
    out = jnp.stack(outs).reshape((len(outs), 1, H))
    return out, h.reshape((1, 1, H))


def init_params(key):
    """Deterministic init mirroring PyTorch defaults (Embedding ~ N(0,1),
    GRU weights ~ U(±1/sqrt(H))). Weight matrices bf16 (MXU), biases f32."""
    H, V = HIDDEN, VOCAB
    ks = jax.random.split(key, 5)
    bound = 1.0 / jnp.sqrt(jnp.float32(H))
    u = lambda k, shape: jax.random.uniform(k, shape, jnp.float32, -bound, bound)
    return {
        "embedding": jax.random.normal(ks[0], (V, H), jnp.float32),
        "w_ih": u(ks[1], (H, 3 * H)).astype(jnp.bfloat16),
        "w_hh": u(ks[2], (H, 3 * H)).astype(jnp.bfloat16),
        "b_ih": u(ks[3], (1, 3 * H)),
        "b_hh": u(ks[4], (1, 3 * H)),
    }


if __name__ == "__main__":
    key = jax.random.PRNGKey(0)
    pkey, tkey = jax.random.split(key, 2)

    params = init_params(pkey)
    tokens = jax.random.randint(tkey, (SEQ,), 0, VOCAB, dtype=jnp.int32)
    hidden = jnp.zeros((1, 1, HIDDEN), jnp.float32)   # EncoderRNN.initHidden()

    output, new_hidden = encoder_forward(tokens, hidden, params)
    jax.block_until_ready((output, new_hidden))

    ref_out, ref_h = encoder_reference(tokens, hidden, params)

    assert output.shape == (SEQ, 1, HIDDEN)
    assert new_hidden.shape == (1, 1, HIDDEN)
    assert bool(jnp.all(jnp.isfinite(output)))
    # bf16-weight MXU matmuls vs f32 reference: small, bounded drift.
    assert bool(jnp.allclose(output, ref_out, atol=5e-2)), "kernel != f32 reference"
    assert bool(jnp.allclose(new_hidden, ref_h, atol=5e-2)), "final hidden mismatch"
    print("KERNEL_OK")
</pallas_src>

<mosaic_0001>
module attributes {stable_mosaic.version = 11 : i64} {
  func.func @encoder_gru_kernel(%arg0: memref<8xi32, #tpu.memory_space<smem>>, %arg1: memref<64x256xf32, #tpu.memory_space<vmem>>, %arg2: memref<256x768xbf16, #tpu.memory_space<vmem>>, %arg3: memref<256x768xbf16, #tpu.memory_space<vmem>>, %arg4: memref<1x768xf32, #tpu.memory_space<vmem>>, %arg5: memref<1x768xf32, #tpu.memory_space<vmem>>, %arg6: memref<1x256xf32, #tpu.memory_space<vmem>>, %arg7: memref<8x256xf32, #tpu.memory_space<vmem>>) attributes {dimension_semantics = [], scalar_prefetch = 0 : i64, scratch_operands = 0 : i64, tpu.core_type = #tpu.core_type<tc>} {
    %c0 = arith.constant 0 : index
    %0 = memref.load %arg0[%c0] : memref<8xi32, #tpu.memory_space<smem>>
    %1 = arith.index_cast %0 : i32 to index
    %c0_0 = arith.constant 0 : index
    %2 = vector.load %arg1[%1, %c0_0] : memref<64x256xf32, #tpu.memory_space<vmem>>, vector<1x256xf32>
    %c1 = arith.constant 1 : index
    %3 = memref.load %arg0[%c1] : memref<8xi32, #tpu.memory_space<smem>>
    %4 = arith.index_cast %3 : i32 to index
    %c0_1 = arith.constant 0 : index
    %5 = vector.load %arg1[%4, %c0_1] : memref<64x256xf32, #tpu.memory_space<vmem>>, vector<1x256xf32>
    %c2 = arith.constant 2 : index
    %6 = memref.load %arg0[%c2] : memref<8xi32, #tpu.memory_space<smem>>
    %7 = arith.index_cast %6 : i32 to index
    %c0_2 = arith.constant 0 : index
    %8 = vector.load %arg1[%7, %c0_2] : memref<64x256xf32, #tpu.memory_space<vmem>>, vector<1x256xf32>
    %c3 = arith.constant 3 : index
    %9 = memref.load %arg0[%c3] : memref<8xi32, #tpu.memory_space<smem>>
    %10 = arith.index_cast %9 : i32 to index
    %c0_3 = arith.constant 0 : index
    %11 = vector.load %arg1[%10, %c0_3] : memref<64x256xf32, #tpu.memory_space<vmem>>, vector<1x256xf32>
    %c4 = arith.constant 4 : index
    %12 = memref.load %arg0[%c4] : memref<8xi32, #tpu.memory_space<smem>>
    %13 = arith.index_cast %12 : i32 to index
    %c0_4 = arith.constant 0 : index
    %14 = vector.load %arg1[%13, %c0_4] : memref<64x256xf32, #tpu.memory_space<vmem>>, vector<1x256xf32>
    %c5 = arith.constant 5 : index
    %15 = memref.load %arg0[%c5] : memref<8xi32, #tpu.memory_space<smem>>
    %16 = arith.index_cast %15 : i32 to index
    %c0_5 = arith.constant 0 : index
    %17 = vector.load %arg1[%16, %c0_5] : memref<64x256xf32, #tpu.memory_space<vmem>>, vector<1x256xf32>
    %c6 = arith.constant 6 : index
    %18 = memref.load %arg0[%c6] : memref<8xi32, #tpu.memory_space<smem>>
    %19 = arith.index_cast %18 : i32 to index
    %c0_6 = arith.constant 0 : index
    %20 = vector.load %arg1[%19, %c0_6] : memref<64x256xf32, #tpu.memory_space<vmem>>, vector<1x256xf32>
    %c7 = arith.constant 7 : index
    %21 = memref.load %arg0[%c7] : memref<8xi32, #tpu.memory_space<smem>>
    %22 = arith.index_cast %21 : i32 to index
    %c0_7 = arith.constant 0 : index
    %23 = vector.load %arg1[%22, %c0_7] : memref<64x256xf32, #tpu.memory_space<vmem>>, vector<1x256xf32>
    %24 = tpu.concatenate %2, %5, %8, %11, %14, %17, %20, %23 in 0 : vector<1x256xf32>, vector<1x256xf32>, vector<1x256xf32>, vector<1x256xf32>, vector<1x256xf32>, vector<1x256xf32>, vector<1x256xf32>, vector<1x256xf32> -> vector<8x256xf32>
    %25 = arith.truncf %24 : vector<8x256xf32> to vector<8x256xbf16>
    %c0_8 = arith.constant 0 : index
    %c0_9 = arith.constant 0 : index
    %26 = vector.load %arg2[%c0_8, %c0_9] : memref<256x768xbf16, #tpu.memory_space<vmem>>, vector<256x768xbf16>
    %cst = arith.constant dense<0.000000e+00> : vector<8x768xf32>
    %27 = tpu.matmul %25, %26, %cst {dimension_numbers = #tpu.dot_dimension_numbers<[1], [0], [0], [1], [0, 0, 1, 1], [], []>} : vector<8x256xbf16>, vector<256x768xbf16>, vector<8x768xf32> -> vector<8x768xf32>
    %c0_10 = arith.constant 0 : index
    %c0_11 = arith.constant 0 : index
    %28 = vector.load %arg4[%c0_10, %c0_11] : memref<1x768xf32, #tpu.memory_space<vmem>>, vector<1x768xf32>
    %29 = vector.broadcast %28 : vector<1x768xf32> to vector<8x768xf32>
    %30 = arith.addf %27, %29 : vector<8x768xf32>
    %c0_12 = arith.constant 0 : index
    %c0_13 = arith.constant 0 : index
    %31 = vector.load %arg3[%c0_12, %c0_13] : memref<256x768xbf16, #tpu.memory_space<vmem>>, vector<256x768xbf16>
    %c0_14 = arith.constant 0 : index
    %c0_15 = arith.constant 0 : index
    %32 = vector.load %arg5[%c0_14, %c0_15] : memref<1x768xf32, #tpu.memory_space<vmem>>, vector<1x768xf32>
    %c0_16 = arith.constant 0 : index
    %c0_17 = arith.constant 0 : index
    %33 = vector.load %arg6[%c0_16, %c0_17] : memref<1x256xf32, #tpu.memory_space<vmem>>, vector<1x256xf32>
    %34 = arith.truncf %33 : vector<1x256xf32> to vector<1x256xbf16>
    %cst_18 = arith.constant dense<0.000000e+00> : vector<1x768xf32>
    %35 = tpu.matmul %34, %31, %cst_18 {dimension_numbers = #tpu.dot_dimension_numbers<[1], [0], [0], [1], [0, 0, 1, 1], [], []>} : vector<1x256xbf16>, vector<256x768xbf16>, vector<1x768xf32> -> vector<1x768xf32>
    %36 = arith.addf %35, %32 : vector<1x768xf32>
    %37 = vector.extract_strided_slice %30 {offsets = [0, 0], sizes = [1, 768], strides = [1, 1]} : vector<8x768xf32> to vector<1x768xf32>
    %38 = vector.extract_strided_slice %37 {offsets = [0, 0], sizes = [1, 256], strides = [1, 1]} : vector<1x768xf32> to vector<1x256xf32>
    %39 = vector.extract_strided_slice %36 {offsets = [0, 0], sizes = [1, 256], strides = [1, 1]} : vector<1x768xf32> to vector<1x256xf32>
    %40 = arith.addf %38, %39 : vector<1x256xf32>
    %41 = arith.negf %40 : vector<1x256xf32>
    %42 = math.exp %41 : vector<1x256xf32>
    %cst_19 = arith.constant 1.000000e+00 : f32
    %43 = vector.broadcast %cst_19 : f32 to vector<1x256xf32>
    %44 = arith.addf %43, %42 : vector<1x256xf32>
    %45 = arith.divf %43, %44 : vector<1x256xf32>
    %46 = vector.extract_strided_slice %37 {offsets = [0, 256], sizes = [1, 256], strides = [1, 1]} : vector<1x768xf32> to vector<1x256xf32>
    %47 = vector.extract_strided_slice %36 {offsets = [0, 256], sizes = [1, 256], strides = [1, 1]} : vector<1x768xf32> to vector<1x256xf32>
    %48 = arith.addf %46, %47 : vector<1x256xf32>
    %49 = arith.negf %48 : vector<1x256xf32>
    %50 = math.exp %49 : vector<1x256xf32>
    %cst_20 = arith.constant 1.000000e+00 : f32
    %51 = vector.broadcast %cst_20 : f32 to vector<1x256xf32>
    %52 = arith.addf %51, %50 : vector<1x256xf32>
    %53 = arith.divf %51, %52 : vector<1x256xf32>
    %54 = vector.extract_strided_slice %37 {offsets = [0, 512], sizes = [1, 256], strides = [1, 1]} : vector<1x768xf32> to vector<1x256xf32>
    %55 = vector.extract_strided_slice %36 {offsets = [0, 512], sizes = [1, 256], strides = [1, 1]} : vector<1x768xf32> to vector<1x256xf32>
    %56 = arith.mulf %45, %55 : vector<1x256xf32>
    %57 = arith.addf %54, %56 : vector<1x256xf32>
    %58 = math.tanh %57 : vector<1x256xf32>
    %cst_21 = arith.constant 1.000000e+00 : f32
    %59 = vector.broadcast %cst_21 : f32 to vector<1x256xf32>
    %60 = arith.subf %59, %53 : vector<1x256xf32>
    %61 = arith.mulf %60, %58 : vector<1x256xf32>
    %62 = arith.mulf %53, %33 : vector<1x256xf32>
    %63 = arith.addf %61, %62 : vector<1x256xf32>
    %64 = arith.truncf %63 : vector<1x256xf32> to vector<1x256xbf16>
    %cst_22 = arith.constant dense<0.000000e+00> : vector<1x768xf32>
    %65 = tpu.matmul %64, %31, %cst_22 {dimension_numbers = #tpu.dot_dimension_numbers<[1], [0], [0], [1], [0, 0, 1, 1], [], []>} : vector<1x256xbf16>, vector<256x768xbf16>, vector<1x768xf32> -> vector<1x768xf32>
    %66 = arith.addf %65, %32 : vector<1x768xf32>
    %67 = vector.extract_strided_slice %30 {offsets = [1, 0], sizes = [1, 768], strides = [1, 1]} : vector<8x768xf32> to vector<1x768xf32>
    %68 = vector.extract_strided_slice %67 {offsets = [0, 0], sizes = [1, 256], strides = [1, 1]} : vector<1x768xf32> to vector<1x256xf32>
    %69 = vector.extract_strided_slice %66 {offsets = [0, 0], sizes = [1, 256], strides = [1, 1]} : vector<1x768xf32> to vector<1x256xf32>
    %70 = arith.addf %68, %69 : vector<1x256xf32>
    %71 = arith.negf %70 : vector<1x256xf32>
    %72 = math.exp %71 : vector<1x256xf32>
    %cst_23 = arith.constant 1.000000e+00 : f32
    %73 = vector.broadcast %cst_23 : f32 to vector<1x256xf32>
    %74 = arith.addf %73, %72 : vector<1x256xf32>
    %75 = arith.divf %73, %74 : vector<1x256xf32>
    %76 = vector.extract_strided_slice %67 {offsets = [0, 256], sizes = [1, 256], strides = [1, 1]} : vector<1x768xf32> to vector<1x256xf32>
    %77 = vector.extract_strided_slice %66 {offsets = [0, 256], sizes = [1, 256], strides = [1, 1]} : vector<1x768xf32> to vector<1x256xf32>
    %78 = arith.addf %76, %77 : vector<1x256xf32>
    %79 = arith.negf %78 : vector<1x256xf32>
    %80 = math.exp %79 : vector<1x256xf32>
    %cst_24 = arith.constant 1.000000e+00 : f32
    %81 = vector.broadcast %cst_24 : f32 to vector<1x256xf32>
    %82 = arith.addf %81, %80 : vector<1x256xf32>
    %83 = arith.divf %81, %82 : vector<1x256xf32>
    %84 = vector.extract_strided_slice %67 {offsets = [0, 512], sizes = [1, 256], strides = [1, 1]} : vector<1x768xf32> to vector<1x256xf32>
    %85 = vector.extract_strided_slice %66 {offsets = [0, 512], sizes = [1, 256], strides = [1, 1]} : vector<1x768xf32> to vector<1x256xf32>
    %86 = arith.mulf %75, %85 : vector<1x256xf32>
    %87 = arith.addf %84, %86 : vector<1x256xf32>
    %88 = math.tanh %87 : vector<1x256xf32>
    %cst_25 = arith.constant 1.000000e+00 : f32
    %89 = vector.broadcast %cst_25 : f32 to vector<1x256xf32>
    %90 = arith.subf %89, %83 : vector<1x256xf32>
    %91 = arith.mulf %90, %88 : vector<1x256xf32>
    %92 = arith.mulf %83, %63 : vector<1x256xf32>
    %93 = arith.addf %91, %92 : vector<1x256xf32>
    %94 = arith.truncf %93 : vector<1x256xf32> to vector<1x256xbf16>
    %cst_26 = arith.constant dense<0.000000e+00> : vector<1x768xf32>
    %95 = tpu.matmul %94, %31, %cst_26 {dimension_numbers = #tpu.dot_dimension_numbers<[1], [0], [0], [1], [0, 0, 1, 1], [], []>} : vector<1x256xbf16>, vector<256x768xbf16>, vector<1x768xf32> -> vector<1x768xf32>
    %96 = arith.addf %95, %32 : vector<1x768xf32>
    %97 = vector.extract_strided_slice %30 {offsets = [2, 0], sizes = [1, 768], strides = [1, 1]} : vector<8x768xf32> to vector<1x768xf32>
    %98 = vector.extract_strided_slice %97 {offsets = [0, 0], sizes = [1, 256], strides = [1, 1]} : vector<1x768xf32> to vector<1x256xf32>
    %99 = vector.extract_strided_slice %96 {offsets = [0, 0], sizes = [1, 256], strides = [1, 1]} : vector<1x768xf32> to vector<1x256xf32>
    %100 = arith.addf %98, %99 : vector<1x256xf32>
    %101 = arith.negf %100 : vector<1x256xf32>
    %102 = math.exp %101 : vector<1x256xf32>
    %cst_27 = arith.constant 1.000000e+00 : f32
    %103 = vector.broadcast %cst_27 : f32 to vector<1x256xf32>
    %104 = arith.addf %103, %102 : vector<1x256xf32>
    %105 = arith.divf %103, %104 : vector<1x256xf32>
    %106 = vector.extract_strided_slice %97 {offsets = [0, 256], sizes = [1, 256], strides = [1, 1]} : vector<1x768xf32> to vector<1x256xf32>
    %107 = vector.extract_strided_slice %96 {offsets = [0, 256], sizes = [1, 256], strides = [1, 1]} : vector<1x768xf32> to vector<1x256xf32>
    %108 = arith.addf %106, %107 : vector<1x256xf32>
    %109 = arith.negf %108 : vector<1x256xf32>
    %110 = math.exp %109 : vector<1x256xf32>
    %cst_28 = arith.constant 1.000000e+00 : f32
    %111 = vector.broadcast %cst_28 : f32 to vector<1x256xf32>
    %112 = arith.addf %111, %110 : vector<1x256xf32>
    %113 = arith.divf %111, %112 : vector<1x256xf32>
    %114 = vector.extract_strided_slice %97 {offsets = [0, 512], sizes = [1, 256], strides = [1, 1]} : vector<1x768xf32> to vector<1x256xf32>
    %115 = vector.extract_strided_slice %96 {offsets = [0, 512], sizes = [1, 256], strides = [1, 1]} : vector<1x768xf32> to vector<1x256xf32>
    %116 = arith.mulf %105, %115 : vector<1x256xf32>
    %117 = arith.addf %114, %116 : vector<1x256xf32>
    %118 = math.tanh %117 : vector<1x256xf32>
    %cst_29 = arith.constant 1.000000e+00 : f32
    %119 = vector.broadcast %cst_29 : f32 to vector<1x256xf32>
    %120 = arith.subf %119, %113 : vector<1x256xf32>
    %121 = arith.mulf %120, %118 : vector<1x256xf32>
    %122 = arith.mulf %113, %93 : vector<1x256xf32>
    %123 = arith.addf %121, %122 : vector<1x256xf32>
    %124 = arith.truncf %123 : vector<1x256xf32> to vector<1x256xbf16>
    %cst_30 = arith.constant dense<0.000000e+00> : vector<1x768xf32>
    %125 = tpu.matmul %124, %31, %cst_30 {dimension_numbers = #tpu.dot_dimension_numbers<[1], [0], [0], [1], [0, 0, 1, 1], [], []>} : vector<1x256xbf16>, vector<256x768xbf16>, vector<1x768xf32> -> vector<1x768xf32>
    %126 = arith.addf %125, %32 : vector<1x768xf32>
    %127 = vector.extract_strided_slice %30 {offsets = [3, 0], sizes = [1, 768], strides = [1, 1]} : vector<8x768xf32> to vector<1x768xf32>
    %128 = vector.extract_strided_slice %127 {offsets = [0, 0], sizes = [1, 256], strides = [1, 1]} : vector<1x768xf32> to vector<1x256xf32>
    %129 = vector.extract_strided_slice %126 {offsets = [0, 0], sizes = [1, 256], strides = [1, 1]} : vector<1x768xf32> to vector<1x256xf32>
    %130 = arith.addf %128, %129 : vector<1x256xf32>
    %131 = arith.negf %130 : vector<1x256xf32>
    %132 = math.exp %131 : vector<1x256xf32>
    %cst_31 = arith.constant 1.000000e+00 : f32
    %133 = vector.broadcast %cst_31 : f32 to vector<1x256xf32>
    %134 = arith.addf %133, %132 : vector<1x256xf32>
    %135 = arith.divf %133, %134 : vector<1x256xf32>
    %136 = vector.extract_strided_slice %127 {offsets = [0, 256], sizes = [1, 256], strides = [1, 1]} : vector<1x768xf32> to vector<1x256xf32>
    %137 = vector.extract_strided_slice %126 {offsets = [0, 256], sizes = [1, 256], strides = [1, 1]} : vector<1x768xf32> to vector<1x256xf32>
    %138 = arith.addf %136, %137 : vector<1x256xf32>
    %139 = arith.negf %138 : vector<1x256xf32>
    %140 = math.exp %139 : vector<1x256xf32>
    %cst_32 = arith.constant 1.000000e+00 : f32
    %141 = vector.broadcast %cst_32 : f32 to vector<1x256xf32>
    %142 = arith.addf %141, %140 : vector<1x256xf32>
    %143 = arith.divf %141, %142 : vector<1x256xf32>
    %144 = vector.extract_strided_slice %127 {offsets = [0, 512], sizes = [1, 256], strides = [1, 1]} : vector<1x768xf32> to vector<1x256xf32>
    %145 = vector.extract_strided_slice %126 {offsets = [0, 512], sizes = [1, 256], strides = [1, 1]} : vector<1x768xf32> to vector<1x256xf32>
    %146 = arith.mulf %135, %145 : vector<1x256xf32>
    %147 = arith.addf %144, %146 : vector<1x256xf32>
    %148 = math.tanh %147 : vector<1x256xf32>
    %cst_33 = arith.constant 1.000000e+00 : f32
    %149 = vector.broadcast %cst_33 : f32 to vector<1x256xf32>
    %150 = arith.subf %149, %143 : vector<1x256xf32>
    %151 = arith.mulf %150, %148 : vector<1x256xf32>
    %152 = arith.mulf %143, %123 : vector<1x256xf32>
    %153 = arith.addf %151, %152 : vector<1x256xf32>
    %154 = arith.truncf %153 : vector<1x256xf32> to vector<1x256xbf16>
    %cst_34 = arith.constant dense<0.000000e+00> : vector<1x768xf32>
    %155 = tpu.matmul %154, %31, %cst_34 {dimension_numbers = #tpu.dot_dimension_numbers<[1], [0], [0], [1], [0, 0, 1, 1], [], []>} : vector<1x256xbf16>, vector<256x768xbf16>, vector<1x768xf32> -> vector<1x768xf32>
    %156 = arith.addf %155, %32 : vector<1x768xf32>
    %157 = vector.extract_strided_slice %30 {offsets = [4, 0], sizes = [1, 768], strides = [1, 1]} : vector<8x768xf32> to vector<1x768xf32>
    %158 = vector.extract_strided_slice %157 {offsets = [0, 0], sizes = [1, 256], strides = [1, 1]} : vector<1x768xf32> to vector<1x256xf32>
    %159 = vector.extract_strided_slice %156 {offsets = [0, 0], sizes = [1, 256], strides = [1, 1]} : vector<1x768xf32> to vector<1x256xf32>
    %160 = arith.addf %158, %159 : vector<1x256xf32>
    %161 = arith.negf %160 : vector<1x256xf32>
    %162 = math.exp %161 : vector<1x256xf32>
    %cst_35 = arith.constant 1.000000e+00 : f32
    %163 = vector.broadcast %cst_35 : f32 to vector<1x256xf32>
    %164 = arith.addf %163, %162 : vector<1x256xf32>
    %165 = arith.divf %163, %164 : vector<1x256xf32>
    %166 = vector.extract_strided_slice %157 {offsets = [0, 256], sizes = [1, 256], strides = [1, 1]} : vector<1x768xf32> to vector<1x256xf32>
    %167 = vector.extract_strided_slice %156 {offsets = [0, 256], sizes = [1, 256], strides = [1, 1]} : vector<1x768xf32> to vector<1x256xf32>
    %168 = arith.addf %166, %167 : vector<1x256xf32>
    %169 = arith.negf %168 : vector<1x256xf32>
    %170 = math.exp %169 : vector<1x256xf32>
    %cst_36 = arith.constant 1.000000e+00 : f32
    %171 = vector.broadcast %cst_36 : f32 to vector<1x256xf32>
    %172 = arith.addf %171, %170 : vector<1x256xf32>
    %173 = arith.divf %171, %172 : vector<1x256xf32>
    %174 = vector.extract_strided_slice %157 {offsets = [0, 512], sizes = [1, 256], strides = [1, 1]} : vector<1x768xf32> to vector<1x256xf32>
    %175 = vector.extract_strided_slice %156 {offsets = [0, 512], sizes = [1, 256], strides = [1, 1]} : vector<1x768xf32> to vector<1x256xf32>
    %176 = arith.mulf %165, %175 : vector<1x256xf32>
    %177 = arith.addf %174, %176 : vector<1x256xf32>
    %178 = math.tanh %177 : vector<1x256xf32>
    %cst_37 = arith.constant 1.000000e+00 : f32
    %179 = vector.broadcast %cst_37 : f32 to vector<1x256xf32>
    %180 = arith.subf %179, %173 : vector<1x256xf32>
    %181 = arith.mulf %180, %178 : vector<1x256xf32>
    %182 = arith.mulf %173, %153 : vector<1x256xf32>
    %183 = arith.addf %181, %182 : vector<1x256xf32>
    %184 = arith.truncf %183 : vector<1x256xf32> to vector<1x256xbf16>
    %cst_38 = arith.constant dense<0.000000e+00> : vector<1x768xf32>
    %185 = tpu.matmul %184, %31, %cst_38 {dimension_numbers = #tpu.dot_dimension_numbers<[1], [0], [0], [1], [0, 0, 1, 1], [], []>} : vector<1x256xbf16>, vector<256x768xbf16>, vector<1x768xf32> -> vector<1x768xf32>
    %186 = arith.addf %185, %32 : vector<1x768xf32>
    %187 = vector.extract_strided_slice %30 {offsets = [5, 0], sizes = [1, 768], strides = [1, 1]} : vector<8x768xf32> to vector<1x768xf32>
    %188 = vector.extract_strided_slice %187 {offsets = [0, 0], sizes = [1, 256], strides = [1, 1]} : vector<1x768xf32> to vector<1x256xf32>
    %189 = vector.extract_strided_slice %186 {offsets = [0, 0], sizes = [1, 256], strides = [1, 1]} : vector<1x768xf32> to vector<1x256xf32>
    %190 = arith.addf %188, %189 : vector<1x256xf32>
    %191 = arith.negf %190 : vector<1x256xf32>
    %192 = math.exp %191 : vector<1x256xf32>
    %cst_39 = arith.constant 1.000000e+00 : f32
    %193 = vector.broadcast %cst_39 : f32 to vector<1x256xf32>
    %194 = arith.addf %193, %192 : vector<1x256xf32>
    %195 = arith.divf %193, %194 : vector<1x256xf32>
    %196 = vector.extract_strided_slice %187 {offsets = [0, 256], sizes = [1, 256], strides = [1, 1]} : vector<1x768xf32> to vector<1x256xf32>
    %197 = vector.extract_strided_slice %186 {offsets = [0, 256], sizes = [1, 256], strides = [1, 1]} : vector<1x768xf32> to vector<1x256xf32>
    %198 = arith.addf %196, %197 : vector<1x256xf32>
    %199 = arith.negf %198 : vector<1x256xf32>
    %200 = math.exp %199 : vector<1x256xf32>
    %cst_40 = arith.constant 1.000000e+00 : f32
    %201 = vector.broadcast %cst_40 : f32 to vector<1x256xf32>
    %202 = arith.addf %201, %200 : vector<1x256xf32>
    %203 = arith.divf %201, %202 : vector<1x256xf32>
    %204 = vector.extract_strided_slice %187 {offsets = [0, 512], sizes = [1, 256], strides = [1, 1]} : vector<1x768xf32> to vector<1x256xf32>
    %205 = vector.extract_strided_slice %186 {offsets = [0, 512], sizes = [1, 256], strides = [1, 1]} : vector<1x768xf32> to vector<1x256xf32>
    %206 = arith.mulf %195, %205 : vector<1x256xf32>
    %207 = arith.addf %204, %206 : vector<1x256xf32>
    %208 = math.tanh %207 : vector<1x256xf32>
    %cst_41 = arith.constant 1.000000e+00 : f32
    %209 = vector.broadcast %cst_41 : f32 to vector<1x256xf32>
    %210 = arith.subf %209, %203 : vector<1x256xf32>
    %211 = arith.mulf %210, %208 : vector<1x256xf32>
    %212 = arith.mulf %203, %183 : vector<1x256xf32>
    %213 = arith.addf %211, %212 : vector<1x256xf32>
    %214 = arith.truncf %213 : vector<1x256xf32> to vector<1x256xbf16>
    %cst_42 = arith.constant dense<0.000000e+00> : vector<1x768xf32>
    %215 = tpu.matmul %214, %31, %cst_42 {dimension_numbers = #tpu.dot_dimension_numbers<[1], [0], [0], [1], [0, 0, 1, 1], [], []>} : vector<1x256xbf16>, vector<256x768xbf16>, vector<1x768xf32> -> vector<1x768xf32>
    %216 = arith.addf %215, %32 : vector<1x768xf32>
    %217 = vector.extract_strided_slice %30 {offsets = [6, 0], sizes = [1, 768], strides = [1, 1]} : vector<8x768xf32> to vector<1x768xf32>
    %218 = vector.extract_strided_slice %217 {offsets = [0, 0], sizes = [1, 256], strides = [1, 1]} : vector<1x768xf32> to vector<1x256xf32>
    %219 = vector.extract_strided_slice %216 {offsets = [0, 0], sizes = [1, 256], strides = [1, 1]} : vector<1x768xf32> to vector<1x256xf32>
    %220 = arith.addf %218, %219 : vector<1x256xf32>
    %221 = arith.negf %220 : vector<1x256xf32>
    %222 = math.exp %221 : vector<1x256xf32>
    %cst_43 = arith.constant 1.000000e+00 : f32
    %223 = vector.broadcast %cst_43 : f32 to vector<1x256xf32>
    %224 = arith.addf %223, %222 : vector<1x256xf32>
    %225 = arith.divf %223, %224 : vector<1x256xf32>
    %226 = vector.extract_strided_slice %217 {offsets = [0, 256], sizes = [1, 256], strides = [1, 1]} : vector<1x768xf32> to vector<1x256xf32>
    %227 = vector.extract_strided_slice %216 {offsets = [0, 256], sizes = [1, 256], strides = [1, 1]} : vector<1x768xf32> to vector<1x256xf32>
    %228 = arith.addf %226, %227 : vector<1x256xf32>
    %229 = arith.negf %228 : vector<1x256xf32>
    %230 = math.exp %229 : vector<1x256xf32>
    %cst_44 = arith.constant 1.000000e+00 : f32
    %231 = vector.broadcast %cst_44 : f32 to vector<1x256xf32>
    %232 = arith.addf %231, %230 : vector<1x256xf32>
    %233 = arith.divf %231, %232 : vector<1x256xf32>
    %234 = vector.extract_strided_slice %217 {offsets = [0, 512], sizes = [1, 256], strides = [1, 1]} : vector<1x768xf32> to vector<1x256xf32>
    %235 = vector.extract_strided_slice %216 {offsets = [0, 512], sizes = [1, 256], strides = [1, 1]} : vector<1x768xf32> to vector<1x256xf32>
    %236 = arith.mulf %225, %235 : vector<1x256xf32>
    %237 = arith.addf %234, %236 : vector<1x256xf32>
    %238 = math.tanh %237 : vector<1x256xf32>
    %cst_45 = arith.constant 1.000000e+00 : f32
    %239 = vector.broadcast %cst_45 : f32 to vector<1x256xf32>
    %240 = arith.subf %239, %233 : vector<1x256xf32>
    %241 = arith.mulf %240, %238 : vector<1x256xf32>
    %242 = arith.mulf %233, %213 : vector<1x256xf32>
    %243 = arith.addf %241, %242 : vector<1x256xf32>
    %244 = arith.truncf %243 : vector<1x256xf32> to vector<1x256xbf16>
    %cst_46 = arith.constant dense<0.000000e+00> : vector<1x768xf32>
    %245 = tpu.matmul %244, %31, %cst_46 {dimension_numbers = #tpu.dot_dimension_numbers<[1], [0], [0], [1], [0, 0, 1, 1], [], []>} : vector<1x256xbf16>, vector<256x768xbf16>, vector<1x768xf32> -> vector<1x768xf32>
    %246 = arith.addf %245, %32 : vector<1x768xf32>
    %247 = vector.extract_strided_slice %30 {offsets = [7, 0], sizes = [1, 768], strides = [1, 1]} : vector<8x768xf32> to vector<1x768xf32>
    %248 = vector.extract_strided_slice %247 {offsets = [0, 0], sizes = [1, 256], strides = [1, 1]} : vector<1x768xf32> to vector<1x256xf32>
    %249 = vector.extract_strided_slice %246 {offsets = [0, 0], sizes = [1, 256], strides = [1, 1]} : vector<1x768xf32> to vector<1x256xf32>
    %250 = arith.addf %248, %249 : vector<1x256xf32>
    %251 = arith.negf %250 : vector<1x256xf32>
    %252 = math.exp %251 : vector<1x256xf32>
    %cst_47 = arith.constant 1.000000e+00 : f32
    %253 = vector.broadcast %cst_47 : f32 to vector<1x256xf32>
    %254 = arith.addf %253, %252 : vector<1x256xf32>
    %255 = arith.divf %253, %254 : vector<1x256xf32>
    %256 = vector.extract_strided_slice %247 {offsets = [0, 256], sizes = [1, 256], strides = [1, 1]} : vector<1x768xf32> to vector<1x256xf32>
    %257 = vector.extract_strided_slice %246 {offsets = [0, 256], sizes = [1, 256], strides = [1, 1]} : vector<1x768xf32> to vector<1x256xf32>
    %258 = arith.addf %256, %257 : vector<1x256xf32>
    %259 = arith.negf %258 : vector<1x256xf32>
    %260 = math.exp %259 : vector<1x256xf32>
    %cst_48 = arith.constant 1.000000e+00 : f32
    %261 = vector.broadcast %cst_48 : f32 to vector<1x256xf32>
    %262 = arith.addf %261, %260 : vector<1x256xf32>
    %263 = arith.divf %261, %262 : vector<1x256xf32>
    %264 = vector.extract_strided_slice %247 {offsets = [0, 512], sizes = [1, 256], strides = [1, 1]} : vector<1x768xf32> to vector<1x256xf32>
    %265 = vector.extract_strided_slice %246 {offsets = [0, 512], sizes = [1, 256], strides = [1, 1]} : vector<1x768xf32> to vector<1x256xf32>
    %266 = arith.mulf %255, %265 : vector<1x256xf32>
    %267 = arith.addf %264, %266 : vector<1x256xf32>
    %268 = math.tanh %267 : vector<1x256xf32>
    %cst_49 = arith.constant 1.000000e+00 : f32
    %269 = vector.broadcast %cst_49 : f32 to vector<1x256xf32>
    %270 = arith.subf %269, %263 : vector<1x256xf32>
    %271 = arith.mulf %270, %268 : vector<1x256xf32>
    %272 = arith.mulf %263, %243 : vector<1x256xf32>
    %273 = arith.addf %271, %272 : vector<1x256xf32>
    %274 = tpu.concatenate %63, %93, %123, %153, %183, %213, %243, %273 in 0 : vector<1x256xf32>, vector<1x256xf32>, vector<1x256xf32>, vector<1x256xf32>, vector<1x256xf32>, vector<1x256xf32>, vector<1x256xf32>, vector<1x256xf32> -> vector<8x256xf32>
    %c0_50 = arith.constant 0 : index
    %c0_51 = arith.constant 0 : index
    %275 = vector.load %arg7[%c0_50, %c0_51] : memref<8x256xf32, #tpu.memory_space<vmem>>, vector<8x256xf32>
    tpu.vector_store %arg7[%c0_50, %c0_51], %274 {strides = array<i32>} : memref<8x256xf32, #tpu.memory_space<vmem>>, vector<8x256xf32>,
    return
  }
}

</mosaic_0001>

<bundles_post_ra>
// kernel: tpu_custom_call.1
= control target key start
LH: loop header
LB: loop body
LE: loop exit
PB: predicated region body
PF: predicated region fallthrough
CT: control target
= control target key end

     0   :  { %12 = vsyncpa [#allocation5], 0  ;;  %s6060_s0 = inlined_call_operand.hbm [shape: s32[8], index: 0, kind: input, shape index: {}]   ;;  %s6061_s1 = inlined_call_operand.hbm [shape: f32[64,256], index: 1, kind: input, shape index: {}]   ;;  %s6062_s2 = inlined_call_operand.hbm [shape: bf16[256,768], index: 2, kind: input, shape index: {}]   ;;  %s6063_s3 = inlined_call_operand.hbm [shape: bf16[256,768], index: 3, kind: input, shape index: {}]   ;;  %s6064_s4 = inlined_call_operand.vmem [shape: f32[1,768], index: 4, kind: input, shape index: {}]   ;;  %s6065_s5 = inlined_call_operand.vmem [shape: f32[1,768], index: 5, kind: input, shape index: {}]   ;;  %s6066_s6 = inlined_call_operand.vmem [shape: f32[1,256], index: 6, kind: input, shape index: {}]   ;;  %s6067_s7 = inlined_call_operand.hbm [shape: f32[8,256], index: 7, kind: output, shape index: {}]  }
   0x1   :  { %13 = vsyncpa [#allocation3], 0 }
   0x2   :  { %14 = vsyncpa [#allocation8], 0 }
   0x3   :  { %15 = vsyncpa [#allocation4], 0  ;;  %s4238_s24 = smov [#allocation7]   ;;  %s4132_s28 = scalar_lea.hbm %s6062_s2, 12288 }
   0x4   :  { %s41_s25 = sshll.u32 %s4238_s24, 4  ;;  %p4133_p0 = scmp.ne.s32.totalorder %s6062_s2, %s4132_s28  ;;  %s42_s25 = int_to_ptr.vmem [resolvable:$true] %s41_s25 }
   0x5   :  { %p4136_p1 = scmp.lt.u32.totalorder %s4132_s28, %s6062_s2 }
   0x7   :  { %p4138_p2 = pnand %p4136_p1, %p4133_p0 }
   0x9   :  { %4141 = shalt.err (!%p4138_p2)
}
   0xa   :  { %s4142_s10 = scalar_lea.vmem %s42_s25, 12288  ;;  %p4147_p4 = scmp.lt.s32.totalorder %s42_s25, %s42_s25 }
   0xb   :  { %p4143_p3 = scmp.ne.s32.totalorder %s42_s25, %s4142_s10  ;;  %p4148_p5 = scmp.lt.s32.totalorder %s4142_s10, %s4142_s10 }
   0xd   :  { %p4149_p6 = por %p4148_p5, %p4147_p4 }
   0xf   :  { %p4150_p7 = pnand %p4149_p6, %p4143_p3 }
  0x11   :  { %4153 = shalt.err (!%p4150_p7)
}
  0x12   :  { %s4239_s11 = smov 384   ;;  %s4240_s12 = smov 24  }
  0x13   :  { %47 = dma.hbm_to_vmem [thread:$0]  %s6062_s2, 12288, %s42_s25, [#allocation8], %s4239_s11, %s4239_s11, %s4240_s12  }
  0x14   :  { %s4154_s17 = scalar_lea.hbm %s6060_s0, 16 }
  0x15   :  { %p4155_p8 = scmp.ne.s32.totalorder %s6060_s0, %s4154_s17  ;;  %p4158_p9 = scmp.lt.u32.totalorder %s4154_s17, %s6060_s0 }
  0x17   :  { %p4160_p10 = pnand %p4158_p9, %p4155_p8 }
  0x19   :  { %4163 = shalt.err (!%p4160_p10)
}
  0x1a   :  { %s4241_s22 = smov [#allocation2]   ;;  %s4242_s2 = smov [#allocation6]  }
  0x1b   :  { %23 = dma.hbm_to_smem %s6060_s0, 16, %s4241_s22, [#allocation5]  }
  0x1c   :  { %s29_s25 = sshll.u32 %s4242_s2, 4  ;;  %s4164_s28 = scalar_lea.hbm %s6061_s1, 2048  ;;  %s30_s25 = int_to_ptr.vmem [resolvable:$true] %s29_s25 }
  0x1d   :  { %p4165_p11 = scmp.ne.s32.totalorder %s6061_s1, %s4164_s28  ;;  %p4168_p12 = scmp.lt.u32.totalorder %s4164_s28, %s6061_s1 }
  0x1f   :  { %p4170_p13 = pnand %p4168_p12, %p4165_p11 }
  0x21   :  { %4173 = shalt.err (!%p4170_p13)
}
  0x22   :  { %s4174_s10 = scalar_lea.vmem %s30_s25, 2048  ;;  %p4179_p1 = scmp.lt.s32.totalorder %s30_s25, %s30_s25 }
  0x23   :  { %p4175_p0 = scmp.ne.s32.totalorder %s30_s25, %s4174_s10  ;;  %p4180_p2 = scmp.lt.s32.totalorder %s4174_s10, %s4174_s10 }
  0x25   :  { %p4181_p3 = por %p4180_p2, %p4179_p1 }
  0x27   :  { %p4182_p4 = pnand %p4181_p3, %p4175_p0 }
  0x29   :  { %4185 = shalt.err (!%p4182_p4)
}
  0x2a   :  { %s4243_s0 = smov 256   ;;  %s4244_s13 = smov 16  }
  0x2b   :  { %35 = dma.hbm_to_vmem [thread:$0]  %s6061_s1, 2048, %s30_s25, [#allocation3], %s4243_s0, %s4243_s0, %s4244_s13  }
  0x2c   :  { %s4245_s16 = smov [#allocation9]   ;;  %s4186_s20 = scalar_lea.hbm %s6063_s3, 12288 }
  0x2d   :  { %s53_s17 = sshll.u32 %s4245_s16, 4  ;;  %p4187_p5 = scmp.ne.s32.totalorder %s6063_s3, %s4186_s20  ;;  %s54_s17 = int_to_ptr.vmem [resolvable:$true] %s53_s17 }
  0x2e   :  { %p4190_p6 = scmp.lt.u32.totalorder %s4186_s20, %s6063_s3 }
  0x30   :  { %p4192_p7 = pnand %p4190_p6, %p4187_p5 }
  0x32   :  { %4195 = shalt.err (!%p4192_p7)
}
  0x33   :  { %s4196_s2 = scalar_lea.vmem %s54_s17, 12288  ;;  %p4201_p9 = scmp.lt.s32.totalorder %s54_s17, %s54_s17 }
  0x34   :  { %p4197_p8 = scmp.ne.s32.totalorder %s54_s17, %s4196_s2  ;;  %p4202_p10 = scmp.lt.s32.totalorder %s4196_s2, %s4196_s2 }
  0x36   :  { %p4203_p11 = por %p4202_p10, %p4201_p9 }
  0x38   :  { %p4204_p12 = pnand %p4203_p11, %p4197_p8 }
  0x3a   :  { %4207 = shalt.err (!%p4204_p12)
}
  0x3b   :  { %59 = dma.hbm_to_vmem [thread:$0]  %s6063_s3, 12288, %s54_s17, [#allocation8], %s4239_s11, %s4239_s11, %s4240_s12  }
  0x3c   :  { %4230 = dma.done.wait [#allocation5], 16  }
  0x3d   :  { %4231 = vsyncadd [#allocation5], 4294967280 }
  0x3e   :  { %4232 = dma.done.wait [#allocation3], 2048  }
  0x3f   :  { %4233 = vsyncadd [#allocation3], 4294965248 }
  0x40   :  { %4234 = dma.done.wait [#allocation8], 24576  }
  0x41   :  { %4235 = vsyncadd [#allocation8], 4294942720 }
  0x42   :  { %78 = sfence }
  0x43   :  { %v3492_v0 = vld [vmem:[#allocation7 + $0x4] ss:$24 sps:$4 sm:$0xff]   ;;  %v3496_v2 = vld [vmem:[#allocation7] ss:$24 sps:$4 sm:$0xff]   ;;  %v3498_v4 = vld [vmem:[#allocation7 + $0x34] ss:$24 sps:$4 sm:$0xff]   ;;  %v160_v34 = vlaneseq }
  0x44   :  { %v3494_v1 = vld [vmem:[#allocation7 + $0xc] ss:$24 sps:$4 sm:$0xff]   ;;  %878 = vmatprep.subr.bf16.mxu0 %v3492_v0  ;;  %v3497_v3 = vld [vmem:[#allocation7 + $0x8] ss:$24 sps:$4 sm:$0xff]   ;;  %v3500_v5 = vld [vmem:[#allocation7 + $0x3c] ss:$24 sps:$4 sm:$0xff]  }
  0x45   :  { %919 = vmatprep.subr.bf16.mxu1 %v3494_v1  ;;  %879 = vmatpush1.bf16.msra.mxu0 %v3496_v2  ;;  %v3502_v6 = vld [vmem:[#allocation7 + $0x30] ss:$24 sps:$4 sm:$0xff]   ;;  %v3504_v8 = vld [vmem:[#allocation7 + $0x64] ss:$24 sps:$4 sm:$0xff]   ;;  %v3508_v10 = vld [vmem:[#allocation7 + $0x60] ss:$24 sps:$4 sm:$0xff]  }
  0x46   :  { %920 = vmatpush1.bf16.msra.mxu1 %v3497_v3  ;;  %880 = vmatprep.subr.bf16.mxu0 %v3498_v4  ;;  %v3503_v7 = vld [vmem:[#allocation7 + $0x38] ss:$24 sps:$4 sm:$0xff]   ;;  %v3506_v9 = vld [vmem:[#allocation7 + $0x6c] ss:$24 sps:$4 sm:$0xff]   ;;  %v3509_v11 = vld [vmem:[#allocation7 + $0x68] ss:$24 sps:$4 sm:$0xff]  }
  0x47   :  { %921 = vmatprep.subr.bf16.mxu1 %v3500_v5  ;;  %v3510_v12 = vld [vmem:[#allocation7 + $0x94] ss:$24 sps:$4 sm:$0xff]   ;;  %s4341_s3 = sld [smem:[#allocation2]]  ;;  %v3514_v14 = vld [vmem:[#allocation7 + $0x90] ss:$24 sps:$4 sm:$0xff]   ;;  %s4343_s11 = sld [smem:[#allocation2 + $0x1]] }
  0x48   :  { %v3512_v13 = vld [vmem:[#allocation7 + $0x9c] ss:$24 sps:$4 sm:$0xff]   ;;  %v3515_v15 = vld [vmem:[#allocation7 + $0x98] ss:$24 sps:$4 sm:$0xff]   ;;  %v3518_v17 = vld [vmem:[#allocation7 + $0xcc] ss:$24 sps:$4 sm:$0xff]  }
  0x49   :  { %881 = vmatpush1.bf16.msra.mxu0 %v3502_v6  ;;  %v3516_v16 = vld [vmem:[#allocation7 + $0xc4] ss:$24 sps:$4 sm:$0xff]   ;;  %s4345_s12 = sld [smem:[#allocation2 + $0x2]]  ;;  %v3520_v18 = vld [vmem:[#allocation7 + $0xc0] ss:$24 sps:$4 sm:$0xff]   ;;  %s4348_s27 = sld [smem:[#allocation2 + $0x3]] }
  0x4a   :  { %922 = vmatpush1.bf16.msra.mxu1 %v3503_v7  ;;  %882 = vmatprep.subr.bf16.mxu0 %v3504_v8  ;;  %v3521_v19 = vld [vmem:[#allocation7 + $0xc8] ss:$24 sps:$4 sm:$0xff]   ;;  %v3522_v20 = vld [vmem:[#allocation7 + $0xf4] ss:$24 sps:$4 sm:$0xff]   ;;  %v3527_v23 = vld [vmem:[#allocation7 + $0xf8] ss:$24 sps:$4 sm:$0xff]  }
  0x4b   :  { %923 = vmatprep.subr.bf16.mxu1 %v3506_v9  ;;  %v3524_v21 = vld [vmem:[#allocation7 + $0xfc] ss:$24 sps:$4 sm:$0xff]   ;;  %v3526_v22 = vld [vmem:[#allocation7 + $0xf0] ss:$24 sps:$4 sm:$0xff]   ;;  %v3530_v25 = vld [vmem:[#allocation7 + $0x12c] ss:$24 sps:$4 sm:$0xff]  }
  0x4c   :  { %v3528_v24 = vld [vmem:[#allocation7 + $0x124] ss:$24 sps:$4 sm:$0xff]   ;;  %s4354_s0 = sld [smem:[#allocation2 + $0x4]]  ;;  %v3532_v26 = vld [vmem:[#allocation7 + $0x120] ss:$24 sps:$4 sm:$0xff]   ;;  %s4356_s13 = sld [smem:[#allocation2 + $0x5]] }
  0x4d   :  { %883 = vmatpush1.bf16.msra.mxu0 %v3508_v10  ;;  %s80_s26 = sshra.s32 %s4341_s3, 3  ;;  %s83_s28 = sand.u32 7, %s4341_s3  ;;  %v3533_v27 = vld [vmem:[#allocation7 + $0x128] ss:$24 sps:$4 sm:$0xff]   ;;  %v3534_v28 = vld [vmem:[#allocation7 + $0x154] ss:$24 sps:$4 sm:$0xff]  }
  0x4e   :  { %924 = vmatpush1.bf16.msra.mxu1 %v3509_v11  ;;  %884 = vmatprep.subr.bf16.mxu0 %v3510_v12  ;;  %s90_s29 = sshra.s32 %s4343_s11, 3  ;;  %s3475_s30 = sshll.u32 %s80_s26, 4  ;;  %v3536_v29 = vld [vmem:[#allocation7 + $0x15c] ss:$24 sps:$4 sm:$0xff]   ;;  %v3538_v30 = vld [vmem:[#allocation7 + $0x150] ss:$24 sps:$4 sm:$0xff]  }
  0x4f   :  { %925 = vmatprep.subr.bf16.mxu1 %v3512_v13  ;;  %s93_s8 = sand.u32 7, %s4343_s11  ;;  %s100_s9 = sshra.s32 %s4345_s12, 3  ;;  %v3539_v31 = vld [vmem:[#allocation7 + $0x158] ss:$24 sps:$4 sm:$0xff]   ;;  %v3540_v32 = vld [vmem:[#allocation7 + $0x184] ss:$24 sps:$4 sm:$0xff]  }
  0x50   :  { %s3476_s10 = sshll.u32 %s90_s29, 4  ;;  %s103_s14 = sand.u32 7, %s4345_s12  ;;  %v3542_v33 = vld [vmem:[#allocation7 + $0x18c] ss:$24 sps:$4 sm:$0xff]   ;;  %v3544_v35 = vld [vmem:[#allocation7 + $0x180] ss:$24 sps:$4 sm:$0xff]  }
  0x51   :  { %885 = vmatpush1.bf16.msra.mxu0 %v3514_v14  ;;  %s3477_s15 = sshll.u32 %s100_s9, 4  ;;  %s4359_s16 = sadd.s32 %s3475_s30, %s83_s28  ;;  %v3545_v36 = vld [vmem:[#allocation7 + $0x188] ss:$24 sps:$4 sm:$0xff]   ;;  %v3546_v37 = vld [vmem:[#allocation7 + $0x1b4] ss:$24 sps:$4 sm:$0xff]   ;;  %v4376_v40 = vshrl.u32 %v160_v34, 7 }
  0x52   :  { %926 = vmatpush1.bf16.msra.mxu1 %v3515_v15  ;;  %886 = vmatprep.subr.bf16.mxu0 %v3516_v16  ;;  %s4361_s17 = sld [smem:[#allocation2 + $0x6]]  ;;  %s4363_s18 = sadd.s32 %s3476_s10, %s93_s8  ;;  %v3548_v38 = vld [vmem:[#allocation7 + $0x1bc] ss:$24 sps:$4 sm:$0xff]   ;;  %v3550_v39 = vld [vmem:[#allocation7 + $0x1b0] ss:$24 sps:$4 sm:$0xff]   ;;  %vm247_vm0 = vcmask 1040384  }
  0x53   :  { %927 = vmatprep.subr.bf16.mxu1 %v3518_v17  ;;  %s4365_s19 = sadd.s32 %s3477_s15, %s103_s14  ;;  %s4367_s20 = sld [smem:[#allocation2 + $0x7]]  ;;  %6321 = vst [vmem:[#allocation15_spill] sm:$0xff] %v4376_v40  ;;  %v3551_v41 = vld [vmem:[#allocation7 + $0x1b8] ss:$24 sps:$4 sm:$0xff]   ;;  %v3552_v42 = vld [vmem:[#allocation7 + $0x1e4] ss:$24 sps:$4 sm:$0xff]  }
  0x54   :  { %s110_s21 = sshra.s32 %s4348_s27, 3  ;;  %s120_s22 = sshra.s32 %s4354_s0, 3  ;;  %v3554_v43 = vld [vmem:[#allocation7 + $0x1ec] ss:$24 sps:$4 sm:$0xff]   ;;  %v4388_v44 = vsub.s32 1, %v4376_v40  ;;  %vm250_vm1 = vcmask 1041408  }
  0x55   :  { %887 = vmatpush1.bf16.msra.mxu0 %v3520_v18  ;;  %s113_s23 = sand.u32 7, %s4348_s27  ;;  %s130_s24 = sshra.s32 %s4356_s13, 3  ;;  %v3556_v45 = vld [vmem:[#allocation7 + $0x1e0] ss:$24 sps:$4 sm:$0xff]   ;;  %vm253_vm2 = vcmask 1042432   ;;  %v4395_v48 = vsub.s32 0, %v4376_v40 }
  0x56   :  { %928 = vmatpush1.bf16.msra.mxu1 %v3521_v19  ;;  %888 = vmatprep.subr.bf16.mxu0 %v3522_v20  ;;  %s3478_s2 = sshll.u32 %s110_s21, 4  ;;  %s123_s1 = sand.u32 7, %s4354_s0  ;;  %6322 = vst [vmem:[#allocation16_spill] sm:$0xff] %v4388_v44  ;;  %v3557_v46 = vld [vmem:[#allocation7 + $0x1e8] ss:$24 sps:$4 sm:$0xff]   ;;  %vm256_vm3 = vcmask 1043456  }
  0x57   :  { %929 = vmatprep.subr.bf16.mxu1 %v3524_v21  ;;  %s3479_s25 = sshll.u32 %s120_s22, 4  ;;  %s133_s11 = sand.u32 7, %s4356_s13  ;;  %v3558_v47 = vld [vmem:[#allocation7 + $0x214] ss:$24 sps:$4 sm:$0xff]   ;;  %6323 = vst [vmem:[#allocation17_spill] sm:$0xff] %v4395_v48  ;;  %vm259_vm4 = vcmask 1044480  }
  0x58   :  { %s140_s3 = sshra.s32 %s4361_s17, 3  ;;  %s3480_s12 = sshll.u32 %s130_s24, 4  ;;  %v3560_v49 = vld [vmem:[#allocation7 + $0x21c] ss:$24 sps:$4 sm:$0xff]   ;;  %v3562_v50 = vld [vmem:[#allocation7 + $0x210] ss:$24 sps:$4 sm:$0xff]  }
  0x59   :  { %889 = vmatpush1.bf16.msra.mxu0 %v3526_v22  ;;  %s143_s26 = sand.u32 7, %s4361_s17  ;;  %s150_s27 = sshra.s32 %s4367_s20, 3  ;;  %v3563_v51 = vld [vmem:[#allocation7 + $0x218] ss:$24 sps:$4 sm:$0xff]   ;;  %v3564_v52 = vld [vmem:[#allocation7 + $0x244] ss:$24 sps:$4 sm:$0xff]  }
  0x5a   :  { %930 = vmatpush1.bf16.msra.mxu1 %v3527_v23  ;;  %890 = vmatprep.subr.bf16.mxu0 %v3528_v24  ;;  %s3481_s28 = sshll.u32 %s140_s3, 4  ;;  %s153_s29 = sand.u32 7, %s4367_s20  ;;  %v3566_v53 = vld [vmem:[#allocation7 + $0x24c] ss:$24 sps:$4 sm:$0xff]   ;;  %v3568_v7 = vld [vmem:[#allocation7 + $0x240] ss:$24 sps:$4 sm:$0xff]  }
  0x5b   :  { %931 = vmatprep.subr.bf16.mxu1 %v3530_v25  ;;  %s4381_s30 = sadd.s32 %s3478_s2, %s113_s23  ;;  %s3482_s8 = sshll.u32 %s150_s27, 4  ;;  %v3569_v8 = vld [vmem:[#allocation7 + $0x248] ss:$24 sps:$4 sm:$0xff]   ;;  %v3570_v12 = vld [vmem:[#allocation7 + $0x274] ss:$24 sps:$4 sm:$0xff]   ;;  %vm262_vm5 = vcmask 1045504  }
  0x5c   :  { %s4383_s9 = sadd.s32 %s3479_s25, %s123_s1  ;;  %s4385_s10 = sadd.s32 %s3480_s12, %s133_s11  ;;  %v3572_v16 = vld [vmem:[#allocation7 + $0x27c] ss:$24 sps:$4 sm:$0xff]   ;;  %vm265_vm6 = vcmask 1046528   ;;  %v3574_v22 = vld [vmem:[#allocation7 + $0x270] ss:$24 sps:$4 sm:$0xff]  }
  0x5d   :  { %891 = vmatpush1.bf16.msra.mxu0 %v3532_v26  ;;  %s4390_s0 = sadd.s32 %s3481_s28, %s143_s26  ;;  %s4392_s13 = sadd.s32 %s3482_s8, %s153_s29  ;;  %v3575_v23 = vld [vmem:[#allocation7 + $0x278] ss:$24 sps:$4 sm:$0xff]   ;;  %v3576_v26 = vld [vmem:[#allocation7 + $0x2a4] ss:$24 sps:$4 sm:$0xff]  }
  0x5e   :  { %932 = vmatpush1.bf16.msra.mxu1 %v3533_v27  ;;  %892 = vmatprep.subr.bf16.mxu0 %v3534_v28  ;;  %s87_s14 = scalar_lea.vmem [#allocation6], %s4359_s16  ;;  %s97_s15 = scalar_lea.vmem [#allocation6], %s4363_s18  ;;  %v3580_v34 = vld [vmem:[#allocation7 + $0x2a0] ss:$24 sps:$4 sm:$0xff]   ;;  %v4693_v40 = vld [vmem:[#allocation9 + $0x224] ss:$24 sps:$4 sm:$0xff]  }
  0x5f   :  { %933 = vmatprep.subr.bf16.mxu1 %v3536_v29  ;;  %v88_v54 = vld [vmem:[%s87_s14] ss:$8 sm:$0x3]  ;;  %s107_s17 = scalar_lea.vmem [#allocation6], %s4365_s19  ;;  %s117_s20 = scalar_lea.vmem [#allocation6], %s4381_s30  ;;  %6371 = vst [vmem:[#allocation65_spill] sm:$0xff] %v4693_v40 }
  0x60   :  { %v98_v55 = vld [vmem:[%s97_s15] ss:$8 sm:$0x3]  ;;  %v167_v58 = vrot.slane %v88_v54, %v4388_v44  ;;  %s127_s21 = scalar_lea.vmem [#allocation6], %s4383_s9  ;;  %s137_s16 = scalar_lea.vmem [#allocation6], %s4385_s10  ;;  %v163_v0 = vrot.slane %v88_v54, %v4395_v48 }
  0x61   :  { %893 = vmatpush1.bf16.msra.mxu0 %v3538_v30  ;;  %v108_v56 = vld [vmem:[%s107_s17] ss:$8 sm:$0x3]  ;;  %v178_v59 = vrot.slane %v98_v55, %v4388_v44  ;;  %s147_s18 = scalar_lea.vmem [#allocation6], %s4390_s0  ;;  %s157_s19 = scalar_lea.vmem [#allocation6], %s4392_s13  ;;  %v174_v6 = vrot.slane %v98_v55, %v4395_v48 }
  0x62   :  { %934 = vmatpush1.bf16.msra.mxu1 %v3539_v31  ;;  %894 = vmatprep.subr.bf16.mxu0 %v3540_v32  ;;  %v118_v57 = vld [vmem:[%s117_s20] ss:$8 sm:$0x3]  ;;  %v189_v62 = vrot.slane %v108_v56, %v4388_v44  ;;  %v185_v11 = vrot.slane %v108_v56, %v4395_v48  ;;  %v3578_v29 = vld [vmem:[#allocation7 + $0x2ac] ss:$24 sps:$4 sm:$0xff]  }
  0x63   :  { %935 = vmatprep.subr.bf16.mxu1 %v3542_v33  ;;  %v128_v60 = vld [vmem:[%s127_s21] ss:$8 sm:$0x3]  ;;  %v200_v63 = vrot.slane %v118_v57, %v4388_v44  ;;  %v249_v5 = vsel %vm247_vm0, %v167_v58, %v178_v59  ;;  %v196_v15 = vrot.slane %v118_v57, %v4395_v48  ;;  %v248_v21 = vsel %vm247_vm0, %v163_v0, %v174_v6  ;;  %v3602_v55 = vld [vmem:[#allocation7 + $0x74] ss:$24 sps:$4 sm:$0xff]  }
  0x64   :  { %v138_v61 = vld [vmem:[%s137_s16] ss:$8 sm:$0x3]  ;;  %v211_v3 = vrot.slane %v128_v60, %v4388_v44  ;;  %v252_v10 = vsel %vm250_vm1, %v249_v5, %v189_v62  ;;  %v207_v18 = vrot.slane %v128_v60, %v4395_v48  ;;  %v251_v25 = vsel %vm250_vm1, %v248_v21, %v185_v11  ;;  %v4450_v56 = vld [vmem:[#allocation9 + $0x64] ss:$24 sps:$4 sm:$0xff]  }
  0x65   :  { %895 = vmatpush1.bf16.msra.mxu0 %v3544_v35  ;;  %v148_v1 = vld [vmem:[%s147_s18] ss:$8 sm:$0x3]  ;;  %v222_v4 = vrot.slane %v138_v61, %v4388_v44  ;;  %v255_v14 = vsel %vm253_vm2, %v252_v10, %v200_v63  ;;  %v218_v20 = vrot.slane %v138_v61, %v4395_v48  ;;  %v254_v28 = vsel %vm253_vm2, %v251_v25, %v196_v15  ;;  %v4452_v58 = vld [vmem:[#allocation9 + $0x60] ss:$24 sps:$4 sm:$0xff]  }
  0x66   :  { %936 = vmatpush1.bf16.msra.mxu1 %v3545_v36  ;;  %896 = vmatprep.subr.bf16.mxu0 %v3546_v37  ;;  %v158_v2 = vld [vmem:[%s157_s19] ss:$8 sm:$0x3]  ;;  %v233_v9 = vrot.slane %v148_v1, %v4388_v44  ;;  %v258_v17 = vsel %vm256_vm3, %v255_v14, %v211_v3  ;;  %v229_v31 = vrot.slane %v148_v1, %v4395_v48  ;;  %v3582_v36 = vld [vmem:[#allocation7 + $0x2d4] ss:$24 sps:$4 sm:$0xff]  }
  0x67   :  { %937 = vmatprep.subr.bf16.mxu1 %v3548_v38  ;;  %v244_v13 = vrot.slane %v158_v2, %v4388_v44  ;;  %v261_v19 = vsel %vm259_vm4, %v258_v17, %v222_v4  ;;  %v257_v32 = vsel %vm256_vm3, %v254_v28, %v207_v18  ;;  %v3581_v35 = vld [vmem:[#allocation7 + $0x2a8] ss:$24 sps:$4 sm:$0xff]   ;;  %v240_v37 = vrot.slane %v158_v2, %v4395_v48  ;;  %v3584_v38 = vld [vmem:[#allocation7 + $0x2dc] ss:$24 sps:$4 sm:$0xff]  }
  0x68   :  { %v264_v24 = vsel %vm262_vm5, %v261_v19, %v233_v9  ;;  %v260_v33 = vsel %vm259_vm4, %v257_v32, %v218_v20  ;;  %v4446_v54 = vld [vmem:[#allocation9 + $0x30] ss:$24 sps:$4 sm:$0xff]   ;;  %v3608_v59 = vld [vmem:[#allocation7 + $0xa4] ss:$24 sps:$4 sm:$0xff]   ;;  %v4456_v60 = vld [vmem:[#allocation9 + $0x94] ss:$24 sps:$4 sm:$0xff]  }
  0x69   :  { %897 = vmatpush1.bf16.msra.mxu0 %v3550_v39  ;;  %v267_v27 = vsel %vm265_vm6, %v264_v24, %v244_v13  ;;  %v263_v39 = vsel %vm262_vm5, %v260_v33, %v229_v31  ;;  %v3600_v57 = vld [vmem:[#allocation7 + $0x70] ss:$24 sps:$4 sm:$0xff]   ;;  %v3606_v61 = vld [vmem:[#allocation7 + $0xa0] ss:$24 sps:$4 sm:$0xff]   ;;  %v3614_v63 = vld [vmem:[#allocation7 + $0xd4] ss:$24 sps:$4 sm:$0xff]  }
  0x6a   :  { %938 = vmatpush1.bf16.msra.mxu1 %v3551_v41  ;;  %898 = vmatprep.subr.bf16.mxu0 %v3552_v42  ;;  %v269_v30 = vpack.c.bf16 %v267_v27, %v267_v27  ;;  %v3586_v41 = vld [vmem:[#allocation7 + $0x2d0] ss:$24 sps:$4 sm:$0xff]   ;;  %v4462_v0 = vld [vmem:[#allocation9 + $0xc4] ss:$24 sps:$4 sm:$0xff]   ;;  %v4464_v2 = vld [vmem:[#allocation9 + $0xc0] ss:$24 sps:$4 sm:$0xff]  }
  0x6b   :  { %939 = vmatprep.subr.bf16.mxu1 %v3554_v43  ;;  %v3587_v42 = vld [vmem:[#allocation7 + $0x2d8] ss:$24 sps:$4 sm:$0xff]   ;;  %v266_v43 = vsel %vm265_vm6, %v263_v39, %v240_v37  ;;  %v3620_v3 = vld [vmem:[#allocation7 + $0x104] ss:$24 sps:$4 sm:$0xff]   ;;  %v4468_v4 = vld [vmem:[#allocation9 + $0xf4] ss:$24 sps:$4 sm:$0xff]  }
  0x6c   :  { %910 = vmatprep.mubr.bf16.mxu0 %v269_v30  ;;  %951 = vmatprep.mubr.bf16.mxu1 %v269_v30  ;;  %v4458_v62 = vld [vmem:[#allocation9 + $0x90] ss:$24 sps:$4 sm:$0xff]   ;;  %v3618_v5 = vld [vmem:[#allocation7 + $0x100] ss:$24 sps:$4 sm:$0xff]   ;;  %v3632_v11 = vld [vmem:[#allocation7 + $0x164] ss:$24 sps:$4 sm:$0xff]  }
  0x6d   :  { %899 = vmatpush1.bf16.msra.mxu0 %v3556_v45  ;;  %v3590_v45 = vld [vmem:[#allocation7 + $0x14] ss:$24 sps:$4 sm:$0xff]   ;;  %v3612_v1 = vld [vmem:[#allocation7 + $0xd0] ss:$24 sps:$4 sm:$0xff]   ;;  %v4476_v10 = vld [vmem:[#allocation9 + $0x120] ss:$24 sps:$4 sm:$0xff]  }
  0x6e   :  { %940 = vmatpush1.bf16.msra.mxu1 %v3557_v46  ;;  %900 = vmatprep.subr.bf16.mxu0 %v3558_v47  ;;  %v4435_v46 = vld [vmem:[#allocation9 + $0x4] ss:$24 sps:$4 sm:$0xff]   ;;  %v4437_v47 = vpack.c.bf16 %v266_v43, %v266_v43  ;;  %v4470_v6 = vld [vmem:[#allocation9 + $0xf0] ss:$24 sps:$4 sm:$0xff]   ;;  %v3630_v15 = vld [vmem:[#allocation7 + $0x160] ss:$24 sps:$4 sm:$0xff]  }
  0x6f   :  { %941 = vmatprep.subr.bf16.mxu1 %v3560_v49  ;;  %v3588_v49 = vld [vmem:[#allocation7 + $0x10] ss:$24 sps:$4 sm:$0xff]   ;;  %v3638_v17 = vld [vmem:[#allocation7 + $0x194] ss:$24 sps:$4 sm:$0xff]   ;;  %v4499_v19 = vld [vmem:[#allocation9 + $0x184] ss:$24 sps:$4 sm:$0xff]  }
  0x70   :  { %v3624_v9 = vld [vmem:[#allocation7 + $0x130] ss:$24 sps:$4 sm:$0xff]   ;;  %v4503_v21 = vld [vmem:[#allocation9 + $0x180] ss:$24 sps:$4 sm:$0xff]   ;;  %v4512_v27 = vld [vmem:[#allocation9 + $0x1e4] ss:$24 sps:$4 sm:$0xff]  }
  0x71   :  { %901 = vmatpush1.bf16.msra.mxu0 %v3562_v50  ;;  %v4439_v50 = vld [vmem:[#allocation9] ss:$24 sps:$4 sm:$0xff]   ;;  %v4485_v13 = vld [vmem:[%s6066_s6] sm:$0x3]  ;;  %v4518_v31 = vld [vmem:[#allocation9 + $0x214] ss:$24 sps:$4 sm:$0xff]  }
  0x72   :  { %942 = vmatpush1.bf16.msra.mxu1 %v3563_v51  ;;  %902 = vmatprep.subr.bf16.mxu0 %v3564_v52  ;;  %v3596_v51 = vld [vmem:[#allocation7 + $0x44] ss:$24 sps:$4 sm:$0xff]   ;;  %v4442_v52 = vld [vmem:[#allocation9 + $0x34] ss:$24 sps:$4 sm:$0xff]   ;;  %v4489_v14 = vrot.slane %v4485_v13, %v4388_v44  ;;  %v3636_v20 = vld [vmem:[#allocation7 + $0x190] ss:$24 sps:$4 sm:$0xff]  }
  0x73   :  { %943 = vmatprep.subr.bf16.mxu1 %v3566_v53  ;;  %v3594_v53 = vld [vmem:[#allocation7 + $0x40] ss:$24 sps:$4 sm:$0xff]   ;;  %v4508_v25 = vld [vmem:[#allocation9 + $0x1b0] ss:$24 sps:$4 sm:$0xff]   ;;  %v4530_v39 = vld [vmem:[#allocation9 + $0x274] ss:$24 sps:$4 sm:$0xff]  }
  0x74   :  { %6324 = vst [vmem:[#allocation18_spill] sm:$0xff] %v4489_v14  ;;  %v4496_v18 = vpack.c.bf16 %v4489_v14, %v4489_v14  ;;  %v3642_v24 = vld [vmem:[#allocation7 + $0x1c0] ss:$24 sps:$4 sm:$0xff]   ;;  %v3648_v28 = vld [vmem:[#allocation7 + $0x1f0] ss:$24 sps:$4 sm:$0xff]  }
  0x75   :  { %903 = vmatpush1.bf16.msra.mxu0 %v3568_v7  ;;  %v3626_v7 = vld [vmem:[#allocation7 + $0x134] ss:$24 sps:$4 sm:$0xff]   ;;  %v3654_v32 = vld [vmem:[#allocation7 + $0x220] ss:$24 sps:$4 sm:$0xff]   ;;  %v4520_v33 = vld [vmem:[#allocation9 + $0x210] ss:$24 sps:$4 sm:$0xff]  }
  0x76   :  { %944 = vmatpush1.bf16.msra.mxu1 %v3569_v8  ;;  %904 = vmatprep.subr.bf16.mxu0 %v3570_v12  ;;  %v4474_v8 = vld [vmem:[#allocation9 + $0x124] ss:$24 sps:$4 sm:$0xff]   ;;  %v4480_v12 = vld [vmem:[#allocation9 + $0x154] ss:$24 sps:$4 sm:$0xff]   ;;  %v4527_v37 = vld [vmem:[#allocation9 + $0x240] ss:$24 sps:$4 sm:$0xff]  }
  0x77   :  { %945 = vmatprep.subr.bf16.mxu1 %v3572_v16  ;;  %v4491_v16 = vld [vmem:[#allocation9 + $0x150] ss:$24 sps:$4 sm:$0xff]   ;;  %v3674_v43 = vld [vmem:[#allocation7 + $0x2b4] ss:$24 sps:$4 sm:$0xff]   ;;  %v4699_v44 = vld [vmem:[#allocation9 + $0x220] ss:$24 sps:$4 sm:$0xff]  }
  0x78   :  { %v4681_v14 = vld [vmem:[#allocation9 + $0x1f4] ss:$24 sps:$4 sm:$0xff]   ;;  %6373 = vst [vmem:[#allocation67_spill] sm:$0xff] %v4699_v44 }
  0x79   :  { %905 = vmatpush1.bf16.msra.mxu0 %v3574_v22  ;;  %v3644_v22 = vld [vmem:[#allocation7 + $0x1c4] ss:$24 sps:$4 sm:$0xff]   ;;  %6367 = vst [vmem:[#allocation61_spill] sm:$0xff] %v4681_v14 }
  0x7a   :  { %946 = vmatpush1.bf16.msra.mxu1 %v3575_v23  ;;  %906 = vmatprep.subr.bf16.mxu0 %v3576_v26  ;;  %v4506_v23 = vld [vmem:[#allocation9 + $0x1b4] ss:$24 sps:$4 sm:$0xff]  }
  0x7b   :  { %947 = vmatprep.subr.bf16.mxu1 %v3578_v29  ;;  %v3650_v26 = vld [vmem:[#allocation7 + $0x1f4] ss:$24 sps:$4 sm:$0xff]   ;;  %v4515_v29 = vld [vmem:[#allocation9 + $0x1e0] ss:$24 sps:$4 sm:$0xff]  }
  0x7d   :  { %907 = vmatpush1.bf16.msra.mxu0 %v3580_v34  ;;  %v3662_v34 = vld [vmem:[#allocation7 + $0x254] ss:$24 sps:$4 sm:$0xff]  }
  0x7e   :  { %948 = vmatpush1.bf16.msra.mxu1 %v3581_v35  ;;  %908 = vmatprep.subr.bf16.mxu0 %v3582_v36  ;;  %v4524_v35 = vld [vmem:[#allocation9 + $0x244] ss:$24 sps:$4 sm:$0xff]   ;;  %v3660_v36 = vld [vmem:[#allocation7 + $0x250] ss:$24 sps:$4 sm:$0xff]  }
  0x7f   :  { %949 = vmatprep.subr.bf16.mxu1 %v3584_v38  ;;  %v3668_v38 = vld [vmem:[#allocation7 + $0x284] ss:$24 sps:$4 sm:$0xff]  }
  0x81   :  { %909 = vmatpush1.bf16.msra.mxu0 %v3586_v41  ;;  %v3666_v41 = vld [vmem:[#allocation7 + $0x280] ss:$24 sps:$4 sm:$0xff]  }
  0x82   :  { %950 = vmatpush1.bf16.msra.mxu1 %v3587_v42  ;;  %960 = vmatprep.subr.bf16.mxu0 %v3590_v45  ;;  %v4532_v42 = vld [vmem:[#allocation9 + $0x270] ss:$24 sps:$4 sm:$0xff]   ;;  %v4536_v45 = vld [vmem:[#allocation9 + $0x2a4] ss:$24 sps:$4 sm:$0xff]  }
  0x83   :  { %1623 = vmatprep.subr.bf16.mxu1 %v4435_v46  ;;  %6325 = vst [vmem:[#allocation19_spill] sm:$0xff] %v4532_v42  ;;  %6326 = vst [vmem:[#allocation20_spill] sm:$0xff] %v4536_v45 }
  0x84   :  { %911 = vmatmul.mubr.bf16.vlgmr.msra.gmra.mrb[0].mxu0 %v4437_v47 }
  0x85   :  { %952 = vmatmul.mubr.bf16.vlgmr.msra.gmra.mrb[0].mxu1 %v4437_v47  ;;  %961 = vmatpush1.bf16.msra.mxu0 %v3588_v49  ;;  %v3672_v49 = vld [vmem:[#allocation7 + $0x2b0] ss:$24 sps:$4 sm:$0xff]  }
  0x86   :  { %1624 = vmatpush1.bf16.msra.mxu1 %v4439_v50  ;;  %962 = vmatprep.subr.bf16.mxu0 %v3596_v51  ;;  %v4539_v51 = vld [vmem:[#allocation9 + $0x2a0] ss:$24 sps:$4 sm:$0xff]  }
  0x87   :  { %1625 = vmatprep.subr.bf16.mxu1 %v4442_v52  ;;  %992 = vmatprep.mubr.bf16.mxu0 %v269_v30  ;;  %v3656_v30 = vld [vmem:[#allocation7 + $0x224] ss:$24 sps:$4 sm:$0xff]   ;;  %6327 = vst [vmem:[#allocation21_spill] sm:$0xff] %v4539_v51 }
  0x88   :  { %1655 = vmatprep.mubr.bf16.mxu1 %v4496_v18 }
  0x89   :  { %963 = vmatpush1.bf16.msra.mxu0 %v3594_v53  ;;  %v3680_v53 = vld [vmem:[#allocation7 + $0x2e4] ss:$24 sps:$4 sm:$0xff]  }
  0x8a   :  { %1626 = vmatpush1.bf16.msra.mxu1 %v4446_v54  ;;  %964 = vmatprep.subr.bf16.mxu0 %v3602_v55  ;;  %v4542_v55 = vld [vmem:[#allocation9 + $0x2d4] ss:$24 sps:$4 sm:$0xff]  }
  0x8b   :  { %1627 = vmatprep.subr.bf16.mxu1 %v4450_v56  ;;  %6328 = vst [vmem:[#allocation22_spill] sm:$0xff] %v4542_v55 }
  0x8d   :  { %965 = vmatpush1.bf16.msra.mxu0 %v3600_v57  ;;  %v3678_v57 = vld [vmem:[#allocation7 + $0x2e0] ss:$24 sps:$4 sm:$0xff]  }
  0x8e   :  { %1628 = vmatpush1.bf16.msra.mxu1 %v4452_v58  ;;  %966 = vmatprep.subr.bf16.mxu0 %v3608_v59  ;;  %v4544_v59 = vld [vmem:[#allocation9 + $0x2d0] ss:$24 sps:$4 sm:$0xff]  }
  0x8f   :  { %1629 = vmatprep.subr.bf16.mxu1 %v4456_v60  ;;  %6329 = vst [vmem:[#allocation23_spill] sm:$0xff] %v4544_v59 }
  0x91   :  { %967 = vmatpush1.bf16.msra.mxu0 %v3606_v61  ;;  %v4548_v61 = vrot.slane %v4485_v13, %v4395_v48  ;;  %v4575_v13 = vld [vmem:[#allocation9 + $0x38] ss:$24 sps:$4 sm:$0xff]   ;;  %v4705_v48 = vld [vmem:[#allocation9 + $0x254] ss:$24 sps:$4 sm:$0xff]  }
  0x92   :  { %1630 = vmatpush1.bf16.msra.mxu1 %v4458_v62  ;;  %968 = vmatprep.subr.bf16.mxu0 %v3614_v63  ;;  %v4551_v63 = vld [vmem:[#allocation9 + $0xc] ss:$24 sps:$4 sm:$0xff]   ;;  %6375 = vst [vmem:[#allocation69_spill] sm:$0xff] %v4705_v48 }
  0x93   :  { %1631 = vmatprep.subr.bf16.mxu1 %v4462_v0  ;;  %6330 = vst [vmem:[#allocation24_spill] sm:$0xff] %v4548_v61 }
  0x95   :  { %969 = vmatpush1.bf16.msra.mxu0 %v3612_v1  ;;  %v4554_v1 = vld [vmem:[#allocation9 + $0x14] ss:$24 sps:$4 sm:$0xff]  }
  0x96   :  { %1632 = vmatpush1.bf16.msra.mxu1 %v4464_v2  ;;  %970 = vmatprep.subr.bf16.mxu0 %v3620_v3  ;;  %6331 = vst [vmem:[#allocation25_spill] sm:$0xff] %v4554_v1  ;;  %v4558_v3 = vpack.c.bf16 %v4548_v61, %v4548_v61  ;;  %v4687_v61 = vld [vmem:[#allocation9 + $0x1f0] ss:$24 sps:$4 sm:$0xff]  }
  0x97   :  { %1633 = vmatprep.subr.bf16.mxu1 %v4468_v4  ;;  %6369 = vst [vmem:[#allocation63_spill] sm:$0xff] %v4687_v61 }
  0x99   :  { %971 = vmatpush1.bf16.msra.mxu0 %v3618_v5  ;;  %v4560_v5 = vld [vmem:[#allocation9 + $0x8] ss:$24 sps:$4 sm:$0xff]  }
  0x9a   :  { %1634 = vmatpush1.bf16.msra.mxu1 %v4470_v6  ;;  %972 = vmatprep.subr.bf16.mxu0 %v3626_v7  ;;  %v4563_v7 = vld [vmem:[#allocation9 + $0x10] ss:$24 sps:$4 sm:$0xff]  }
  0x9b   :  { %1635 = vmatprep.subr.bf16.mxu1 %v4474_v8  ;;  %6332 = vst [vmem:[#allocation26_spill] sm:$0xff] %v4563_v7 }
  0x9d   :  { %973 = vmatpush1.bf16.msra.mxu0 %v3624_v9  ;;  %v4567_v9 = vld [vmem:[#allocation9 + $0x3c] ss:$24 sps:$4 sm:$0xff]  }
  0x9e   :  { %1636 = vmatpush1.bf16.msra.mxu1 %v4476_v10  ;;  %974 = vmatprep.subr.bf16.mxu0 %v3632_v11  ;;  %v4569_v11 = vld [vmem:[#allocation9 + $0x44] ss:$24 sps:$4 sm:$0xff]  }
  0x9f   :  { %1637 = vmatprep.subr.bf16.mxu1 %v4480_v12  ;;  %6333 = vst [vmem:[#allocation27_spill] sm:$0xff] %v4569_v11 }
  0xa1   :  { %975 = vmatpush1.bf16.msra.mxu0 %v3630_v15  ;;  %v4577_v15 = vld [vmem:[#allocation9 + $0x40] ss:$24 sps:$4 sm:$0xff]  }
  0xa2   :  { %1638 = vmatpush1.bf16.msra.mxu1 %v4491_v16  ;;  %976 = vmatprep.subr.bf16.mxu0 %v3638_v17  ;;  %6334 = vst [vmem:[#allocation28_spill] sm:$0xff] %v4577_v15  ;;  %v4581_v17 = vld [vmem:[#allocation9 + $0x6c] ss:$24 sps:$4 sm:$0xff]  }
  0xa3   :  { %1639 = vmatprep.subr.bf16.mxu1 %v4499_v19 }
  0xa5   :  { %977 = vmatpush1.bf16.msra.mxu0 %v3636_v20  ;;  %v4583_v20 = vld [vmem:[#allocation9 + $0x74] ss:$24 sps:$4 sm:$0xff]  }
  0xa6   :  { %1640 = vmatpush1.bf16.msra.mxu1 %v4503_v21  ;;  %978 = vmatprep.subr.bf16.mxu0 %v3644_v22  ;;  %6335 = vst [vmem:[#allocation29_spill] sm:$0xff] %v4583_v20  ;;  %v4591_v22 = vld [vmem:[#allocation9 + $0x70] ss:$24 sps:$4 sm:$0xff]  }
  0xa7   :  { %1641 = vmatprep.subr.bf16.mxu1 %v4506_v23  ;;  %6337 = vst [vmem:[#allocation31_spill] sm:$0xff] %v4591_v22 }
  0xa9   :  { %979 = vmatpush1.bf16.msra.mxu0 %v3642_v24  ;;  %v4595_v24 = vld [vmem:[#allocation9 + $0x9c] ss:$24 sps:$4 sm:$0xff]  }
  0xaa   :  { %1642 = vmatpush1.bf16.msra.mxu1 %v4508_v25  ;;  %980 = vmatprep.subr.bf16.mxu0 %v3650_v26  ;;  %6338 = vst [vmem:[#allocation32_spill] sm:$0xff] %v4595_v24  ;;  %v4597_v26 = vld [vmem:[#allocation9 + $0xa4] ss:$24 sps:$4 sm:$0xff]  }
  0xab   :  { %1643 = vmatprep.subr.bf16.mxu1 %v4512_v27  ;;  %6339 = vst [vmem:[#allocation33_spill] sm:$0xff] %v4597_v26 }
  0xad   :  { %981 = vmatpush1.bf16.msra.mxu0 %v3648_v28  ;;  %v4603_v28 = vld [vmem:[#allocation9 + $0xa0] ss:$24 sps:$4 sm:$0xff]  }
  0xae   :  { %1644 = vmatpush1.bf16.msra.mxu1 %v4515_v29  ;;  %982 = vmatprep.subr.bf16.mxu0 %v3656_v30  ;;  %6341 = vst [vmem:[#allocation35_spill] sm:$0xff] %v4603_v28  ;;  %v4607_v30 = vld [vmem:[#allocation9 + $0xcc] ss:$24 sps:$4 sm:$0xff]  }
  0xaf   :  { %1645 = vmatprep.subr.bf16.mxu1 %v4518_v31  ;;  %6342 = vst [vmem:[#allocation36_spill] sm:$0xff] %v4607_v30 }
  0xb1   :  { %983 = vmatpush1.bf16.msra.mxu0 %v3654_v32  ;;  %v4609_v32 = vld [vmem:[#allocation9 + $0xd4] ss:$24 sps:$4 sm:$0xff]  }
  0xb2   :  { %1646 = vmatpush1.bf16.msra.mxu1 %v4520_v33  ;;  %984 = vmatprep.subr.bf16.mxu0 %v3662_v34  ;;  %6343 = vst [vmem:[#allocation37_spill] sm:$0xff] %v4609_v32  ;;  %v4613_v34 = vld [vmem:[#allocation9 + $0xc8] ss:$24 sps:$4 sm:$0xff]  }
  0xb3   :  { %1647 = vmatprep.subr.bf16.mxu1 %v4524_v35  ;;  %6344 = vst [vmem:[#allocation38_spill] sm:$0xff] %v4613_v34 }
  0xb5   :  { %985 = vmatpush1.bf16.msra.mxu0 %v3660_v36  ;;  %v4615_v36 = vld [vmem:[#allocation9 + $0xd0] ss:$24 sps:$4 sm:$0xff]  }
  0xb6   :  { %1648 = vmatpush1.bf16.msra.mxu1 %v4527_v37  ;;  %986 = vmatprep.subr.bf16.mxu0 %v3668_v38  ;;  %6345 = vst [vmem:[#allocation39_spill] sm:$0xff] %v4615_v36  ;;  %v4619_v38 = vld [vmem:[#allocation9 + $0xfc] ss:$24 sps:$4 sm:$0xff]  }
  0xb7   :  { %1649 = vmatprep.subr.bf16.mxu1 %v4530_v39  ;;  %6346 = vst [vmem:[#allocation40_spill] sm:$0xff] %v4619_v38 }
  0xb9   :  { %987 = vmatpush1.bf16.msra.mxu0 %v3666_v41  ;;  %v4621_v41 = vld [vmem:[#allocation9 + $0x104] ss:$24 sps:$4 sm:$0xff]  }
  0xba   :  { %1650 = vmatpush1.bf16.msra.mxu1 %v4532_v42  ;;  %988 = vmatprep.subr.bf16.mxu0 %v3674_v43  ;;  %6347 = vst [vmem:[#allocation41_spill] sm:$0xff] %v4621_v41  ;;  %v4625_v43 = vld [vmem:[#allocation9 + $0xf8] ss:$24 sps:$4 sm:$0xff]   ;;  %v4741_v42 = vld [vmem:[#allocation9 + $0x2e4] ss:$24 sps:$4 sm:$0xff]  }
  0xbb   :  { %1651 = vmatprep.subr.bf16.mxu1 %v4536_v45  ;;  %6348 = vst [vmem:[#allocation42_spill] sm:$0xff] %v4625_v43  ;;  %v4735_v45 = vld [vmem:[#allocation9 + $0x2b0] ss:$24 sps:$4 sm:$0xff]   ;;  %6386 = vst [vmem:[#allocation80_spill] sm:$0xff] %v4741_v42 }
  0xbc   :  { %6384 = vst [vmem:[#allocation78_spill] sm:$0xff] %v4735_v45 }
  0xbd   :  { %989 = vmatpush1.bf16.msra.mxu0 %v3672_v49  ;;  %v4627_v49 = vld [vmem:[#allocation9 + $0x100] ss:$24 sps:$4 sm:$0xff]  }
  0xbe   :  { %1652 = vmatpush1.bf16.msra.mxu1 %v4539_v51  ;;  %990 = vmatprep.subr.bf16.mxu0 %v3680_v53  ;;  %6349 = vst [vmem:[#allocation43_spill] sm:$0xff] %v4627_v49  ;;  %v4631_v53 = vld [vmem:[#allocation9 + $0x12c] ss:$24 sps:$4 sm:$0xff]  }
  0xbf   :  { %1653 = vmatprep.subr.bf16.mxu1 %v4542_v55  ;;  %6350 = vst [vmem:[#allocation44_spill] sm:$0xff] %v4631_v53  ;;  %v4723_v55 = vld [vmem:[#allocation9 + $0x280] ss:$24 sps:$4 sm:$0xff]   ;;  %v4729_v51 = vld [vmem:[#allocation9 + $0x2b4] ss:$24 sps:$4 sm:$0xff]  }
  0xc0   :  { %6382 = vst [vmem:[#allocation76_spill] sm:$0xff] %v4729_v51 }
  0xc1   :  { %991 = vmatpush1.bf16.msra.mxu0 %v3678_v57  ;;  %v4633_v57 = vld [vmem:[#allocation9 + $0x134] ss:$24 sps:$4 sm:$0xff]  }
  0xc2   :  { %1654 = vmatpush1.bf16.msra.mxu1 %v4544_v59  ;;  %1664 = vmatprep.subr.bf16.mxu0 %v4551_v63  ;;  %6351 = vst [vmem:[#allocation45_spill] sm:$0xff] %v4633_v57  ;;  %v4717_v59 = vld [vmem:[#allocation9 + $0x284] ss:$24 sps:$4 sm:$0xff]  }
  0xc3   :  { %1705 = vmatprep.subr.bf16.mxu1 %v4554_v1  ;;  %v4711_v1 = vld [vmem:[#allocation9 + $0x250] ss:$24 sps:$4 sm:$0xff]   ;;  %6379 = vst [vmem:[#allocation73_spill] sm:$0xff] %v4717_v59 }
  0xc4   :  { %993 = vmatmul.mubr.bf16.vlgmr.msra.gmra.mrb[4].mxu0 %v4437_v47  ;;  %v4589_v47 = vld [vmem:[#allocation9 + $0x68] ss:$24 sps:$4 sm:$0xff]   ;;  %6377 = vst [vmem:[#allocation71_spill] sm:$0xff] %v4711_v1 }
  0xc5   :  { %1656 = vmatmul.mubr.bf16.vlgmr.msra.gmra.mrb[4].mxu1 %v4558_v3  ;;  %1665 = vmatpush1.bf16.msra.mxu0 %v4560_v5  ;;  %6336 = vst [vmem:[#allocation30_spill] sm:$0xff] %v4589_v47 }
  0xc6   :  { %1706 = vmatpush1.bf16.msra.mxu1 %v4563_v7  ;;  %1666 = vmatprep.subr.bf16.mxu0 %v4567_v9  ;;  %v4675_v7 = vld [vmem:[#allocation9 + $0x1c0] ss:$24 sps:$4 sm:$0xff]  }
  0xc7   :  { %1707 = vmatprep.subr.bf16.mxu1 %v4569_v11  ;;  %1696 = vmatprep.mubr.bf16.mxu0 %v4496_v18  ;;  %v4669_v11 = vld [vmem:[#allocation9 + $0x1c4] ss:$24 sps:$4 sm:$0xff]   ;;  %6365 = vst [vmem:[#allocation59_spill] sm:$0xff] %v4675_v7 }
  0xc8   :  { %1737 = vmatprep.mubr.bf16.mxu1 %v4496_v18  ;;  %v4601_v18 = vld [vmem:[#allocation9 + $0x98] ss:$24 sps:$4 sm:$0xff]   ;;  %6363 = vst [vmem:[#allocation57_spill] sm:$0xff] %v4669_v11 }
  0xc9   :  { %1667 = vmatpush1.bf16.msra.mxu0 %v4575_v13  ;;  %6340 = vst [vmem:[#allocation34_spill] sm:$0xff] %v4601_v18 }
  0xca   :  { %1708 = vmatpush1.bf16.msra.mxu1 %v4577_v15  ;;  %1668 = vmatprep.subr.bf16.mxu0 %v4581_v17  ;;  %v4663_v15 = vld [vmem:[#allocation9 + $0x190] ss:$24 sps:$4 sm:$0xff]  }
  0xcb   :  { %1709 = vmatprep.subr.bf16.mxu1 %v4583_v20  ;;  %v4657_v20 = vld [vmem:[#allocation9 + $0x194] ss:$24 sps:$4 sm:$0xff]   ;;  %6361 = vst [vmem:[#allocation55_spill] sm:$0xff] %v4663_v15 }
  0xcc   :  { %6359 = vst [vmem:[#allocation53_spill] sm:$0xff] %v4657_v20 }
  0xcd   :  { %1669 = vmatpush1.bf16.msra.mxu0 %v4589_v47 }
  0xce   :  { %1710 = vmatpush1.bf16.msra.mxu1 %v4591_v22  ;;  %1670 = vmatprep.subr.bf16.mxu0 %v4595_v24  ;;  %v4651_v22 = vld [vmem:[#allocation9 + $0x160] ss:$24 sps:$4 sm:$0xff]  }
  0xcf   :  { %1711 = vmatprep.subr.bf16.mxu1 %v4597_v26  ;;  %v4645_v26 = vld [vmem:[#allocation9 + $0x164] ss:$24 sps:$4 sm:$0xff]   ;;  %6357 = vst [vmem:[#allocation51_spill] sm:$0xff] %v4651_v22 }
  0xd0   :  { %6355 = vst [vmem:[#allocation49_spill] sm:$0xff] %v4645_v26 }
  0xd1   :  { %1671 = vmatpush1.bf16.msra.mxu0 %v4601_v18 }
  0xd2   :  { %1712 = vmatpush1.bf16.msra.mxu1 %v4603_v28  ;;  %1672 = vmatprep.subr.bf16.mxu0 %v4607_v30  ;;  %v4639_v28 = vld [vmem:[#allocation9 + $0x130] ss:$24 sps:$4 sm:$0xff]  }
  0xd3   :  { %1713 = vmatprep.subr.bf16.mxu1 %v4609_v32  ;;  %v4637_v32 = vld [vmem:[#allocation9 + $0x128] ss:$24 sps:$4 sm:$0xff]   ;;  %6353 = vst [vmem:[#allocation47_spill] sm:$0xff] %v4639_v28 }
  0xd4   :  { %6352 = vst [vmem:[#allocation46_spill] sm:$0xff] %v4637_v32 }
  0xd5   :  { %1673 = vmatpush1.bf16.msra.mxu0 %v4613_v34 }
  0xd6   :  { %1714 = vmatpush1.bf16.msra.mxu1 %v4615_v36  ;;  %1674 = vmatprep.subr.bf16.mxu0 %v4619_v38  ;;  %v4643_v36 = vld [vmem:[#allocation9 + $0x15c] ss:$24 sps:$4 sm:$0xff]  }
  0xd7   :  { %1715 = vmatprep.subr.bf16.mxu1 %v4621_v41  ;;  %6354 = vst [vmem:[#allocation48_spill] sm:$0xff] %v4643_v36  ;;  %v4649_v41 = vld [vmem:[#allocation9 + $0x158] ss:$24 sps:$4 sm:$0xff]  }
  0xd8   :  { %6356 = vst [vmem:[#allocation50_spill] sm:$0xff] %v4649_v41 }
  0xd9   :  { %1675 = vmatpush1.bf16.msra.mxu0 %v4625_v43 }
  0xda   :  { %1716 = vmatpush1.bf16.msra.mxu1 %v4627_v49  ;;  %1676 = vmatprep.subr.bf16.mxu0 %v4631_v53  ;;  %v4655_v49 = vld [vmem:[#allocation9 + $0x18c] ss:$24 sps:$4 sm:$0xff]  }
  0xdb   :  { %1717 = vmatprep.subr.bf16.mxu1 %v4633_v57  ;;  %6358 = vst [vmem:[#allocation52_spill] sm:$0xff] %v4655_v49  ;;  %v4661_v57 = vld [vmem:[#allocation9 + $0x188] ss:$24 sps:$4 sm:$0xff]  }
  0xdc   :  { %6360 = vst [vmem:[#allocation54_spill] sm:$0xff] %v4661_v57 }
  0xdd   :  { %1677 = vmatpush1.bf16.msra.mxu0 %v4637_v32 }
  0xde   :  { %1718 = vmatpush1.bf16.msra.mxu1 %v4639_v28  ;;  %1678 = vmatprep.subr.bf16.mxu0 %v4643_v36  ;;  %v4667_v28 = vld [vmem:[#allocation9 + $0x1bc] ss:$24 sps:$4 sm:$0xff]  }
  0xdf   :  { %1719 = vmatprep.subr.bf16.mxu1 %v4645_v26  ;;  %6362 = vst [vmem:[#allocation56_spill] sm:$0xff] %v4667_v28  ;;  %v4673_v26 = vld [vmem:[#allocation9 + $0x1b8] ss:$24 sps:$4 sm:$0xff]  }
  0xe0   :  { %6364 = vst [vmem:[#allocation58_spill] sm:$0xff] %v4673_v26 }
  0xe1   :  { %1679 = vmatpush1.bf16.msra.mxu0 %v4649_v41 }
  0xe2   :  { %1720 = vmatpush1.bf16.msra.mxu1 %v4651_v22  ;;  %1680 = vmatprep.subr.bf16.mxu0 %v4655_v49  ;;  %v4679_v22 = vld [vmem:[#allocation9 + $0x1ec] ss:$24 sps:$4 sm:$0xff]  }
  0xe3   :  { %1721 = vmatprep.subr.bf16.mxu1 %v4657_v20  ;;  %6366 = vst [vmem:[#allocation60_spill] sm:$0xff] %v4679_v22  ;;  %v4685_v20 = vld [vmem:[#allocation9 + $0x1e8] ss:$24 sps:$4 sm:$0xff]  }
  0xe4   :  { %6368 = vst [vmem:[#allocation62_spill] sm:$0xff] %v4685_v20 }
  0xe5   :  { %1681 = vmatpush1.bf16.msra.mxu0 %v4661_v57 }
  0xe6   :  { %1722 = vmatpush1.bf16.msra.mxu1 %v4663_v15  ;;  %1682 = vmatprep.subr.bf16.mxu0 %v4667_v28  ;;  %v4691_v15 = vld [vmem:[#allocation9 + $0x21c] ss:$24 sps:$4 sm:$0xff]  }
  0xe7   :  { %1723 = vmatprep.subr.bf16.mxu1 %v4669_v11  ;;  %6370 = vst [vmem:[#allocation64_spill] sm:$0xff] %v4691_v15  ;;  %v4697_v11 = vld [vmem:[#allocation9 + $0x218] ss:$24 sps:$4 sm:$0xff]  }
  0xe8   :  { %6372 = vst [vmem:[#allocation66_spill] sm:$0xff] %v4697_v11 }
  0xe9   :  { %1683 = vmatpush1.bf16.msra.mxu0 %v4673_v26 }
  0xea   :  { %1724 = vmatpush1.bf16.msra.mxu1 %v4675_v7  ;;  %1684 = vmatprep.subr.bf16.mxu0 %v4679_v22  ;;  %v4703_v7 = vld [vmem:[#allocation9 + $0x24c] ss:$24 sps:$4 sm:$0xff]  }
  0xeb   :  { %1725 = vmatprep.subr.bf16.mxu1 %v4681_v14  ;;  %6374 = vst [vmem:[#allocation68_spill] sm:$0xff] %v4703_v7  ;;  %v4709_v14 = vld [vmem:[#allocation9 + $0x248] ss:$24 sps:$4 sm:$0xff]  }
  0xec   :  { %6376 = vst [vmem:[#allocation70_spill] sm:$0xff] %v4709_v14 }
  0xed   :  { %1685 = vmatpush1.bf16.msra.mxu0 %v4685_v20 }
  0xee   :  { %1726 = vmatpush1.bf16.msra.mxu1 %v4687_v61  ;;  %1686 = vmatprep.subr.bf16.mxu0 %v4691_v15  ;;  %v4715_v61 = vld [vmem:[#allocation9 + $0x27c] ss:$24 sps:$4 sm:$0xff]  }
  0xef   :  { %1727 = vmatprep.subr.bf16.mxu1 %v4693_v40  ;;  %6378 = vst [vmem:[#allocation72_spill] sm:$0xff] %v4715_v61  ;;  %v4721_v40 = vld [vmem:[#allocation9 + $0x278] ss:$24 sps:$4 sm:$0xff]  }
  0xf0   :  { %6380 = vst [vmem:[#allocation74_spill] sm:$0xff] %v4721_v40 }
  0xf1   :  { %1687 = vmatpush1.bf16.msra.mxu0 %v4697_v11 }
  0xf2   :  { %1728 = vmatpush1.bf16.msra.mxu1 %v4699_v44  ;;  %1688 = vmatprep.subr.bf16.mxu0 %v4703_v7  ;;  %v4727_v44 = vld [vmem:[#allocation9 + $0x2ac] ss:$24 sps:$4 sm:$0xff]  }
  0xf3   :  { %1729 = vmatprep.subr.bf16.mxu1 %v4705_v48  ;;  %6381 = vst [vmem:[#allocation75_spill] sm:$0xff] %v4727_v44  ;;  %v4733_v48 = vld [vmem:[#allocation9 + $0x2a8] ss:$24 sps:$4 sm:$0xff]  }
  0xf4   :  { %6383 = vst [vmem:[#allocation77_spill] sm:$0xff] %v4733_v48 }
  0xf5   :  { %1689 = vmatpush1.bf16.msra.mxu0 %v4709_v14 }
  0xf6   :  { %1730 = vmatpush1.bf16.msra.mxu1 %v4711_v1  ;;  %1690 = vmatprep.subr.bf16.mxu0 %v4715_v61  ;;  %v4739_v1 = vld [vmem:[#allocation9 + $0x2dc] ss:$24 sps:$4 sm:$0xff]  }
  0xf7   :  { %1731 = vmatprep.subr.bf16.mxu1 %v4717_v59  ;;  %6385 = vst [vmem:[#allocation79_spill] sm:$0xff] %v4739_v1  ;;  %v4745_v59 = vld [vmem:[#allocation9 + $0x2d8] ss:$24 sps:$4 sm:$0xff]  }
  0xf8   :  { %6387 = vst [vmem:[#allocation81_spill] sm:$0xff] %v4745_v59 }
  0xf9   :  { %1691 = vmatpush1.bf16.msra.mxu0 %v4721_v40  ;;  %v4747_v40 = vld [vmem:[#allocation9 + $0x2e0] ss:$24 sps:$4 sm:$0xff]  }
  0xfa   :  { %1732 = vmatpush1.bf16.msra.mxu1 %v4723_v55  ;;  %1692 = vmatprep.subr.bf16.mxu0 %v4727_v44  ;;  %6388 = vst [vmem:[#allocation82_spill] sm:$0xff] %v4747_v40 }
  0xfb   :  { %1733 = vmatprep.subr.bf16.mxu1 %v4729_v51 }
  0xfd   :  { %1693 = vmatpush1.bf16.msra.mxu0 %v4733_v48 }
  0xfe   :  { %1734 = vmatpush1.bf16.msra.mxu1 %v4735_v45  ;;  %1694 = vmatprep.subr.bf16.mxu0 %v4739_v1 }
  0xff   :  { %1735 = vmatprep.subr.bf16.mxu1 %v4741_v42 }
 0x101   :  { %1695 = vmatpush1.bf16.msra.mxu0 %v4745_v59 }
 0x102   :  { %1736 = vmatpush1.bf16.msra.mxu1 %v4747_v40  ;;  %1790 = vmatprep.subr.bf16.mxu0 %v4435_v46 }
 0x103   :  { %1831 = vmatprep.subr.bf16.mxu1 %v4551_v63 }
 0x104   :  { %1697 = vmatmul.mubr.bf16.vlgmr.msra.gmra.mrb[8].mxu0 %v4558_v3 }
 0x105   :  { %1738 = vmatmul.mubr.bf16.vlgmr.msra.gmra.mrb[8].mxu1 %v4558_v3  ;;  %1791 = vmatpush1.bf16.msra.mxu0 %v4439_v50  ;;  %v6389_v50 = vld [vmem:[#allocation19_spill] sm:$0xff] }
 0x106   :  { %1832 = vmatpush1.bf16.msra.mxu1 %v4560_v5  ;;  %1792 = vmatprep.subr.bf16.mxu0 %v4442_v52  ;;  %v6390_v52 = vld [vmem:[#allocation74_spill] sm:$0xff] }
 0x107   :  { %1833 = vmatprep.subr.bf16.mxu1 %v4567_v9 }
 0x109   :  { %1793 = vmatpush1.bf16.msra.mxu0 %v4446_v54  ;;  %v6391_v54 = vld [vmem:[#allocation20_spill] sm:$0xff] }
 0x10a   :  { %1834 = vmatpush1.bf16.msra.mxu1 %v4575_v13  ;;  %1794 = vmatprep.subr.bf16.mxu0 %v4450_v56  ;;  %v6392_v56 = vld [vmem:[#allocation21_spill] sm:$0xff] }
 0x10b   :  { %1835 = vmatprep.subr.bf16.mxu1 %v4581_v17 }
 0x10d   :  { %1795 = vmatpush1.bf16.msra.mxu0 %v4452_v58  ;;  %v6393_v58 = vld [vmem:[#allocation22_spill] sm:$0xff] }
 0x10e   :  { %1836 = vmatpush1.bf16.msra.mxu1 %v4589_v47  ;;  %1796 = vmatprep.subr.bf16.mxu0 %v4456_v60  ;;  %v6394_v60 = vld [vmem:[#allocation23_spill] sm:$0xff] }
 0x10f   :  { %1837 = vmatprep.subr.bf16.mxu1 %v4595_v24 }
 0x111   :  { %1797 = vmatpush1.bf16.msra.mxu0 %v4458_v62  ;;  %v6395_v62 = vld [vmem:[#allocation25_spill] sm:$0xff] }
 0x112   :  { %1838 = vmatpush1.bf16.msra.mxu1 %v4601_v18  ;;  %1798 = vmatprep.subr.bf16.mxu0 %v4462_v0 }
 0x113   :  { %1839 = vmatprep.subr.bf16.mxu1 %v4607_v30 }
 0x115   :  { %1799 = vmatpush1.bf16.msra.mxu0 %v4464_v2 }
 0x116   :  { %1840 = vmatpush1.bf16.msra.mxu1 %v4613_v34  ;;  %1800 = vmatprep.subr.bf16.mxu0 %v4468_v4 }
 0x117   :  { %1841 = vmatprep.subr.bf16.mxu1 %v4619_v38 }
 0x119   :  { %1801 = vmatpush1.bf16.msra.mxu0 %v4470_v6 }
 0x11a   :  { %1842 = vmatpush1.bf16.msra.mxu1 %v4625_v43  ;;  %1802 = vmatprep.subr.bf16.mxu0 %v4474_v8 }
 0x11b   :  { %1843 = vmatprep.subr.bf16.mxu1 %v4631_v53 }
 0x11d   :  { %1803 = vmatpush1.bf16.msra.mxu0 %v4476_v10 }
 0x11e   :  { %1844 = vmatpush1.bf16.msra.mxu1 %v4637_v32  ;;  %1804 = vmatprep.subr.bf16.mxu0 %v4480_v12 }
 0x11f   :  { %1845 = vmatprep.subr.bf16.mxu1 %v4643_v36 }
 0x121   :  { %1805 = vmatpush1.bf16.msra.mxu0 %v4491_v16 }
 0x122   :  { %1846 = vmatpush1.bf16.msra.mxu1 %v4649_v41  ;;  %1806 = vmatprep.subr.bf16.mxu0 %v4499_v19 }
 0x123   :  { %1847 = vmatprep.subr.bf16.mxu1 %v4655_v49 }
 0x125   :  { %1807 = vmatpush1.bf16.msra.mxu0 %v4503_v21 }
 0x126   :  { %1848 = vmatpush1.bf16.msra.mxu1 %v4661_v57  ;;  %1808 = vmatprep.subr.bf16.mxu0 %v4506_v23 }
 0x127   :  { %1849 = vmatprep.subr.bf16.mxu1 %v4667_v28 }
 0x129   :  { %1809 = vmatpush1.bf16.msra.mxu0 %v4508_v25 }
 0x12a   :  { %1850 = vmatpush1.bf16.msra.mxu1 %v4673_v26  ;;  %1810 = vmatprep.subr.bf16.mxu0 %v4512_v27 }
 0x12b   :  { %1851 = vmatprep.subr.bf16.mxu1 %v4679_v22 }
 0x12d   :  { %1811 = vmatpush1.bf16.msra.mxu0 %v4515_v29 }
 0x12e   :  { %1852 = vmatpush1.bf16.msra.mxu1 %v4685_v20  ;;  %1812 = vmatprep.subr.bf16.mxu0 %v4518_v31 }
 0x12f   :  { %1853 = vmatprep.subr.bf16.mxu1 %v4691_v15 }
 0x131   :  { %1813 = vmatpush1.bf16.msra.mxu0 %v4520_v33 }
 0x132   :  { %1854 = vmatpush1.bf16.msra.mxu1 %v4697_v11  ;;  %1814 = vmatprep.subr.bf16.mxu0 %v4524_v35 }
 0x133   :  { %1855 = vmatprep.subr.bf16.mxu1 %v4703_v7 }
 0x135   :  { %1815 = vmatpush1.bf16.msra.mxu0 %v4527_v37 }
 0x136   :  { %1856 = vmatpush1.bf16.msra.mxu1 %v4709_v14  ;;  %1816 = vmatprep.subr.bf16.mxu0 %v4530_v39 }
 0x137   :  { %1857 = vmatprep.subr.bf16.mxu1 %v4715_v61 }
 0x139   :  { %1817 = vmatpush1.bf16.msra.mxu0 %v6389_v50 }
 0x13a   :  { %1858 = vmatpush1.bf16.msra.mxu1 %v6390_v52  ;;  %1818 = vmatprep.subr.bf16.mxu0 %v6391_v54 }
 0x13b   :  { %1859 = vmatprep.subr.bf16.mxu1 %v4727_v44 }
 0x13d   :  { %1819 = vmatpush1.bf16.msra.mxu0 %v6392_v56 }
 0x13e   :  { %1860 = vmatpush1.bf16.msra.mxu1 %v4733_v48  ;;  %1820 = vmatprep.subr.bf16.mxu0 %v6393_v58 }
 0x13f   :  { %1861 = vmatprep.subr.bf16.mxu1 %v4739_v1 }
 0x141   :  { %1821 = vmatpush1.bf16.msra.mxu0 %v6394_v60 }
 0x142   :  { %1862 = vmatpush1.bf16.msra.mxu1 %v4745_v59  ;;  %1872 = vmatprep.subr.bf16.mxu0 %v6395_v62 }
 0x143   :  { %1989 = vmatprep.subr.bf16.mxu1 %v4435_v46  ;;  %v1097_v46 = vld [vmem:[%s6065_s5] sm:$0x3f] }
 0x157   :  { %v912_v3 = vpop.f32.mrb[0].mxu0 }
 0x158   :  { %v953_v52 = vpop.f32.mrb[0].mxu1  ;;  %v914_v61 = vpop.f32.mrb[1].mxu0 }
 0x159   :  { %v955_v44 = vpop.f32.mrb[1].mxu1  ;;  %v916_v14 = vpop.f32.mrb[2].mxu0 }
 0x15a   :  { %v957_v7 = vpop.f32.mrb[2].mxu1  ;;  %v917_v11 = vpop.f32.mrb[3].mxu0  ;;  %v366_v14 = vld [vmem:[%s6064_s4] sm:$0x3f]  ;;  %s4246_s4 = smov [#allocation10]  }
 0x15b   :  { %v958_v48 = vpop.f32.mrb[3].mxu1  ;;  %v6396_v7 = vld [vmem:[#allocation17_spill] sm:$0xff]  ;;  %v6398_v11 = vld [vmem:[#allocation16_spill] sm:$0xff]  ;;  %s3193_s5 = sshll.u32 %s4246_s4, 4  ;;  %s3194_s5 = int_to_ptr.vmem [resolvable:$true] %s3193_s5 }
 0x15c   :  { %v4832_v48 = vrot.slane %v1097_v46, %v6396_v7  ;;  %v4835_v49 = vrot.slane %v1097_v46, %v6398_v11  ;;  %v371_v41 = vrot.slane %v366_v14, %v6396_v7  ;;  %s4208_s25 = scalar_lea.vmem %s3194_s5, 256  ;;  %p4213_p0 = scmp.lt.s32.totalorder %s3194_s5, %s3194_s5 }
 0x15d   :  { %p4209_p13 = scmp.ne.s32.totalorder %s3194_s5, %s4208_s25  ;;  %p4214_p1 = scmp.lt.s32.totalorder %s4208_s25, %s4208_s25 }
 0x15e   :  { %6397 = vst [vmem:[#allocation19_spill] sm:$0xff] %v4832_v48  ;;  %6399 = vst [vmem:[#allocation20_spill] sm:$0xff] %v4835_v49 }
 0x15f   :  { %p4215_p2 = por %p4214_p1, %p4213_p0 }
 0x161   :  { %p4216_p3 = pnand %p4215_p2, %p4209_p13 }
 0x197   :  { %v4821_v15 = vpop.f32.mrb[4].mxu0 }
 0x198   :  { %v1657_v20 = vpop.f32.mrb[4].mxu1  ;;  %v4823_v1 = vpop.f32.mrb[5].mxu0 }
 0x199   :  { %v1659_v22 = vpop.f32.mrb[5].mxu1  ;;  %v998_v26 = vpop.f32.mrb[6].mxu0 }
 0x19a   :  { %v1661_v59 = vpop.f32.mrb[6].mxu1  ;;  %v999_v28 = vpop.f32.mrb[7].mxu0  ;;  %v1658_v26 = vadd.f32 %v1657_v20, %v4832_v48  ;;  %v6402_v20 = vld [vmem:[#allocation15_spill] sm:$0xff] }
 0x19b   :  { %v1662_v57 = vpop.f32.mrb[7].mxu1  ;;  %v375_v59 = vrot.slane %v366_v14, %v6398_v11  ;;  %v1660_v28 = vadd.f32 %v1659_v22, %v4835_v49  ;;  %v378_v48 = vsub.s32 2, %v6402_v20  ;;  %v382_v22 = vsub.s32 3, %v6402_v20 }
 0x19c   :  { %v4841_v57 = vadd.f32 %v912_v3, %v371_v41  ;;  %v390_v41 = vsub.s32 5, %v6402_v20 }
 0x19d   :  { %v4843_v36 = vadd.f32 %v914_v61, %v375_v59  ;;  %v386_v61 = vsub.s32 4, %v6402_v20  ;;  %v379_v3 = vrot.slane %v366_v14, %v378_v48  ;;  %v4851_v59 = vrot.slane %v1097_v46, %v378_v48 }
 0x19e   :  { %6400 = vst [vmem:[#allocation21_spill] sm:$0xff] %v4841_v57  ;;  %v1746_v32 = vadd.f32 %v1658_v26, %v4841_v57 }
 0x19f   :  { %6401 = vst [vmem:[#allocation22_spill] sm:$0xff] %v4843_v36  ;;  %v1747_v53 = vadd.f32 %v1660_v28, %v4843_v36  ;;  %6403 = vst [vmem:[#allocation23_spill] sm:$0xff] %v4851_v59  ;;  %v4859_v26 = vadd.f32 %v953_v52, %v379_v3 }
 0x1a0   :  { %v3443_v43 = vmul.f32 -1.442695, %v1746_v32  ;;  %v4853_v32 = vrot.slane %v1097_v46, %v386_v61 }
 0x1a1   :  { %v3444_v38 = vmul.f32 -1.442695, %v1747_v53 }
 0x1a2   :  { %3780 = vpow2.f32 %v3443_v43  ;;  %6404 = vst [vmem:[#allocation25_spill] sm:$0xff] %v4853_v32  ;;  %v4855_v43 = vrot.slane %v1097_v46, %v382_v22 }
 0x1a3   :  { %3782 = vpow2.f32 %v3444_v38  ;;  %v383_v38 = vrot.slane %v366_v14, %v382_v22 }
 0x1a5   :  { %v4863_v48 = vadd.f32 %v955_v44, %v383_v38  ;;  %v387_v44 = vrot.slane %v366_v14, %v386_v61  ;;  %v391_v38 = vrot.slane %v366_v14, %v390_v41 }
 0x1a7   :  { %6405 = vst [vmem:[#allocation17_spill] sm:$0xff] %v4863_v48 }
 0x1ac   :  { %v3781_v34 = vpop.eup %3780 }
 0x1ad   :  { %v3783_v7 = vpop.eup %3782  ;;  %v1754_v30 = vadd.f32 1.0, %v3781_v34  ;;  %v4857_v34 = vrot.slane %v1097_v46, %v390_v41 }
 0x1ae   :  { %v1755_v11 = vadd.f32 1.0, %v3783_v7 }
 0x1af   :  { %3784 = vrcp.f32 %v1754_v30 }
 0x1b0   :  { %3786 = vrcp.f32 %v1755_v11 }
 0x1b9   :  { %v3785_v36 = vpop.eup %3784 }
 0x1ba   :  { %v3787_v18 = vpop.eup %3786 }
 0x1d7   :  { %v1698_v30 = vpop.f32.mrb[8].mxu0 }
 0x1d8   :  { %v1739_v53 = vpop.f32.mrb[8].mxu1  ;;  %v1699_v28 = vadd.f32 %v1698_v30, %v4851_v59  ;;  %v1700_v11 = vpop.f32.mrb[9].mxu0 }
 0x1d9   :  { %v1740_v7 = vadd.f32 %v1739_v53, %v4853_v32  ;;  %v1741_v20 = vpop.f32.mrb[9].mxu1  ;;  %v1701_v57 = vadd.f32 %v1700_v11, %v4855_v43  ;;  %v1702_v49 = vpop.f32.mrb[10].mxu0  ;;  %v4870_v11 = vadd.f32 %v4821_v15, %v387_v44 }
 0x1da   :  { %v1742_v22 = vadd.f32 %v1741_v20, %v4857_v34  ;;  %v1743_v46 = vpop.f32.mrb[10].mxu1  ;;  %v1760_v24 = vadd.f32 %v1699_v28, %v4859_v26  ;;  %v1703_v3 = vpop.f32.mrb[11].mxu0  ;;  %v4874_v28 = vadd.f32 %v4823_v1, %v391_v38  ;;  %v6408_v38 = vld [vmem:[#allocation26_spill] sm:$0xff] }
 0x1db   :  { %v1774_v52 = vmul.f32 %v3785_v36, %v1740_v7  ;;  %v1744_v47 = vpop.f32.mrb[11].mxu1  ;;  %v1761_v30 = vadd.f32 %v1701_v57, %v4863_v48  ;;  %v6407_v46 = vld [vmem:[#allocation18_spill] sm:$0xff] }
 0x1dc   :  { %v1775_v53 = vmul.f32 %v3787_v18, %v1742_v22  ;;  %v3445_v32 = vmul.f32 -1.442695, %v1760_v24 }
 0x1dd   :  { %v3446_v59 = vmul.f32 -1.442695, %v1761_v30  ;;  %v1776_v20 = vadd.f32 %v1774_v52, %v4870_v11 }
 0x1de   :  { %3788 = vpow2.f32 %v3445_v32  ;;  %v1777_v24 = vadd.f32 %v1775_v53, %v4874_v28  ;;  %v6406_v32 = vld [vmem:[#allocation24_spill] sm:$0xff] }
 0x1df   :  { %3790 = vpow2.f32 %v3446_v59 }
 0x1e8   :  { %v3789_v49 = vpop.eup %3788 }
 0x1e9   :  { %v1768_v36 = vadd.f32 1.0, %v3789_v49  ;;  %v3791_v47 = vpop.eup %3790  ;;  %v6409_v49 = vld [vmem:[#allocation27_spill] sm:$0xff] }
 0x1ea   :  { %v1769_v57 = vadd.f32 1.0, %v3791_v47  ;;  %v6410_v47 = vld [vmem:[#allocation28_spill] sm:$0xff] }
 0x1eb   :  { %3792 = vrcp.f32 %v1768_v36  ;;  %v4896_v36 = vld [vmem:[#allocation9 + $0x34] ss:$24 sps:$4 sm:$0xff]  }
 0x1ec   :  { %3794 = vtanh.f32 %v1776_v20  ;;  %v4893_v20 = vld [vmem:[#allocation9] ss:$24 sps:$4 sm:$0xff]  }
 0x1ed   :  { %3796 = vrcp.f32 %v1769_v57  ;;  %v6411_v57 = vld [vmem:[#allocation29_spill] sm:$0xff] }
 0x1ee   :  { %3798 = vtanh.f32 %v1777_v24  ;;  %v4901_v24 = vld [vmem:[#allocation9 + $0x30] ss:$24 sps:$4 sm:$0xff]  }
 0x1f5   :  { %v3793_v18 = vpop.eup %3792 }
 0x1f6   :  { %v3795_v14 = vpop.eup %3794  ;;  %v1780_v61 = vsub.f32 1.0, %v3793_v18  ;;  %v1784_v7 = vmul.f32 %v3793_v18, %v6406_v32  ;;  %v4904_v18 = vld [vmem:[#allocation9 + $0x64] ss:$24 sps:$4 sm:$0xff]  }
 0x1f7   :  { %v3797_v15 = vpop.eup %3796  ;;  %v6415_v32 = vld [vmem:[#allocation37_spill] sm:$0xff] }
 0x1f8   :  { %v1781_v41 = vsub.f32 1.0, %v3797_v15  ;;  %v1782_v59 = vmul.f32 %v3795_v14, %v1780_v61  ;;  %v3799_v22 = vpop.eup %3798  ;;  %v1785_v52 = vmul.f32 %v3797_v15, %v6407_v46  ;;  %v6412_v14 = vld [vmem:[#allocation31_spill] sm:$0xff]  ;;  %v6413_v61 = vld [vmem:[#allocation33_spill] sm:$0xff] }
 0x1f9   :  { %v4909_v15 = vld [vmem:[#allocation9 + $0x60] ss:$24 sps:$4 sm:$0xff]   ;;  %v6419_v46 = vld [vmem:[#allocation43_spill] sm:$0xff] }
 0x1fa   :  { %v1783_v1 = vmul.f32 %v3799_v22, %v1781_v41  ;;  %v4879_v3 = vadd.f32 %v1784_v7, %v1782_v59  ;;  %v4912_v41 = vld [vmem:[#allocation9 + $0x94] ss:$24 sps:$4 sm:$0xff]   ;;  %v4917_v7 = vld [vmem:[#allocation9 + $0x90] ss:$24 sps:$4 sm:$0xff]  }
 0x1fb   :  { %v6414_v59 = vld [vmem:[#allocation35_spill] sm:$0xff]  ;;  %6416 = vst [vmem:[#allocation16_spill] sm:$0xff] %v4917_v7 }
 0x1fc   :  { %v4881_v30 = vadd.f32 %v1785_v52, %v1783_v1  ;;  %v4887_v44 = vpack.c.bf16 %v4879_v3, %v4879_v3  ;;  %v6417_v22 = vld [vmem:[#allocation39_spill] sm:$0xff]  ;;  %v6418_v1 = vld [vmem:[#allocation41_spill] sm:$0xff] }
 0x1fd   :  { %v6420_v52 = vld [vmem:[#allocation45_spill] sm:$0xff] }
 0x1fe   :  { %v1789_v53 = vpack.c.bf16 %v4881_v30, %v4881_v30 }
 0x200   :  { %1822 = vmatprep.mubr.bf16.mxu0 %v1789_v53  ;;  %1863 = vmatprep.mubr.bf16.mxu1 %v1789_v53 }
 0x201   :  { %1823 = vmatmul.mubr.bf16.vlgmr.msra.gmra.mrb[12].mxu0 %v4887_v44  ;;  %1864 = vmatmul.mubr.bf16.vlgmr.msra.gmra.mrb[12].mxu1 %v4887_v44 }
 0x202   :  { %1873 = vmatpush1.bf16.msra.mxu0 %v6408_v38  ;;  %1904 = vmatprep.mubr.bf16.mxu0 %v1789_v53  ;;  %v6421_v53 = vld [vmem:[#allocation47_spill] sm:$0xff] }
 0x203   :  { %1874 = vmatprep.subr.bf16.mxu0 %v6409_v49  ;;  %1990 = vmatpush1.bf16.msra.mxu1 %v4893_v20 }
 0x204   :  { %1991 = vmatprep.subr.bf16.mxu1 %v4896_v36 }
 0x206   :  { %1875 = vmatpush1.bf16.msra.mxu0 %v6410_v47 }
 0x207   :  { %1876 = vmatprep.subr.bf16.mxu0 %v6411_v57  ;;  %1992 = vmatpush1.bf16.msra.mxu1 %v4901_v24 }
 0x208   :  { %1993 = vmatprep.subr.bf16.mxu1 %v4904_v18 }
 0x20a   :  { %1877 = vmatpush1.bf16.msra.mxu0 %v6412_v14 }
 0x20b   :  { %1878 = vmatprep.subr.bf16.mxu0 %v6413_v61  ;;  %1994 = vmatpush1.bf16.msra.mxu1 %v4909_v15 }
 0x20c   :  { %1995 = vmatprep.subr.bf16.mxu1 %v4912_v41 }
 0x20e   :  { %1879 = vmatpush1.bf16.msra.mxu0 %v6414_v59 }
 0x20f   :  { %1880 = vmatprep.subr.bf16.mxu0 %v6415_v32  ;;  %1996 = vmatpush1.bf16.msra.mxu1 %v4917_v7  ;;  %v6422_v7 = vld [vmem:[#allocation49_spill] sm:$0xff] }
 0x210   :  { %1997 = vmatprep.subr.bf16.mxu1 %v4462_v0  ;;  %v6423_v0 = vld [vmem:[#allocation51_spill] sm:$0xff] }
 0x212   :  { %1881 = vmatpush1.bf16.msra.mxu0 %v6417_v22 }
 0x213   :  { %1882 = vmatprep.subr.bf16.mxu0 %v6418_v1  ;;  %1998 = vmatpush1.bf16.msra.mxu1 %v4464_v2  ;;  %v6424_v2 = vld [vmem:[#allocation53_spill] sm:$0xff] }
 0x214   :  { %1999 = vmatprep.subr.bf16.mxu1 %v4468_v4  ;;  %v6425_v4 = vld [vmem:[#allocation55_spill] sm:$0xff] }
 0x216   :  { %1883 = vmatpush1.bf16.msra.mxu0 %v6419_v46 }
 0x217   :  { %1884 = vmatprep.subr.bf16.mxu0 %v6420_v52  ;;  %2000 = vmatpush1.bf16.msra.mxu1 %v4470_v6  ;;  %v6426_v6 = vld [vmem:[#allocation57_spill] sm:$0xff] }
 0x218   :  { %2001 = vmatprep.subr.bf16.mxu1 %v4474_v8  ;;  %v6427_v8 = vld [vmem:[#allocation59_spill] sm:$0xff] }
 0x21a   :  { %1885 = vmatpush1.bf16.msra.mxu0 %v6421_v53 }
 0x21b   :  { %1886 = vmatprep.subr.bf16.mxu0 %v6422_v7  ;;  %2002 = vmatpush1.bf16.msra.mxu1 %v4476_v10  ;;  %v6428_v10 = vld [vmem:[#allocation61_spill] sm:$0xff] }
 0x21c   :  { %2003 = vmatprep.subr.bf16.mxu1 %v4480_v12  ;;  %v6429_v12 = vld [vmem:[#allocation63_spill] sm:$0xff] }
 0x21e   :  { %1887 = vmatpush1.bf16.msra.mxu0 %v6423_v0 }
 0x21f   :  { %1888 = vmatprep.subr.bf16.mxu0 %v6424_v2  ;;  %2004 = vmatpush1.bf16.msra.mxu1 %v4491_v16  ;;  %v6430_v16 = vld [vmem:[#allocation65_spill] sm:$0xff] }
 0x220   :  { %2005 = vmatprep.subr.bf16.mxu1 %v4499_v19  ;;  %v6431_v19 = vld [vmem:[#allocation67_spill] sm:$0xff] }
 0x222   :  { %1889 = vmatpush1.bf16.msra.mxu0 %v6425_v4 }
 0x223   :  { %1890 = vmatprep.subr.bf16.mxu0 %v6426_v6  ;;  %2006 = vmatpush1.bf16.msra.mxu1 %v4503_v21  ;;  %v6432_v21 = vld [vmem:[#allocation69_spill] sm:$0xff] }
 0x224   :  { %2007 = vmatprep.subr.bf16.mxu1 %v4506_v23  ;;  %v6433_v23 = vld [vmem:[#allocation71_spill] sm:$0xff] }
 0x226   :  { %1891 = vmatpush1.bf16.msra.mxu0 %v6427_v8 }
 0x227   :  { %1892 = vmatprep.subr.bf16.mxu0 %v6428_v10  ;;  %2008 = vmatpush1.bf16.msra.mxu1 %v4508_v25  ;;  %v6434_v25 = vld [vmem:[#allocation73_spill] sm:$0xff] }
 0x228   :  { %2009 = vmatprep.subr.bf16.mxu1 %v4512_v27  ;;  %v6435_v27 = vld [vmem:[#allocation30_spill] sm:$0xff] }
 0x22a   :  { %1893 = vmatpush1.bf16.msra.mxu0 %v6429_v12 }
 0x22b   :  { %1894 = vmatprep.subr.bf16.mxu0 %v6430_v16  ;;  %2010 = vmatpush1.bf16.msra.mxu1 %v4515_v29  ;;  %v6436_v29 = vld [vmem:[#allocation32_spill] sm:$0xff] }
 0x22c   :  { %2011 = vmatprep.subr.bf16.mxu1 %v4518_v31  ;;  %v6437_v31 = vld [vmem:[#allocation34_spill] sm:$0xff] }
 0x22e   :  { %1895 = vmatpush1.bf16.msra.mxu0 %v6431_v19 }
 0x22f   :  { %1896 = vmatprep.subr.bf16.mxu0 %v6432_v21  ;;  %2012 = vmatpush1.bf16.msra.mxu1 %v4520_v33  ;;  %v6438_v33 = vld [vmem:[#allocation36_spill] sm:$0xff] }
 0x230   :  { %2013 = vmatprep.subr.bf16.mxu1 %v4524_v35  ;;  %v6439_v35 = vld [vmem:[#allocation38_spill] sm:$0xff] }
 0x232   :  { %1897 = vmatpush1.bf16.msra.mxu0 %v6433_v23 }
 0x233   :  { %1898 = vmatprep.subr.bf16.mxu0 %v6434_v25  ;;  %2014 = vmatpush1.bf16.msra.mxu1 %v4527_v37  ;;  %v6440_v37 = vld [vmem:[#allocation40_spill] sm:$0xff] }
 0x234   :  { %2015 = vmatprep.subr.bf16.mxu1 %v4530_v39  ;;  %v6441_v39 = vld [vmem:[#allocation42_spill] sm:$0xff] }
 0x236   :  { %1899 = vmatpush1.bf16.msra.mxu0 %v4723_v55 }
 0x237   :  { %1900 = vmatprep.subr.bf16.mxu0 %v4729_v51  ;;  %2016 = vmatpush1.bf16.msra.mxu1 %v6389_v50  ;;  %v6447_v50 = vld [vmem:[#allocation54_spill] sm:$0xff] }
 0x238   :  { %2017 = vmatprep.subr.bf16.mxu1 %v6391_v54  ;;  %v6448_v54 = vld [vmem:[#allocation56_spill] sm:$0xff] }
 0x23a   :  { %1901 = vmatpush1.bf16.msra.mxu0 %v4735_v45 }
 0x23b   :  { %1902 = vmatprep.subr.bf16.mxu0 %v4741_v42  ;;  %2018 = vmatpush1.bf16.msra.mxu1 %v6392_v56  ;;  %v6449_v56 = vld [vmem:[#allocation58_spill] sm:$0xff] }
 0x23c   :  { %2019 = vmatprep.subr.bf16.mxu1 %v6393_v58  ;;  %v6450_v58 = vld [vmem:[#allocation60_spill] sm:$0xff] }
 0x23e   :  { %1903 = vmatpush1.bf16.msra.mxu0 %v4747_v40  ;;  %v6467_v40 = vld [vmem:[#allocation23_spill] sm:$0xff] }
 0x23f   :  { %2030 = vmatprep.subr.bf16.mxu0 %v4551_v63  ;;  %2020 = vmatpush1.bf16.msra.mxu1 %v6394_v60  ;;  %v6442_v63 = vld [vmem:[#allocation44_spill] sm:$0xff]  ;;  %v6451_v60 = vld [vmem:[#allocation62_spill] sm:$0xff] }
 0x240   :  { %2071 = vmatprep.subr.bf16.mxu1 %v6395_v62  ;;  %v6452_v62 = vld [vmem:[#allocation64_spill] sm:$0xff] }
 0x241   :  { %1905 = vmatmul.mubr.bf16.vlgmr.msra.gmra.mrb[16].mxu0 %v4887_v44  ;;  %v6453_v44 = vld [vmem:[#allocation66_spill] sm:$0xff] }
 0x242   :  { %2031 = vmatpush1.bf16.msra.mxu0 %v4560_v5  ;;  %v6443_v5 = vld [vmem:[#allocation46_spill] sm:$0xff] }
 0x243   :  { %2032 = vmatprep.subr.bf16.mxu0 %v4567_v9  ;;  %v6444_v9 = vld [vmem:[#allocation48_spill] sm:$0xff] }
 0x246   :  { %2033 = vmatpush1.bf16.msra.mxu0 %v4575_v13  ;;  %v6445_v13 = vld [vmem:[#allocation50_spill] sm:$0xff] }
 0x247   :  { %2034 = vmatprep.subr.bf16.mxu0 %v4581_v17  ;;  %v6446_v17 = vld [vmem:[#allocation52_spill] sm:$0xff] }
 0x24a   :  { %2035 = vmatpush1.bf16.msra.mxu0 %v6435_v27  ;;  %v6454_v27 = vld [vmem:[#allocation68_spill] sm:$0xff] }
 0x24b   :  { %2036 = vmatprep.subr.bf16.mxu0 %v6436_v29  ;;  %v6455_v29 = vld [vmem:[#allocation70_spill] sm:$0xff] }
 0x24e   :  { %2037 = vmatpush1.bf16.msra.mxu0 %v6437_v31  ;;  %v6456_v31 = vld [vmem:[#allocation72_spill] sm:$0xff] }
 0x24f   :  { %2038 = vmatprep.subr.bf16.mxu0 %v6438_v33  ;;  %v6457_v33 = vld [vmem:[#allocation74_spill] sm:$0xff] }
 0x252   :  { %2039 = vmatpush1.bf16.msra.mxu0 %v6439_v35  ;;  %v6458_v35 = vld [vmem:[#allocation75_spill] sm:$0xff] }
 0x253   :  { %2040 = vmatprep.subr.bf16.mxu0 %v6440_v37  ;;  %v6459_v37 = vld [vmem:[#allocation77_spill] sm:$0xff] }
 0x256   :  { %2041 = vmatpush1.bf16.msra.mxu0 %v6441_v39 }
 0x257   :  { %2042 = vmatprep.subr.bf16.mxu0 %v6442_v63  ;;  %v6466_v63 = vld [vmem:[#allocation22_spill] sm:$0xff] }
 0x25a   :  { %2043 = vmatpush1.bf16.msra.mxu0 %v6443_v5  ;;  %v6465_v5 = vld [vmem:[#allocation21_spill] sm:$0xff] }
 0x25b   :  { %2044 = vmatprep.subr.bf16.mxu0 %v6444_v9 }
 0x25e   :  { %2045 = vmatpush1.bf16.msra.mxu0 %v6445_v13  ;;  %v6464_v13 = vld [vmem:[#allocation20_spill] sm:$0xff] }
 0x25f   :  { %2046 = vmatprep.subr.bf16.mxu0 %v6446_v17  ;;  %v6463_v17 = vld [vmem:[#allocation19_spill] sm:$0xff] }
 0x262   :  { %2047 = vmatpush1.bf16.msra.mxu0 %v6447_v50 }
 0x263   :  { %2048 = vmatprep.subr.bf16.mxu0 %v6448_v54 }
 0x266   :  { %2049 = vmatpush1.bf16.msra.mxu0 %v6449_v56  ;;  %v6460_v56 = vld [vmem:[#allocation79_spill] sm:$0xff] }
 0x267   :  { %2050 = vmatprep.subr.bf16.mxu0 %v6450_v58  ;;  %v6461_v58 = vld [vmem:[#allocation81_spill] sm:$0xff] }
 0x26a   :  { %2051 = vmatpush1.bf16.msra.mxu0 %v6451_v60  ;;  %v5001_v60 = vld [vmem:[#allocation9 + $0x4] ss:$24 sps:$4 sm:$0xff]  }
 0x26b   :  { %2052 = vmatprep.subr.bf16.mxu0 %v6452_v62  ;;  %6462 = vst [vmem:[#allocation15_spill] sm:$0xff] %v5001_v60 }
 0x26e   :  { %2053 = vmatpush1.bf16.msra.mxu0 %v6453_v44 }
 0x26f   :  { %2054 = vmatprep.subr.bf16.mxu0 %v6454_v27 }
 0x272   :  { %2055 = vmatpush1.bf16.msra.mxu0 %v6455_v29 }
 0x273   :  { %2056 = vmatprep.subr.bf16.mxu0 %v6456_v31 }
 0x276   :  { %2057 = vmatpush1.bf16.msra.mxu0 %v6457_v33 }
 0x277   :  { %2058 = vmatprep.subr.bf16.mxu0 %v6458_v35 }
 0x27a   :  { %2059 = vmatpush1.bf16.msra.mxu0 %v6459_v37 }
 0x27b   :  { %2060 = vmatprep.subr.bf16.mxu0 %v6460_v56 }
 0x27e   :  { %2061 = vmatpush1.bf16.msra.mxu0 %v6461_v58 }
 0x27f   :  { %2186 = vmatprep.subr.bf16.mxu0 %v5001_v60 }
 0x2d4   :  { %v1824_v44 = vpop.f32.mrb[12].mxu0  ;;  %v1865_v27 = vpop.f32.mrb[12].mxu1 }
 0x2d5   :  { %v1826_v62 = vpop.f32.mrb[13].mxu0  ;;  %v1867_v29 = vpop.f32.mrb[13].mxu1  ;;  %v1825_v35 = vadd.f32 %v1824_v44, %v6463_v17  ;;  %v1866_v60 = vadd.f32 %v1865_v27, %v6467_v40 }
 0x2d6   :  { %v1828_v54 = vpop.f32.mrb[14].mxu0  ;;  %v1869_v31 = vpop.f32.mrb[14].mxu1  ;;  %v1827_v37 = vadd.f32 %v1826_v62, %v6464_v13  ;;  %v1868_v45 = vadd.f32 %v1867_v29, %v4855_v43 }
 0x2d7   :  { %v1829_v50 = vpop.f32.mrb[15].mxu0  ;;  %v1870_v33 = vpop.f32.mrb[15].mxu1  ;;  %v1915_v9 = vrot.slane %v1825_v35, 7  ;;  %v1935_v54 = vrot.slane %v1866_v60, 7 }
 0x2d8   :  { %v1916_v56 = vrot.slane %v1827_v37, 7  ;;  %v1936_v50 = vrot.slane %v1868_v45, 7  ;;  %v6468_v45 = vld [vmem:[#allocation25_spill] sm:$0xff] }
 0x2d9   :  { %v1919_v58 = vadd.f32 %v1915_v9, %v6465_v5  ;;  %v1939_v44 = vadd.f32 %v1935_v54, %v4859_v26 }
 0x2da   :  { %v1920_v39 = vadd.f32 %v1916_v56, %v6466_v63  ;;  %v1940_v62 = vadd.f32 %v1936_v50, %v4863_v48 }
 0x2db   :  { %v3447_v42 = vmul.f32 -1.442695, %v1919_v58  ;;  %v3449_v31 = vmul.f32 -1.442695, %v1939_v44 }
 0x2dc   :  { %v3448_v51 = vmul.f32 -1.442695, %v1920_v39  ;;  %v3450_v33 = vmul.f32 -1.442695, %v1940_v62 }
 0x2dd   :  { %3800 = vpow2.f32 %v3447_v42 }
 0x2de   :  { %3802 = vpow2.f32 %v3448_v51 }
 0x2df   :  { %3804 = vpow2.f32 %v3449_v31 }
 0x2e0   :  { %3806 = vpow2.f32 %v3450_v33 }
 0x2e7   :  { %v3801_v35 = vpop.eup %3800 }
 0x2e8   :  { %v3803_v9 = vpop.eup %3802  ;;  %v1927_v56 = vadd.f32 1.0, %v3801_v35 }
 0x2e9   :  { %v1928_v27 = vadd.f32 1.0, %v3803_v9  ;;  %v3805_v58 = vpop.eup %3804 }
 0x2ea   :  { %3808 = vrcp.f32 %v1927_v56  ;;  %v3807_v39 = vpop.eup %3806  ;;  %v1947_v42 = vadd.f32 1.0, %v3805_v58 }
 0x2eb   :  { %3810 = vrcp.f32 %v1928_v27  ;;  %v1948_v37 = vadd.f32 1.0, %v3807_v39 }
 0x2ec   :  { %3812 = vrcp.f32 %v1947_v42 }
 0x2ed   :  { %3814 = vrcp.f32 %v1948_v37 }
 0x2f4   :  { %v3809_v63 = vpop.eup %3808 }
 0x2f5   :  { %v3811_v33 = vpop.eup %3810 }
 0x2f6   :  { %v3813_v58 = vpop.eup %3812 }
 0x2f7   :  { %v3815_v39 = vpop.eup %3814 }
 0x314   :  { %v1906_v60 = vpop.f32.mrb[16].mxu0 }
 0x315   :  { %v1907_v51 = vadd.f32 %v1906_v60, %v6468_v45  ;;  %v1908_v29 = vpop.f32.mrb[17].mxu0  ;;  %v1965_v60 = vsub.f32 1.0, %v3813_v58 }
 0x316   :  { %v1909_v54 = vadd.f32 %v1908_v29, %v4857_v34  ;;  %v1910_v50 = vpop.f32.mrb[18].mxu0  ;;  %v1971_v29 = vrot.slane %v4879_v3, 7 }
 0x317   :  { %v1955_v44 = vrot.slane %v1907_v51, 7  ;;  %v1911_v62 = vpop.f32.mrb[19].mxu0  ;;  %v1966_v50 = vsub.f32 1.0, %v3815_v39 }
 0x318   :  { %v1956_v31 = vrot.slane %v1909_v54, 7  ;;  %v1972_v54 = vrot.slane %v4881_v30, 7 }
 0x319   :  { %v1959_v35 = vmul.f32 %v3809_v63, %v1955_v44  ;;  %v1975_v63 = vmul.f32 %v3813_v58, %v1971_v29  ;;  %v5133_v58 = vld [vmem:[#allocation9 + $0x2d4] ss:$24 sps:$4 sm:$0xff]  }
 0x31a   :  { %v1960_v9 = vmul.f32 %v3811_v33, %v1956_v31  ;;  %v1976_v44 = vmul.f32 %v3815_v39, %v1972_v54  ;;  %6482 = vst [vmem:[#allocation37_spill] sm:$0xff] %v5133_v58  ;;  %v5137_v39 = vld [vmem:[#allocation9 + $0xc] ss:$24 sps:$4 sm:$0xff]   ;;  %v5153_v54 = vld [vmem:[#allocation9 + $0x38] ss:$24 sps:$4 sm:$0xff]  }
 0x31b   :  { %v1961_v56 = vadd.f32 %v1959_v35, %v4870_v11  ;;  %6484 = vst [vmem:[#allocation39_spill] sm:$0xff] %v5137_v39  ;;  %v5143_v29 = vld [vmem:[#allocation9 + $0x14] ss:$24 sps:$4 sm:$0xff]   ;;  %6489 = vst [vmem:[#allocation49_spill] sm:$0xff] %v5153_v54 }
 0x31c   :  { %v1962_v27 = vadd.f32 %v1960_v9, %v4874_v28  ;;  %6486 = vst [vmem:[#allocation43_spill] sm:$0xff] %v5143_v29 }
 0x31d   :  { %3816 = vtanh.f32 %v1961_v56 }
 0x31e   :  { %3818 = vtanh.f32 %v1962_v27 }
 0x327   :  { %v3817_v51 = vpop.eup %3816 }
 0x328   :  { %v3819_v62 = vpop.eup %3818  ;;  %v1967_v42 = vmul.f32 %v3817_v51, %v1965_v60  ;;  %v5140_v60 = vld [vmem:[#allocation9 + $0x2d0] ss:$24 sps:$4 sm:$0xff]  }
 0x329   :  { %v1968_v37 = vmul.f32 %v3819_v62, %v1966_v50  ;;  %6485 = vst [vmem:[#allocation41_spill] sm:$0xff] %v5140_v60  ;;  %v5147_v51 = vld [vmem:[#allocation9 + $0x8] ss:$24 sps:$4 sm:$0xff]   ;;  %v5150_v50 = vld [vmem:[#allocation9 + $0x3c] ss:$24 sps:$4 sm:$0xff]  }
 0x32a   :  { %v5018_v31 = vadd.f32 %v1975_v63, %v1967_v42  ;;  %6487 = vst [vmem:[#allocation45_spill] sm:$0xff] %v5147_v51  ;;  %6488 = vst [vmem:[#allocation47_spill] sm:$0xff] %v5150_v50  ;;  %v5156_v62 = vld [vmem:[#allocation9 + $0x6c] ss:$24 sps:$4 sm:$0xff]   ;;  %v5159_v42 = vld [vmem:[#allocation9 + $0x68] ss:$24 sps:$4 sm:$0xff]  }
 0x32b   :  { %v5020_v33 = vadd.f32 %v1976_v44, %v1968_v37  ;;  %6490 = vst [vmem:[#allocation51_spill] sm:$0xff] %v5156_v62  ;;  %6491 = vst [vmem:[#allocation53_spill] sm:$0xff] %v5159_v42  ;;  %v5162_v63 = vld [vmem:[#allocation9 + $0x9c] ss:$24 sps:$4 sm:$0xff]   ;;  %v5165_v37 = vld [vmem:[#allocation9 + $0x98] ss:$24 sps:$4 sm:$0xff]  }
 0x32c   :  { %v1979_v35 = vpack.c.bf16 %v5018_v31, %v5018_v31  ;;  %6492 = vst [vmem:[#allocation55_spill] sm:$0xff] %v5162_v63  ;;  %6493 = vst [vmem:[#allocation57_spill] sm:$0xff] %v5165_v37  ;;  %v5168_v44 = vld [vmem:[#allocation9 + $0xcc] ss:$24 sps:$4 sm:$0xff]  }
 0x32d   :  { %v1980_v9 = vpack.c.bf16 %v5020_v33, %v5020_v33  ;;  %6494 = vst [vmem:[#allocation59_spill] sm:$0xff] %v5168_v44 }
 0x32e   :  { %v5026_v27 = vshrl.u32 %v1979_v35, 16  ;;  %v5171_v35 = vld [vmem:[#allocation9 + $0xc8] ss:$24 sps:$4 sm:$0xff]  }
 0x32f   :  { %v1985_v56 = vshrl.u32 %v1980_v9, 16  ;;  %6495 = vst [vmem:[#allocation61_spill] sm:$0xff] %v5171_v35  ;;  %v5174_v9 = vld [vmem:[#allocation9 + $0xfc] ss:$24 sps:$4 sm:$0xff]  }
 0x330   :  { %6496 = vst [vmem:[#allocation63_spill] sm:$0xff] %v5174_v9 }
 0x331   :  { %2021 = vmatprep.mubr.bf16.mxu1 %v1985_v56  ;;  %2062 = vmatprep.mubr.bf16.mxu0 %v1985_v56 }
 0x332   :  { %2022 = vmatmul.mubr.bf16.vlgmr.msra.gmra.mrb[16].mxu1 %v5026_v27  ;;  %2063 = vmatmul.mubr.bf16.vlgmr.msra.gmra.mrb[20].mxu0 %v5026_v27 }
 0x333   :  { %2072 = vmatpush1.bf16.msra.mxu1 %v6408_v38  ;;  %2103 = vmatprep.mubr.bf16.mxu1 %v1985_v56  ;;  %v6469_v38 = vld [vmem:[#allocation16_spill] sm:$0xff]  ;;  %v6497_v56 = vld [vmem:[#allocation42_spill] sm:$0xff] }
 0x334   :  { %2073 = vmatprep.subr.bf16.mxu1 %v6409_v49  ;;  %2187 = vmatpush1.bf16.msra.mxu0 %v4893_v20  ;;  %v5045_v49 = vld [vmem:[#allocation9 + $0xc4] ss:$24 sps:$4 sm:$0xff]  }
 0x335   :  { %2188 = vmatprep.subr.bf16.mxu0 %v4896_v36 }
 0x337   :  { %2074 = vmatpush1.bf16.msra.mxu1 %v6410_v47  ;;  %v5050_v47 = vld [vmem:[#allocation9 + $0xc0] ss:$24 sps:$4 sm:$0xff]  }
 0x338   :  { %2075 = vmatprep.subr.bf16.mxu1 %v6411_v57  ;;  %2189 = vmatpush1.bf16.msra.mxu0 %v4901_v24  ;;  %v5053_v57 = vld [vmem:[#allocation9 + $0xf4] ss:$24 sps:$4 sm:$0xff]  }
 0x339   :  { %2190 = vmatprep.subr.bf16.mxu0 %v4904_v18 }
 0x33b   :  { %2076 = vmatpush1.bf16.msra.mxu1 %v6412_v14  ;;  %v5058_v14 = vld [vmem:[#allocation9 + $0xf0] ss:$24 sps:$4 sm:$0xff]  }
 0x33c   :  { %2077 = vmatprep.subr.bf16.mxu1 %v6413_v61  ;;  %2191 = vmatpush1.bf16.msra.mxu0 %v4909_v15  ;;  %v5061_v61 = vld [vmem:[#allocation9 + $0x124] ss:$24 sps:$4 sm:$0xff]  }
 0x33d   :  { %2192 = vmatprep.subr.bf16.mxu0 %v4912_v41 }
 0x33f   :  { %2078 = vmatpush1.bf16.msra.mxu1 %v6414_v59  ;;  %v5066_v59 = vld [vmem:[#allocation9 + $0x120] ss:$24 sps:$4 sm:$0xff]  }
 0x340   :  { %2079 = vmatprep.subr.bf16.mxu1 %v6415_v32  ;;  %2193 = vmatpush1.bf16.msra.mxu0 %v6469_v38  ;;  %v5069_v32 = vld [vmem:[#allocation9 + $0x154] ss:$24 sps:$4 sm:$0xff]  }
 0x341   :  { %2194 = vmatprep.subr.bf16.mxu0 %v5045_v49 }
 0x343   :  { %2080 = vmatpush1.bf16.msra.mxu1 %v6417_v22  ;;  %v5074_v22 = vld [vmem:[#allocation9 + $0x150] ss:$24 sps:$4 sm:$0xff]  }
 0x344   :  { %2081 = vmatprep.subr.bf16.mxu1 %v6418_v1  ;;  %2195 = vmatpush1.bf16.msra.mxu0 %v5050_v47  ;;  %v5077_v1 = vld [vmem:[#allocation9 + $0x184] ss:$24 sps:$4 sm:$0xff]  }
 0x345   :  { %2196 = vmatprep.subr.bf16.mxu0 %v5053_v57 }
 0x347   :  { %2082 = vmatpush1.bf16.msra.mxu1 %v6419_v46  ;;  %v5085_v46 = vld [vmem:[#allocation9 + $0x1b4] ss:$24 sps:$4 sm:$0xff]  }
 0x348   :  { %2083 = vmatprep.subr.bf16.mxu1 %v6420_v52  ;;  %2197 = vmatpush1.bf16.msra.mxu0 %v5058_v14  ;;  %v5090_v52 = vld [vmem:[#allocation9 + $0x1b0] ss:$24 sps:$4 sm:$0xff]  }
 0x349   :  { %2198 = vmatprep.subr.bf16.mxu0 %v5061_v61 }
 0x34b   :  { %2084 = vmatpush1.bf16.msra.mxu1 %v6421_v53  ;;  %v5093_v53 = vld [vmem:[#allocation9 + $0x1e4] ss:$24 sps:$4 sm:$0xff]  }
 0x34c   :  { %2085 = vmatprep.subr.bf16.mxu1 %v6422_v7  ;;  %2199 = vmatpush1.bf16.msra.mxu0 %v5066_v59  ;;  %v5082_v7 = vld [vmem:[#allocation9 + $0x180] ss:$24 sps:$4 sm:$0xff]  }
 0x34d   :  { %2200 = vmatprep.subr.bf16.mxu0 %v5069_v32 }
 0x34f   :  { %2086 = vmatpush1.bf16.msra.mxu1 %v6423_v0  ;;  %v5098_v0 = vld [vmem:[#allocation9 + $0x1e0] ss:$24 sps:$4 sm:$0xff]  }
 0x350   :  { %2087 = vmatprep.subr.bf16.mxu1 %v6424_v2  ;;  %2201 = vmatpush1.bf16.msra.mxu0 %v5074_v22  ;;  %6470 = vst [vmem:[#allocation24_spill] sm:$0xff] %v5098_v0  ;;  %v5101_v2 = vld [vmem:[#allocation9 + $0x214] ss:$24 sps:$4 sm:$0xff]  }
 0x351   :  { %2202 = vmatprep.subr.bf16.mxu0 %v5077_v1  ;;  %6471 = vst [vmem:[#allocation18_spill] sm:$0xff] %v5101_v2 }
 0x353   :  { %2088 = vmatpush1.bf16.msra.mxu1 %v6425_v4  ;;  %v5106_v4 = vld [vmem:[#allocation9 + $0x210] ss:$24 sps:$4 sm:$0xff]  }
 0x354   :  { %2089 = vmatprep.subr.bf16.mxu1 %v6426_v6  ;;  %2203 = vmatpush1.bf16.msra.mxu0 %v5082_v7  ;;  %6472 = vst [vmem:[#allocation26_spill] sm:$0xff] %v5106_v4  ;;  %v5109_v6 = vld [vmem:[#allocation9 + $0x244] ss:$24 sps:$4 sm:$0xff]  }
 0x355   :  { %2204 = vmatprep.subr.bf16.mxu0 %v5085_v46  ;;  %6473 = vst [vmem:[#allocation27_spill] sm:$0xff] %v5109_v6 }
 0x357   :  { %2090 = vmatpush1.bf16.msra.mxu1 %v6427_v8  ;;  %v5114_v8 = vld [vmem:[#allocation9 + $0x240] ss:$24 sps:$4 sm:$0xff]  }
 0x358   :  { %2091 = vmatprep.subr.bf16.mxu1 %v6428_v10  ;;  %2205 = vmatpush1.bf16.msra.mxu0 %v5090_v52  ;;  %6474 = vst [vmem:[#allocation28_spill] sm:$0xff] %v5114_v8  ;;  %v5117_v10 = vld [vmem:[#allocation9 + $0x274] ss:$24 sps:$4 sm:$0xff]  }
 0x359   :  { %2206 = vmatprep.subr.bf16.mxu0 %v5093_v53  ;;  %6475 = vst [vmem:[#allocation29_spill] sm:$0xff] %v5117_v10 }
 0x35b   :  { %2092 = vmatpush1.bf16.msra.mxu1 %v6429_v12  ;;  %v6476_v12 = vld [vmem:[#allocation76_spill] sm:$0xff] }
 0x35c   :  { %2093 = vmatprep.subr.bf16.mxu1 %v6430_v16  ;;  %2207 = vmatpush1.bf16.msra.mxu0 %v5098_v0  ;;  %v5122_v16 = vld [vmem:[#allocation9 + $0x270] ss:$24 sps:$4 sm:$0xff]  }
 0x35d   :  { %2208 = vmatprep.subr.bf16.mxu0 %v5101_v2  ;;  %6477 = vst [vmem:[#allocation31_spill] sm:$0xff] %v5122_v16 }
 0x35f   :  { %2094 = vmatpush1.bf16.msra.mxu1 %v6431_v19  ;;  %v5125_v19 = vld [vmem:[#allocation9 + $0x2a4] ss:$24 sps:$4 sm:$0xff]  }
 0x360   :  { %2095 = vmatprep.subr.bf16.mxu1 %v6432_v21  ;;  %2209 = vmatpush1.bf16.msra.mxu0 %v5106_v4  ;;  %6478 = vst [vmem:[#allocation33_spill] sm:$0xff] %v5125_v19  ;;  %v6479_v21 = vld [vmem:[#allocation78_spill] sm:$0xff] }
 0x361   :  { %2210 = vmatprep.subr.bf16.mxu0 %v5109_v6 }
 0x363   :  { %2096 = vmatpush1.bf16.msra.mxu1 %v6433_v23  ;;  %v6480_v23 = vld [vmem:[#allocation80_spill] sm:$0xff] }
 0x364   :  { %2097 = vmatprep.subr.bf16.mxu1 %v6434_v25  ;;  %2211 = vmatpush1.bf16.msra.mxu0 %v5114_v8  ;;  %v5130_v25 = vld [vmem:[#allocation9 + $0x2a0] ss:$24 sps:$4 sm:$0xff]  }
 0x365   :  { %2212 = vmatprep.subr.bf16.mxu0 %v5117_v10  ;;  %6481 = vst [vmem:[#allocation35_spill] sm:$0xff] %v5130_v25 }
 0x367   :  { %2098 = vmatpush1.bf16.msra.mxu1 %v4723_v55  ;;  %v6483_v55 = vld [vmem:[#allocation82_spill] sm:$0xff] }
 0x368   :  { %2099 = vmatprep.subr.bf16.mxu1 %v6476_v12  ;;  %2213 = vmatpush1.bf16.msra.mxu0 %v5122_v16  ;;  %v6499_v12 = vld [vmem:[#allocation46_spill] sm:$0xff] }
 0x369   :  { %2214 = vmatprep.subr.bf16.mxu0 %v5125_v19 }
 0x36b   :  { %2100 = vmatpush1.bf16.msra.mxu1 %v6479_v21  ;;  %v6500_v21 = vld [vmem:[#allocation48_spill] sm:$0xff] }
 0x36c   :  { %2101 = vmatprep.subr.bf16.mxu1 %v6480_v23  ;;  %2215 = vmatpush1.bf16.msra.mxu0 %v5130_v25  ;;  %v6501_v23 = vld [vmem:[#allocation50_spill] sm:$0xff] }
 0x36d   :  { %2216 = vmatprep.subr.bf16.mxu0 %v5133_v58 }
 0x36f   :  { %2102 = vmatpush1.bf16.msra.mxu1 %v6483_v55  ;;  %v6502_v55 = vld [vmem:[#allocation52_spill] sm:$0xff] }
 0x370   :  { %2227 = vmatprep.subr.bf16.mxu1 %v5137_v39  ;;  %2217 = vmatpush1.bf16.msra.mxu0 %v5140_v60 }
 0x371   :  { %2268 = vmatprep.subr.bf16.mxu0 %v5143_v29 }
 0x372   :  { %2104 = vmatmul.mubr.bf16.vlgmr.msra.gmra.mrb[20].mxu1 %v5026_v27  ;;  %v6498_v27 = vld [vmem:[#allocation44_spill] sm:$0xff] }
 0x373   :  { %2228 = vmatpush1.bf16.msra.mxu1 %v5147_v51 }
 0x374   :  { %2229 = vmatprep.subr.bf16.mxu1 %v5150_v50 }
 0x377   :  { %2230 = vmatpush1.bf16.msra.mxu1 %v5153_v54 }
 0x378   :  { %2231 = vmatprep.subr.bf16.mxu1 %v5156_v62 }
 0x37b   :  { %2232 = vmatpush1.bf16.msra.mxu1 %v5159_v42 }
 0x37c   :  { %2233 = vmatprep.subr.bf16.mxu1 %v5162_v63  ;;  %v6506_v63 = vld [vmem:[#allocation60_spill] sm:$0xff] }
 0x37f   :  { %2234 = vmatpush1.bf16.msra.mxu1 %v5165_v37  ;;  %v6504_v37 = vld [vmem:[#allocation56_spill] sm:$0xff] }
 0x380   :  { %2235 = vmatprep.subr.bf16.mxu1 %v5168_v44  ;;  %v6503_v44 = vld [vmem:[#allocation54_spill] sm:$0xff] }
 0x383   :  { %2236 = vmatpush1.bf16.msra.mxu1 %v5171_v35  ;;  %v6505_v35 = vld [vmem:[#allocation58_spill] sm:$0xff] }
 0x384   :  { %2237 = vmatprep.subr.bf16.mxu1 %v5174_v9  ;;  %v6507_v9 = vld [vmem:[#allocation62_spill] sm:$0xff] }
 0x387   :  { %2238 = vmatpush1.bf16.msra.mxu1 %v6497_v56  ;;  %v6508_v56 = vld [vmem:[#allocation64_spill] sm:$0xff] }
 0x388   :  { %2239 = vmatprep.subr.bf16.mxu1 %v6498_v27  ;;  %v6509_v27 = vld [vmem:[#allocation66_spill] sm:$0xff] }
 0x38b   :  { %2240 = vmatpush1.bf16.msra.mxu1 %v6499_v12  ;;  %v6510_v12 = vld [vmem:[#allocation68_spill] sm:$0xff] }
 0x38c   :  { %2241 = vmatprep.subr.bf16.mxu1 %v6500_v21  ;;  %v6511_v21 = vld [vmem:[#allocation70_spill] sm:$0xff] }
 0x38f   :  { %2242 = vmatpush1.bf16.msra.mxu1 %v6501_v23  ;;  %v6512_v23 = vld [vmem:[#allocation72_spill] sm:$0xff] }
 0x390   :  { %2243 = vmatprep.subr.bf16.mxu1 %v6502_v55  ;;  %v6513_v55 = vld [vmem:[#allocation74_spill] sm:$0xff] }
 0x393   :  { %2244 = vmatpush1.bf16.msra.mxu1 %v6503_v44  ;;  %v6514_v44 = vld [vmem:[#allocation75_spill] sm:$0xff] }
 0x394   :  { %2245 = vmatprep.subr.bf16.mxu1 %v6504_v37  ;;  %v6515_v37 = vld [vmem:[#allocation77_spill] sm:$0xff] }
 0x397   :  { %2246 = vmatpush1.bf16.msra.mxu1 %v6505_v35  ;;  %v6516_v35 = vld [vmem:[#allocation79_spill] sm:$0xff] }
 0x398   :  { %2247 = vmatprep.subr.bf16.mxu1 %v6506_v63  ;;  %v6517_v63 = vld [vmem:[#allocation81_spill] sm:$0xff] }
 0x39b   :  { %2248 = vmatpush1.bf16.msra.mxu1 %v6507_v9  ;;  %v6518_v9 = vld [vmem:[#allocation15_spill] sm:$0xff] }
 0x39c   :  { %2249 = vmatprep.subr.bf16.mxu1 %v6508_v56 }
 0x39f   :  { %2250 = vmatpush1.bf16.msra.mxu1 %v6509_v27 }
 0x3a0   :  { %2251 = vmatprep.subr.bf16.mxu1 %v6510_v12 }
 0x3a3   :  { %2252 = vmatpush1.bf16.msra.mxu1 %v6511_v21 }
 0x3a4   :  { %2253 = vmatprep.subr.bf16.mxu1 %v6512_v23 }
 0x3a7   :  { %2254 = vmatpush1.bf16.msra.mxu1 %v6513_v55 }
 0x3a8   :  { %2255 = vmatprep.subr.bf16.mxu1 %v6514_v44 }
 0x3ab   :  { %2256 = vmatpush1.bf16.msra.mxu1 %v6515_v37 }
 0x3ac   :  { %2257 = vmatprep.subr.bf16.mxu1 %v6516_v35 }
 0x3af   :  { %2258 = vmatpush1.bf16.msra.mxu1 %v6517_v63 }
 0x3b0   :  { %2387 = vmatprep.subr.bf16.mxu1 %v6518_v9 }
 0x405   :  { %v2023_v56 = vpop.f32.mrb[16].mxu1  ;;  %v2064_v27 = vpop.f32.mrb[20].mxu0 }
 0x406   :  { %v2065_v12 = vadd.f32 %v2064_v27, %v6467_v40  ;;  %v2025_v42 = vpop.f32.mrb[17].mxu1  ;;  %v2066_v21 = vpop.f32.mrb[21].mxu0 }
 0x407   :  { %v2067_v23 = vadd.f32 %v2066_v21, %v4855_v43  ;;  %v2027_v62 = vpop.f32.mrb[18].mxu1  ;;  %v2068_v55 = vpop.f32.mrb[22].mxu0 }
 0x408   :  { %v2134_v54 = vrot.slane %v2065_v12, 6  ;;  %v2028_v44 = vpop.f32.mrb[19].mxu1  ;;  %v2069_v50 = vpop.f32.mrb[23].mxu0  ;;  %v2024_v62 = vadd.f32 %v2023_v56, %v6463_v17  ;;  %v2026_v12 = vadd.f32 %v2025_v42, %v6464_v13 }
 0x409   :  { %v2135_v37 = vrot.slane %v2067_v23, 6  ;;  %v6519_v44 = vld [vmem:[#allocation22_spill] sm:$0xff] }
 0x40a   :  { %v2138_v35 = vadd.f32 %v2134_v54, %v4859_v26  ;;  %v2114_v50 = vrot.slane %v2024_v62, 6  ;;  %v2115_v21 = vrot.slane %v2026_v12, 6  ;;  %v2170_v54 = vrot.slane %v5018_v31, 7 }
 0x40b   :  { %v2139_v63 = vadd.f32 %v2135_v37, %v4863_v48 }
 0x40c   :  { %v3453_v51 = vmul.f32 -1.442695, %v2138_v35  ;;  %v2118_v55 = vadd.f32 %v2114_v50, %v6465_v5 }
 0x40d   :  { %v3454_v9 = vmul.f32 -1.442695, %v2139_v63 }
 0x40e   :  { %3820 = vpow2.f32 %v3453_v51  ;;  %v2119_v51 = vadd.f32 %v2115_v21, %v6519_v44 }
 0x40f   :  { %3822 = vpow2.f32 %v3454_v9  ;;  %v2171_v9 = vrot.slane %v5020_v33, 7 }
 0x410   :  { %v3452_v63 = vmul.f32 -1.442695, %v2119_v51 }
 0x418   :  { %v3821_v29 = vpop.eup %3820 }
 0x419   :  { %v2146_v27 = vadd.f32 1.0, %v3821_v29  ;;  %v3823_v40 = vpop.eup %3822 }
 0x41a   :  { %v2147_v60 = vadd.f32 1.0, %v3823_v40  ;;  %v3451_v40 = vmul.f32 -1.442695, %v2118_v55 }
 0x41b   :  { %3824 = vrcp.f32 %v2146_v27 }
 0x41c   :  { %3826 = vrcp.f32 %v2147_v60 }
 0x41d   :  { %3828 = vpow2.f32 %v3451_v40 }
 0x41e   :  { %3830 = vpow2.f32 %v3452_v63 }
 0x425   :  { %v3825_v23 = vpop.eup %3824 }
 0x426   :  { %v2174_v29 = vmul.f32 %v3825_v23, %v2170_v54  ;;  %v3827_v37 = vpop.eup %3826 }
 0x427   :  { %v2175_v35 = vmul.f32 %v3827_v37, %v2171_v9  ;;  %v3829_v60 = vpop.eup %3828 }
 0x428   :  { %v3831_v42 = vpop.eup %3830  ;;  %v2126_v56 = vadd.f32 1.0, %v3829_v60 }
 0x429   :  { %v2127_v27 = vadd.f32 1.0, %v3831_v42  ;;  %v2164_v42 = vsub.f32 1.0, %v3825_v23 }
 0x42a   :  { %3832 = vrcp.f32 %v2126_v56 }
 0x42b   :  { %3834 = vrcp.f32 %v2127_v27  ;;  %v2165_v27 = vsub.f32 1.0, %v3827_v37 }
 0x434   :  { %v3833_v9 = vpop.eup %3832 }
 0x435   :  { %v3835_v51 = vpop.eup %3834 }
 0x445   :  { %v2105_v62 = vpop.f32.mrb[20].mxu1 }
 0x446   :  { %v2106_v12 = vadd.f32 %v2105_v62, %v6468_v45  ;;  %v2107_v50 = vpop.f32.mrb[21].mxu1 }
 0x447   :  { %v2108_v21 = vadd.f32 %v2107_v50, %v4857_v34  ;;  %v2109_v44 = vpop.f32.mrb[22].mxu1 }
 0x448   :  { %v2154_v54 = vrot.slane %v2106_v12, 6  ;;  %v2110_v5 = vpop.f32.mrb[23].mxu1  ;;  %v3171_v12 = vsel %vm247_vm0, %v4879_v3, %v5018_v31  ;;  %v5242_v31 = vld [vmem:[#allocation9 + $0x44] ss:$24 sps:$4 sm:$0xff]  }
 0x449   :  { %v2155_v55 = vrot.slane %v2108_v21, 6  ;;  %v3172_v21 = vsel %vm247_vm0, %v4881_v30, %v5020_v33  ;;  %v5239_v30 = vld [vmem:[#allocation9 + $0x10] ss:$24 sps:$4 sm:$0xff]   ;;  %v5247_v33 = vld [vmem:[#allocation9 + $0x40] ss:$24 sps:$4 sm:$0xff]  }
 0x44a   :  { %v2158_v40 = vmul.f32 %v3833_v9, %v2154_v54  ;;  %v5255_v54 = vld [vmem:[#allocation9 + $0x70] ss:$24 sps:$4 sm:$0xff]   ;;  %v5258_v9 = vld [vmem:[#allocation9 + $0xa4] ss:$24 sps:$4 sm:$0xff]  }
 0x44b   :  { %v2159_v63 = vmul.f32 %v3835_v51, %v2155_v55  ;;  %v5290_v55 = vld [vmem:[#allocation9 + $0x164] ss:$24 sps:$4 sm:$0xff]   ;;  %v5295_v51 = vld [vmem:[#allocation9 + $0x160] ss:$24 sps:$4 sm:$0xff]  }
 0x44c   :  { %v2160_v13 = vadd.f32 %v2158_v40, %v4870_v11  ;;  %v5298_v40 = vld [vmem:[#allocation9 + $0x194] ss:$24 sps:$4 sm:$0xff]  }
 0x44d   :  { %v2161_v60 = vadd.f32 %v2159_v63, %v4874_v28  ;;  %v5303_v63 = vld [vmem:[#allocation9 + $0x190] ss:$24 sps:$4 sm:$0xff]  }
 0x44e   :  { %3836 = vtanh.f32 %v2160_v13 }
 0x44f   :  { %3838 = vtanh.f32 %v2161_v60  ;;  %v5306_v60 = vld [vmem:[#allocation9 + $0x1c4] ss:$24 sps:$4 sm:$0xff]  }
 0x458   :  { %v3837_v56 = vpop.eup %3836 }
 0x459   :  { %v3839_v62 = vpop.eup %3838  ;;  %v2166_v45 = vmul.f32 %v3837_v56, %v2164_v42  ;;  %v5311_v42 = vld [vmem:[#allocation9 + $0x1c0] ss:$24 sps:$4 sm:$0xff]   ;;  %v5314_v56 = vld [vmem:[#allocation9 + $0x1f4] ss:$24 sps:$4 sm:$0xff]  }
 0x45a   :  { %v2167_v50 = vmul.f32 %v3839_v62, %v2165_v27  ;;  %v5319_v27 = vld [vmem:[#allocation9 + $0x1f0] ss:$24 sps:$4 sm:$0xff]   ;;  %v5322_v62 = vld [vmem:[#allocation9 + $0x224] ss:$24 sps:$4 sm:$0xff]  }
 0x45b   :  { %v5213_v44 = vadd.f32 %v2174_v29, %v2166_v45  ;;  %6520 = vst [vmem:[#allocation65_spill] sm:$0xff] %v5322_v62 }
 0x45c   :  { %v5215_v5 = vadd.f32 %v2175_v35, %v2167_v50  ;;  %v5250_v35 = vld [vmem:[#allocation9 + $0x74] ss:$24 sps:$4 sm:$0xff]   ;;  %v5327_v50 = vld [vmem:[#allocation9 + $0x220] ss:$24 sps:$4 sm:$0xff]  }
 0x45d   :  { %v2178_v13 = vpack.c.bf16 %v5213_v44, %v5213_v44  ;;  %v5227_v23 = vsel %vm250_vm1, %v3171_v12, %v5213_v44  ;;  %6521 = vst [vmem:[#allocation67_spill] sm:$0xff] %v5327_v50  ;;  %v5330_v12 = vld [vmem:[#allocation9 + $0x254] ss:$24 sps:$4 sm:$0xff]  }
 0x45e   :  { %v2179_v45 = vpack.c.bf16 %v5215_v5, %v5215_v5  ;;  %v5233_v29 = vsel %vm250_vm1, %v3172_v21, %v5215_v5  ;;  %6522 = vst [vmem:[#allocation69_spill] sm:$0xff] %v5330_v12  ;;  %v5335_v21 = vld [vmem:[#allocation9 + $0x250] ss:$24 sps:$4 sm:$0xff]  }
 0x45f   :  { %v5235_v3 = vrot.slane %v2178_v13, 1  ;;  %6523 = vst [vmem:[#allocation71_spill] sm:$0xff] %v5335_v21  ;;  %v5338_v13 = vld [vmem:[#allocation9 + $0x284] ss:$24 sps:$4 sm:$0xff]  }
 0x460   :  { %v2183_v37 = vrot.slane %v2179_v45, 1  ;;  %6524 = vst [vmem:[#allocation73_spill] sm:$0xff] %v5338_v13  ;;  %v5343_v45 = vld [vmem:[#allocation9 + $0x280] ss:$24 sps:$4 sm:$0xff]  }
 0x461   :  { %6525 = vst [vmem:[#allocation30_spill] sm:$0xff] %v5343_v45 }
 0x462   :  { %2218 = vmatprep.mubr.bf16.mxu0 %v2183_v37  ;;  %2259 = vmatprep.mubr.bf16.mxu1 %v2183_v37 }
 0x463   :  { %2219 = vmatmul.mubr.bf16.vlgmr.msra.gmra.mrb[24].mxu0 %v5235_v3  ;;  %2260 = vmatmul.mubr.bf16.vlgmr.msra.gmra.mrb[24].mxu1 %v5235_v3 }
 0x464   :  { %2269 = vmatpush1.bf16.msra.mxu0 %v5239_v30  ;;  %2300 = vmatprep.mubr.bf16.mxu0 %v2183_v37  ;;  %v5346_v37 = vld [vmem:[#allocation9 + $0x2b4] ss:$24 sps:$4 sm:$0xff]  }
 0x465   :  { %2270 = vmatprep.subr.bf16.mxu0 %v5242_v31  ;;  %2388 = vmatpush1.bf16.msra.mxu1 %v4893_v20  ;;  %v5263_v20 = vld [vmem:[#allocation9 + $0xa0] ss:$24 sps:$4 sm:$0xff]   ;;  %6526 = vst [vmem:[#allocation32_spill] sm:$0xff] %v5346_v37 }
 0x466   :  { %2389 = vmatprep.subr.bf16.mxu1 %v4896_v36  ;;  %v5266_v36 = vld [vmem:[#allocation9 + $0xd4] ss:$24 sps:$4 sm:$0xff]  }
 0x468   :  { %2271 = vmatpush1.bf16.msra.mxu0 %v5247_v33 }
 0x469   :  { %2272 = vmatprep.subr.bf16.mxu0 %v5250_v35  ;;  %2390 = vmatpush1.bf16.msra.mxu1 %v4901_v24  ;;  %v5271_v24 = vld [vmem:[#allocation9 + $0xd0] ss:$24 sps:$4 sm:$0xff]  }
 0x46a   :  { %2391 = vmatprep.subr.bf16.mxu1 %v4904_v18  ;;  %v5274_v18 = vld [vmem:[#allocation9 + $0x104] ss:$24 sps:$4 sm:$0xff]  }
 0x46c   :  { %2273 = vmatpush1.bf16.msra.mxu0 %v5255_v54 }
 0x46d   :  { %2274 = vmatprep.subr.bf16.mxu0 %v5258_v9  ;;  %2392 = vmatpush1.bf16.msra.mxu1 %v4909_v15  ;;  %v5279_v15 = vld [vmem:[#allocation9 + $0x100] ss:$24 sps:$4 sm:$0xff]  }
 0x46e   :  { %2393 = vmatprep.subr.bf16.mxu1 %v4912_v41  ;;  %v5282_v41 = vld [vmem:[#allocation9 + $0x134] ss:$24 sps:$4 sm:$0xff]  }
 0x470   :  { %2275 = vmatpush1.bf16.msra.mxu0 %v5263_v20 }
 0x471   :  { %2276 = vmatprep.subr.bf16.mxu0 %v5266_v36  ;;  %2394 = vmatpush1.bf16.msra.mxu1 %v6469_v38  ;;  %v5287_v38 = vld [vmem:[#allocation9 + $0x130] ss:$24 sps:$4 sm:$0xff]  }
 0x472   :  { %2395 = vmatprep.subr.bf16.mxu1 %v5045_v49 }
 0x474   :  { %2277 = vmatpush1.bf16.msra.mxu0 %v5271_v24 }
 0x475   :  { %2278 = vmatprep.subr.bf16.mxu0 %v5274_v18  ;;  %2396 = vmatpush1.bf16.msra.mxu1 %v5050_v47 }
 0x476   :  { %2397 = vmatprep.subr.bf16.mxu1 %v5053_v57 }
 0x478   :  { %2279 = vmatpush1.bf16.msra.mxu0 %v5279_v15 }
 0x479   :  { %2280 = vmatprep.subr.bf16.mxu0 %v5282_v41  ;;  %2398 = vmatpush1.bf16.msra.mxu1 %v5058_v14 }
 0x47a   :  { %2399 = vmatprep.subr.bf16.mxu1 %v5061_v61 }
 0x47c   :  { %2281 = vmatpush1.bf16.msra.mxu0 %v5287_v38 }
 0x47d   :  { %2282 = vmatprep.subr.bf16.mxu0 %v5290_v55  ;;  %2400 = vmatpush1.bf16.msra.mxu1 %v5066_v59 }
 0x47e   :  { %2401 = vmatprep.subr.bf16.mxu1 %v5069_v32 }
 0x480   :  { %2283 = vmatpush1.bf16.msra.mxu0 %v5295_v51 }
 0x481   :  { %2284 = vmatprep.subr.bf16.mxu0 %v5298_v40  ;;  %2402 = vmatpush1.bf16.msra.mxu1 %v5074_v22 }
 0x482   :  { %2403 = vmatprep.subr.bf16.mxu1 %v5077_v1 }
 0x484   :  { %2285 = vmatpush1.bf16.msra.mxu0 %v5303_v63 }
 0x485   :  { %2286 = vmatprep.subr.bf16.mxu0 %v5306_v60  ;;  %2404 = vmatpush1.bf16.msra.mxu1 %v5082_v7 }
 0x486   :  { %2405 = vmatprep.subr.bf16.mxu1 %v5085_v46 }
 0x488   :  { %2287 = vmatpush1.bf16.msra.mxu0 %v5311_v42 }
 0x489   :  { %2288 = vmatprep.subr.bf16.mxu0 %v5314_v56  ;;  %2406 = vmatpush1.bf16.msra.mxu1 %v5090_v52 }
 0x48a   :  { %2407 = vmatprep.subr.bf16.mxu1 %v5093_v53 }
 0x48c   :  { %2289 = vmatpush1.bf16.msra.mxu0 %v5319_v27 }
 0x48d   :  { %2290 = vmatprep.subr.bf16.mxu0 %v5322_v62  ;;  %2408 = vmatpush1.bf16.msra.mxu1 %v5098_v0 }
 0x48e   :  { %2409 = vmatprep.subr.bf16.mxu1 %v5101_v2 }
 0x490   :  { %2291 = vmatpush1.bf16.msra.mxu0 %v5327_v50 }
 0x491   :  { %2292 = vmatprep.subr.bf16.mxu0 %v5330_v12  ;;  %2410 = vmatpush1.bf16.msra.mxu1 %v5106_v4 }
 0x492   :  { %2411 = vmatprep.subr.bf16.mxu1 %v5109_v6 }
 0x494   :  { %2293 = vmatpush1.bf16.msra.mxu0 %v5335_v21  ;;  %v5351_v21 = vld [vmem:[#allocation9 + $0x2b0] ss:$24 sps:$4 sm:$0xff]  }
 0x495   :  { %2294 = vmatprep.subr.bf16.mxu0 %v5338_v13  ;;  %2412 = vmatpush1.bf16.msra.mxu1 %v5114_v8  ;;  %6527 = vst [vmem:[#allocation34_spill] sm:$0xff] %v5351_v21  ;;  %v5354_v13 = vld [vmem:[#allocation9 + $0x2e4] ss:$24 sps:$4 sm:$0xff]  }
 0x496   :  { %2413 = vmatprep.subr.bf16.mxu1 %v5117_v10  ;;  %6528 = vst [vmem:[#allocation36_spill] sm:$0xff] %v5354_v13  ;;  %v6537_v10 = vld [vmem:[#allocation55_spill] sm:$0xff] }
 0x498   :  { %2295 = vmatpush1.bf16.msra.mxu0 %v5343_v45  ;;  %v5359_v45 = vld [vmem:[#allocation9 + $0x2e0] ss:$24 sps:$4 sm:$0xff]  }
 0x499   :  { %2296 = vmatprep.subr.bf16.mxu0 %v5346_v37  ;;  %2414 = vmatpush1.bf16.msra.mxu1 %v5122_v16  ;;  %6529 = vst [vmem:[#allocation38_spill] sm:$0xff] %v5359_v45  ;;  %v6530_v16 = vld [vmem:[#allocation41_spill] sm:$0xff]  ;;  %v6533_v37 = vld [vmem:[#allocation47_spill] sm:$0xff] }
 0x49a   :  { %2415 = vmatprep.subr.bf16.mxu1 %v5125_v19  ;;  %v6531_v19 = vld [vmem:[#allocation43_spill] sm:$0xff] }
 0x49c   :  { %2297 = vmatpush1.bf16.msra.mxu0 %v5351_v21  ;;  %v6532_v21 = vld [vmem:[#allocation45_spill] sm:$0xff] }
 0x49d   :  { %2298 = vmatprep.subr.bf16.mxu0 %v5354_v13  ;;  %2416 = vmatpush1.bf16.msra.mxu1 %v5130_v25  ;;  %v6534_v13 = vld [vmem:[#allocation49_spill] sm:$0xff]  ;;  %v6535_v25 = vld [vmem:[#allocation51_spill] sm:$0xff] }
 0x49e   :  { %2417 = vmatprep.subr.bf16.mxu1 %v5133_v58  ;;  %v6536_v58 = vld [vmem:[#allocation53_spill] sm:$0xff] }
 0x4a0   :  { %2299 = vmatpush1.bf16.msra.mxu0 %v5359_v45  ;;  %v6538_v45 = vld [vmem:[#allocation57_spill] sm:$0xff] }
 0x4a1   :  { %2428 = vmatprep.subr.bf16.mxu0 %v5137_v39  ;;  %2418 = vmatpush1.bf16.msra.mxu1 %v6530_v16  ;;  %v6539_v39 = vld [vmem:[#allocation59_spill] sm:$0xff]  ;;  %v6540_v16 = vld [vmem:[#allocation61_spill] sm:$0xff] }
 0x4a2   :  { %2469 = vmatprep.subr.bf16.mxu1 %v6531_v19  ;;  %v6541_v19 = vld [vmem:[#allocation63_spill] sm:$0xff] }
 0x4a3   :  { %2301 = vmatmul.mubr.bf16.vlgmr.msra.gmra.mrb[28].mxu0 %v5235_v3  ;;  %v5376_v3 = vld [vmem:[#allocation9 + $0xf8] ss:$24 sps:$4 sm:$0xff]  }
 0x4a4   :  { %2429 = vmatpush1.bf16.msra.mxu0 %v6532_v21  ;;  %6542 = vst [vmem:[#allocation40_spill] sm:$0xff] %v5376_v3 }
 0x4a5   :  { %2430 = vmatprep.subr.bf16.mxu0 %v6533_v37  ;;  %v5379_v37 = vld [vmem:[#allocation9 + $0x12c] ss:$24 sps:$4 sm:$0xff]  }
 0x4a6   :  { %6543 = vst [vmem:[#allocation19_spill] sm:$0xff] %v5379_v37 }
 0x4a8   :  { %2431 = vmatpush1.bf16.msra.mxu0 %v6534_v13 }
 0x4a9   :  { %2432 = vmatprep.subr.bf16.mxu0 %v6535_v25  ;;  %v5382_v25 = vld [vmem:[#allocation9 + $0x128] ss:$24 sps:$4 sm:$0xff]  }
 0x4aa   :  { %6544 = vst [vmem:[#allocation16_spill] sm:$0xff] %v5382_v25 }
 0x4ac   :  { %2433 = vmatpush1.bf16.msra.mxu0 %v6536_v58 }
 0x4ad   :  { %2434 = vmatprep.subr.bf16.mxu0 %v6537_v10  ;;  %v5385_v10 = vld [vmem:[#allocation9 + $0x15c] ss:$24 sps:$4 sm:$0xff]  }
 0x4ae   :  { %6545 = vst [vmem:[#allocation76_spill] sm:$0xff] %v5385_v10 }
 0x4b0   :  { %2435 = vmatpush1.bf16.msra.mxu0 %v6538_v45  ;;  %v6564_v45 = vld [vmem:[#allocation23_spill] sm:$0xff] }
 0x4b1   :  { %2436 = vmatprep.subr.bf16.mxu0 %v6539_v39  ;;  %v5388_v39 = vld [vmem:[#allocation9 + $0x158] ss:$24 sps:$4 sm:$0xff]  }
 0x4b2   :  { %6546 = vst [vmem:[#allocation78_spill] sm:$0xff] %v5388_v39 }
 0x4b4   :  { %2437 = vmatpush1.bf16.msra.mxu0 %v6540_v16 }
 0x4b5   :  { %2438 = vmatprep.subr.bf16.mxu0 %v6541_v19  ;;  %v5391_v19 = vld [vmem:[#allocation9 + $0x18c] ss:$24 sps:$4 sm:$0xff]  }
 0x4b6   :  { %6547 = vst [vmem:[#allocation80_spill] sm:$0xff] %v5391_v19 }
 0x4b8   :  { %2439 = vmatpush1.bf16.msra.mxu0 %v5376_v3  ;;  %v5394_v3 = vld [vmem:[#allocation9 + $0x188] ss:$24 sps:$4 sm:$0xff]  }
 0x4b9   :  { %2440 = vmatprep.subr.bf16.mxu0 %v5379_v37  ;;  %6548 = vst [vmem:[#allocation82_spill] sm:$0xff] %v5394_v3  ;;  %v5397_v37 = vld [vmem:[#allocation9 + $0x1bc] ss:$24 sps:$4 sm:$0xff]  }
 0x4ba   :  { %6549 = vst [vmem:[#allocation42_spill] sm:$0xff] %v5397_v37 }
 0x4bc   :  { %2441 = vmatpush1.bf16.msra.mxu0 %v5382_v25  ;;  %v5400_v25 = vld [vmem:[#allocation9 + $0x1b8] ss:$24 sps:$4 sm:$0xff]  }
 0x4bd   :  { %2442 = vmatprep.subr.bf16.mxu0 %v5385_v10  ;;  %6550 = vst [vmem:[#allocation44_spill] sm:$0xff] %v5400_v25  ;;  %v5403_v10 = vld [vmem:[#allocation9 + $0x1ec] ss:$24 sps:$4 sm:$0xff]  }
 0x4be   :  { %6551 = vst [vmem:[#allocation46_spill] sm:$0xff] %v5403_v10 }
 0x4c0   :  { %2443 = vmatpush1.bf16.msra.mxu0 %v5388_v39  ;;  %v5406_v39 = vld [vmem:[#allocation9 + $0x1e8] ss:$24 sps:$4 sm:$0xff]  }
 0x4c1   :  { %2444 = vmatprep.subr.bf16.mxu0 %v5391_v19  ;;  %6552 = vst [vmem:[#allocation48_spill] sm:$0xff] %v5406_v39  ;;  %v5409_v19 = vld [vmem:[#allocation9 + $0x21c] ss:$24 sps:$4 sm:$0xff]  }
 0x4c2   :  { %6553 = vst [vmem:[#allocation50_spill] sm:$0xff] %v5409_v19 }
 0x4c4   :  { %2445 = vmatpush1.bf16.msra.mxu0 %v5394_v3  ;;  %v5412_v3 = vld [vmem:[#allocation9 + $0x218] ss:$24 sps:$4 sm:$0xff]  }
 0x4c5   :  { %2446 = vmatprep.subr.bf16.mxu0 %v5397_v37  ;;  %6554 = vst [vmem:[#allocation52_spill] sm:$0xff] %v5412_v3  ;;  %v5415_v37 = vld [vmem:[#allocation9 + $0x24c] ss:$24 sps:$4 sm:$0xff]  }
 0x4c6   :  { %6555 = vst [vmem:[#allocation54_spill] sm:$0xff] %v5415_v37 }
 0x4c8   :  { %2447 = vmatpush1.bf16.msra.mxu0 %v5400_v25  ;;  %v5418_v25 = vld [vmem:[#allocation9 + $0x248] ss:$24 sps:$4 sm:$0xff]  }
 0x4c9   :  { %2448 = vmatprep.subr.bf16.mxu0 %v5403_v10  ;;  %6556 = vst [vmem:[#allocation56_spill] sm:$0xff] %v5418_v25  ;;  %v5421_v10 = vld [vmem:[#allocation9 + $0x27c] ss:$24 sps:$4 sm:$0xff]  }
 0x4ca   :  { %6557 = vst [vmem:[#allocation58_spill] sm:$0xff] %v5421_v10 }
 0x4cc   :  { %2449 = vmatpush1.bf16.msra.mxu0 %v5406_v39  ;;  %v5424_v39 = vld [vmem:[#allocation9 + $0x278] ss:$24 sps:$4 sm:$0xff]  }
 0x4cd   :  { %2450 = vmatprep.subr.bf16.mxu0 %v5409_v19  ;;  %6558 = vst [vmem:[#allocation60_spill] sm:$0xff] %v5424_v39  ;;  %v5427_v19 = vld [vmem:[#allocation9 + $0x2ac] ss:$24 sps:$4 sm:$0xff]  }
 0x4ce   :  { %6559 = vst [vmem:[#allocation62_spill] sm:$0xff] %v5427_v19 }
 0x4d0   :  { %2451 = vmatpush1.bf16.msra.mxu0 %v5412_v3  ;;  %v5430_v3 = vld [vmem:[#allocation9 + $0x2a8] ss:$24 sps:$4 sm:$0xff]  }
 0x4d1   :  { %2452 = vmatprep.subr.bf16.mxu0 %v5415_v37  ;;  %6560 = vst [vmem:[#allocation64_spill] sm:$0xff] %v5430_v3  ;;  %v5433_v37 = vld [vmem:[#allocation9 + $0x2dc] ss:$24 sps:$4 sm:$0xff]  }
 0x4d2   :  { %6561 = vst [vmem:[#allocation66_spill] sm:$0xff] %v5433_v37 }
 0x4d4   :  { %2453 = vmatpush1.bf16.msra.mxu0 %v5418_v25  ;;  %v5436_v25 = vld [vmem:[#allocation9 + $0x2d8] ss:$24 sps:$4 sm:$0xff]  }
 0x4d5   :  { %2454 = vmatprep.subr.bf16.mxu0 %v5421_v10  ;;  %6562 = vst [vmem:[#allocation68_spill] sm:$0xff] %v5436_v25  ;;  %v6563_v10 = vld [vmem:[#allocation15_spill] sm:$0xff] }
 0x4d8   :  { %2455 = vmatpush1.bf16.msra.mxu0 %v5424_v39 }
 0x4d9   :  { %2456 = vmatprep.subr.bf16.mxu0 %v5427_v19 }
 0x4dc   :  { %2457 = vmatpush1.bf16.msra.mxu0 %v5430_v3 }
 0x4dd   :  { %2458 = vmatprep.subr.bf16.mxu0 %v5433_v37 }
 0x4e0   :  { %2459 = vmatpush1.bf16.msra.mxu0 %v5436_v25 }
 0x4e1   :  { %2584 = vmatprep.subr.bf16.mxu0 %v6563_v10 }
 0x536   :  { %v2220_v16 = vpop.f32.mrb[24].mxu0  ;;  %v2261_v39 = vpop.f32.mrb[24].mxu1 }
 0x537   :  { %v2262_v58 = vadd.f32 %v2261_v39, %v6564_v45  ;;  %v2222_v13 = vpop.f32.mrb[25].mxu0  ;;  %v2263_v19 = vpop.f32.mrb[25].mxu1 }
 0x538   :  { %v2264_v21 = vadd.f32 %v2263_v19, %v4855_v43  ;;  %v2224_v8 = vpop.f32.mrb[26].mxu0  ;;  %v2265_v3 = vpop.f32.mrb[26].mxu1  ;;  %v6565_v19 = vld [vmem:[#allocation20_spill] sm:$0xff] }
 0x539   :  { %v2331_v6 = vrot.slane %v2262_v58, 5  ;;  %v2225_v4 = vpop.f32.mrb[27].mxu0  ;;  %v2266_v12 = vpop.f32.mrb[27].mxu1  ;;  %v2221_v8 = vadd.f32 %v2220_v16, %v6463_v17  ;;  %v2368_v3 = vrot.slane %v5215_v5, 7 }
 0x53a   :  { %v2332_v37 = vrot.slane %v2264_v21, 5  ;;  %v2223_v4 = vadd.f32 %v2222_v13, %v6565_v19 }
 0x53b   :  { %v2335_v50 = vadd.f32 %v2331_v6, %v4859_v26  ;;  %v2311_v58 = vrot.slane %v2221_v8, 5  ;;  %v2367_v6 = vrot.slane %v5213_v44, 7 }
 0x53c   :  { %v2336_v25 = vadd.f32 %v2332_v37, %v4863_v48  ;;  %v2312_v12 = vrot.slane %v2223_v4, 5  ;;  %v6566_v37 = vld [vmem:[#allocation21_spill] sm:$0xff] }
 0x53d   :  { %v3457_v2 = vmul.f32 -1.442695, %v2335_v50  ;;  %v2315_v50 = vadd.f32 %v2311_v58, %v6566_v37  ;;  %v6568_v4 = vld [vmem:[#allocation25_spill] sm:$0xff] }
 0x53e   :  { %v3458_v10 = vmul.f32 -1.442695, %v2336_v25  ;;  %v6567_v25 = vld [vmem:[#allocation22_spill] sm:$0xff] }
 0x53f   :  { %3840 = vpow2.f32 %v3457_v2  ;;  %v2316_v2 = vadd.f32 %v2312_v12, %v6567_v25 }
 0x540   :  { %3842 = vpow2.f32 %v3458_v10 }
 0x541   :  { %v3456_v48 = vmul.f32 -1.442695, %v2316_v2 }
 0x549   :  { %v3841_v0 = vpop.eup %3840 }
 0x54a   :  { %v2343_v39 = vadd.f32 1.0, %v3841_v0  ;;  %v3843_v45 = vpop.eup %3842 }
 0x54b   :  { %v2344_v62 = vadd.f32 1.0, %v3843_v45  ;;  %v3455_v45 = vmul.f32 -1.442695, %v2315_v50 }
 0x54c   :  { %3844 = vrcp.f32 %v2343_v39 }
 0x54d   :  { %3846 = vrcp.f32 %v2344_v62 }
 0x54e   :  { %3848 = vpow2.f32 %v3455_v45 }
 0x54f   :  { %3850 = vpow2.f32 %v3456_v48 }
 0x556   :  { %v3845_v21 = vpop.eup %3844 }
 0x557   :  { %v2371_v0 = vmul.f32 %v3845_v21, %v2367_v6  ;;  %v3847_v10 = vpop.eup %3846 }
 0x558   :  { %v2372_v39 = vmul.f32 %v3847_v10, %v2368_v3  ;;  %v3849_v16 = vpop.eup %3848 }
 0x559   :  { %v3851_v62 = vpop.eup %3850  ;;  %v2323_v13 = vadd.f32 1.0, %v3849_v16 }
 0x55a   :  { %v2324_v8 = vadd.f32 1.0, %v3851_v62  ;;  %v2361_v62 = vsub.f32 1.0, %v3845_v21 }
 0x55b   :  { %3852 = vrcp.f32 %v2323_v13 }
 0x55c   :  { %3854 = vrcp.f32 %v2324_v8  ;;  %v2362_v8 = vsub.f32 1.0, %v3847_v10 }
 0x565   :  { %v3853_v3 = vpop.eup %3852 }
 0x566   :  { %v3855_v2 = vpop.eup %3854 }
 0x576   :  { %v2302_v44 = vpop.f32.mrb[28].mxu0 }
 0x577   :  { %v2303_v58 = vadd.f32 %v2302_v44, %v6568_v4  ;;  %v2304_v37 = vpop.f32.mrb[29].mxu0 }
 0x578   :  { %v2305_v12 = vadd.f32 %v2304_v37, %v4857_v34  ;;  %v2306_v5 = vpop.f32.mrb[30].mxu0 }
 0x579   :  { %v2351_v6 = vrot.slane %v2303_v58, 5  ;;  %v2307_v25 = vpop.f32.mrb[31].mxu0 }
 0x57a   :  { %v2352_v50 = vrot.slane %v2305_v12, 5 }
 0x57b   :  { %v2355_v45 = vmul.f32 %v3853_v3, %v2351_v6  ;;  %v5486_v6 = vld [vmem:[#allocation9 + $0x30] ss:$24 sps:$4 sm:$0xff]   ;;  %v5489_v3 = vld [vmem:[#allocation9 + $0x64] ss:$24 sps:$4 sm:$0xff]  }
 0x57c   :  { %v2356_v48 = vmul.f32 %v3855_v2, %v2352_v50  ;;  %v5494_v50 = vld [vmem:[#allocation9 + $0x60] ss:$24 sps:$4 sm:$0xff]   ;;  %v5497_v2 = vld [vmem:[#allocation9 + $0x94] ss:$24 sps:$4 sm:$0xff]  }
 0x57d   :  { %v2357_v19 = vadd.f32 %v2355_v45, %v4870_v11  ;;  %v5502_v45 = vld [vmem:[#allocation9 + $0x90] ss:$24 sps:$4 sm:$0xff]  }
 0x57e   :  { %v2358_v16 = vadd.f32 %v2356_v48, %v4874_v28  ;;  %v6582_v48 = vld [vmem:[#allocation31_spill] sm:$0xff] }
 0x57f   :  { %3856 = vtanh.f32 %v2357_v19 }
 0x580   :  { %3858 = vtanh.f32 %v2358_v16  ;;  %v6583_v16 = vld [vmem:[#allocation33_spill] sm:$0xff] }
 0x589   :  { %v3857_v13 = vpop.eup %3856 }
 0x58a   :  { %v3859_v44 = vpop.eup %3858  ;;  %v2363_v4 = vmul.f32 %v3857_v13, %v2361_v62  ;;  %v6584_v62 = vld [vmem:[#allocation34_spill] sm:$0xff]  ;;  %v6585_v13 = vld [vmem:[#allocation36_spill] sm:$0xff] }
 0x58b   :  { %v2364_v37 = vmul.f32 %v3859_v44, %v2362_v8  ;;  %v6586_v8 = vld [vmem:[#allocation35_spill] sm:$0xff]  ;;  %v6587_v44 = vld [vmem:[#allocation37_spill] sm:$0xff] }
 0x58c   :  { %v5454_v5 = vadd.f32 %v2371_v0, %v2363_v4 }
 0x58d   :  { %v5456_v25 = vadd.f32 %v2372_v39, %v2364_v37  ;;  %v6588_v37 = vld [vmem:[#allocation38_spill] sm:$0xff] }
 0x58e   :  { %v2375_v58 = vpack.c.bf16 %v5454_v5, %v5454_v5  ;;  %v5463_v12 = vsel %vm253_vm2, %v5227_v23, %v5454_v5  ;;  %v5478_v23 = vld [vmem:[#allocation9] ss:$24 sps:$4 sm:$0xff]  }
 0x58f   :  { %v2376_v19 = vpack.c.bf16 %v5456_v25, %v5456_v25  ;;  %v5470_v21 = vsel %vm253_vm2, %v5233_v29, %v5456_v25  ;;  %v5481_v29 = vld [vmem:[#allocation9 + $0x34] ss:$24 sps:$4 sm:$0xff]  }
 0x590   :  { %v2378_v0 = vshrl.u32 %v2375_v58, 16  ;;  %v6589_v58 = vld [vmem:[#allocation39_spill] sm:$0xff] }
 0x591   :  { %v2382_v10 = vshrl.u32 %v2376_v19, 16  ;;  %v6590_v19 = vld [vmem:[#allocation41_spill] sm:$0xff] }
 0x592   :  { %v5472_v4 = vrot.slane %v2378_v0, 1  ;;  %v6591_v0 = vld [vmem:[#allocation43_spill] sm:$0xff] }
 0x593   :  { %v2384_v39 = vrot.slane %v2382_v10, 1  ;;  %v6592_v10 = vld [vmem:[#allocation45_spill] sm:$0xff] }
 0x595   :  { %2419 = vmatprep.mubr.bf16.mxu1 %v2384_v39  ;;  %2460 = vmatprep.mubr.bf16.mxu0 %v2384_v39 }
 0x596   :  { %2420 = vmatmul.mubr.bf16.vlgmr.msra.gmra.mrb[28].mxu1 %v5472_v4  ;;  %2461 = vmatmul.mubr.bf16.vlgmr.msra.gmra.mrb[32].mxu0 %v5472_v4 }
 0x597   :  { %2470 = vmatpush1.bf16.msra.mxu1 %v5239_v30  ;;  %2501 = vmatprep.mubr.bf16.mxu1 %v2384_v39  ;;  %v6593_v39 = vld [vmem:[#allocation47_spill] sm:$0xff] }
 0x598   :  { %2471 = vmatprep.subr.bf16.mxu1 %v5242_v31  ;;  %2585 = vmatpush1.bf16.msra.mxu0 %v5478_v23 }
 0x599   :  { %2586 = vmatprep.subr.bf16.mxu0 %v5481_v29 }
 0x59b   :  { %2472 = vmatpush1.bf16.msra.mxu1 %v5247_v33 }
 0x59c   :  { %2473 = vmatprep.subr.bf16.mxu1 %v5250_v35  ;;  %2587 = vmatpush1.bf16.msra.mxu0 %v5486_v6 }
 0x59d   :  { %2588 = vmatprep.subr.bf16.mxu0 %v5489_v3 }
 0x59f   :  { %2474 = vmatpush1.bf16.msra.mxu1 %v5255_v54 }
 0x5a0   :  { %2475 = vmatprep.subr.bf16.mxu1 %v5258_v9  ;;  %2589 = vmatpush1.bf16.msra.mxu0 %v5494_v50 }
 0x5a1   :  { %2590 = vmatprep.subr.bf16.mxu0 %v5497_v2 }
 0x5a3   :  { %2476 = vmatpush1.bf16.msra.mxu1 %v5263_v20 }
 0x5a4   :  { %2477 = vmatprep.subr.bf16.mxu1 %v5266_v36  ;;  %2591 = vmatpush1.bf16.msra.mxu0 %v5502_v45 }
 0x5a5   :  { %2592 = vmatprep.subr.bf16.mxu0 %v5045_v49  ;;  %v6569_v49 = vld [vmem:[#allocation65_spill] sm:$0xff] }
 0x5a7   :  { %2478 = vmatpush1.bf16.msra.mxu1 %v5271_v24 }
 0x5a8   :  { %2479 = vmatprep.subr.bf16.mxu1 %v5274_v18  ;;  %2593 = vmatpush1.bf16.msra.mxu0 %v5050_v47  ;;  %v6570_v47 = vld [vmem:[#allocation24_spill] sm:$0xff] }
 0x5a9   :  { %2594 = vmatprep.subr.bf16.mxu0 %v5053_v57  ;;  %v6571_v57 = vld [vmem:[#allocation18_spill] sm:$0xff] }
 0x5ab   :  { %2480 = vmatpush1.bf16.msra.mxu1 %v5279_v15 }
 0x5ac   :  { %2481 = vmatprep.subr.bf16.mxu1 %v5282_v41  ;;  %2595 = vmatpush1.bf16.msra.mxu0 %v5058_v14  ;;  %v6572_v14 = vld [vmem:[#allocation67_spill] sm:$0xff] }
 0x5ad   :  { %2596 = vmatprep.subr.bf16.mxu0 %v5061_v61  ;;  %v6573_v61 = vld [vmem:[#allocation69_spill] sm:$0xff] }
 0x5af   :  { %2482 = vmatpush1.bf16.msra.mxu1 %v5287_v38 }
 0x5b0   :  { %2483 = vmatprep.subr.bf16.mxu1 %v5290_v55  ;;  %2597 = vmatpush1.bf16.msra.mxu0 %v5066_v59  ;;  %v6574_v59 = vld [vmem:[#allocation26_spill] sm:$0xff] }
 0x5b1   :  { %2598 = vmatprep.subr.bf16.mxu0 %v5069_v32  ;;  %v6575_v32 = vld [vmem:[#allocation27_spill] sm:$0xff] }
 0x5b3   :  { %2484 = vmatpush1.bf16.msra.mxu1 %v5295_v51 }
 0x5b4   :  { %2485 = vmatprep.subr.bf16.mxu1 %v5298_v40  ;;  %2599 = vmatpush1.bf16.msra.mxu0 %v5074_v22  ;;  %v6576_v22 = vld [vmem:[#allocation71_spill] sm:$0xff] }
 0x5b5   :  { %2600 = vmatprep.subr.bf16.mxu0 %v5077_v1  ;;  %v6577_v1 = vld [vmem:[#allocation73_spill] sm:$0xff] }
 0x5b7   :  { %2486 = vmatpush1.bf16.msra.mxu1 %v5303_v63 }
 0x5b8   :  { %2487 = vmatprep.subr.bf16.mxu1 %v5306_v60  ;;  %2601 = vmatpush1.bf16.msra.mxu0 %v5082_v7  ;;  %v6578_v7 = vld [vmem:[#allocation28_spill] sm:$0xff] }
 0x5b9   :  { %2602 = vmatprep.subr.bf16.mxu0 %v5085_v46  ;;  %v6579_v46 = vld [vmem:[#allocation29_spill] sm:$0xff] }
 0x5bb   :  { %2488 = vmatpush1.bf16.msra.mxu1 %v5311_v42 }
 0x5bc   :  { %2489 = vmatprep.subr.bf16.mxu1 %v5314_v56  ;;  %2603 = vmatpush1.bf16.msra.mxu0 %v5090_v52  ;;  %v6580_v52 = vld [vmem:[#allocation30_spill] sm:$0xff] }
 0x5bd   :  { %2604 = vmatprep.subr.bf16.mxu0 %v5093_v53  ;;  %v6581_v53 = vld [vmem:[#allocation32_spill] sm:$0xff] }
 0x5bf   :  { %2490 = vmatpush1.bf16.msra.mxu1 %v5319_v27 }
 0x5c0   :  { %2491 = vmatprep.subr.bf16.mxu1 %v6569_v49  ;;  %2605 = vmatpush1.bf16.msra.mxu0 %v6570_v47  ;;  %v6594_v47 = vld [vmem:[#allocation49_spill] sm:$0xff] }
 0x5c1   :  { %2606 = vmatprep.subr.bf16.mxu0 %v6571_v57  ;;  %v6595_v57 = vld [vmem:[#allocation51_spill] sm:$0xff] }
 0x5c3   :  { %2492 = vmatpush1.bf16.msra.mxu1 %v6572_v14 }
 0x5c4   :  { %2493 = vmatprep.subr.bf16.mxu1 %v6573_v61  ;;  %2607 = vmatpush1.bf16.msra.mxu0 %v6574_v59  ;;  %v6596_v59 = vld [vmem:[#allocation53_spill] sm:$0xff] }
 0x5c5   :  { %2608 = vmatprep.subr.bf16.mxu0 %v6575_v32  ;;  %v6597_v32 = vld [vmem:[#allocation55_spill] sm:$0xff] }
 0x5c7   :  { %2494 = vmatpush1.bf16.msra.mxu1 %v6576_v22 }
 0x5c8   :  { %2495 = vmatprep.subr.bf16.mxu1 %v6577_v1  ;;  %2609 = vmatpush1.bf16.msra.mxu0 %v6578_v7  ;;  %v6598_v7 = vld [vmem:[#allocation57_spill] sm:$0xff] }
 0x5c9   :  { %2610 = vmatprep.subr.bf16.mxu0 %v6579_v46  ;;  %v6599_v46 = vld [vmem:[#allocation59_spill] sm:$0xff] }
 0x5cb   :  { %2496 = vmatpush1.bf16.msra.mxu1 %v6580_v52 }
 0x5cc   :  { %2497 = vmatprep.subr.bf16.mxu1 %v6581_v53  ;;  %2611 = vmatpush1.bf16.msra.mxu0 %v6582_v48  ;;  %v6600_v48 = vld [vmem:[#allocation61_spill] sm:$0xff] }
 0x5cd   :  { %2612 = vmatprep.subr.bf16.mxu0 %v6583_v16  ;;  %v6601_v16 = vld [vmem:[#allocation63_spill] sm:$0xff] }
 0x5cf   :  { %2498 = vmatpush1.bf16.msra.mxu1 %v6584_v62 }
 0x5d0   :  { %2499 = vmatprep.subr.bf16.mxu1 %v6585_v13  ;;  %2613 = vmatpush1.bf16.msra.mxu0 %v6586_v8  ;;  %v6603_v8 = vld [vmem:[#allocation19_spill] sm:$0xff] }
 0x5d1   :  { %2614 = vmatprep.subr.bf16.mxu0 %v6587_v44  ;;  %v6604_v44 = vld [vmem:[#allocation16_spill] sm:$0xff] }
 0x5d3   :  { %2500 = vmatpush1.bf16.msra.mxu1 %v6588_v37 }
 0x5d4   :  { %2625 = vmatprep.subr.bf16.mxu1 %v6589_v58  ;;  %2615 = vmatpush1.bf16.msra.mxu0 %v6590_v19  ;;  %v6605_v58 = vld [vmem:[#allocation76_spill] sm:$0xff]  ;;  %v6606_v19 = vld [vmem:[#allocation78_spill] sm:$0xff] }
 0x5d5   :  { %2666 = vmatprep.subr.bf16.mxu0 %v6591_v0  ;;  %v6607_v0 = vld [vmem:[#allocation80_spill] sm:$0xff] }
 0x5d6   :  { %2502 = vmatmul.mubr.bf16.vlgmr.msra.gmra.mrb[32].mxu1 %v5472_v4  ;;  %v6602_v4 = vld [vmem:[#allocation40_spill] sm:$0xff] }
 0x5d7   :  { %2626 = vmatpush1.bf16.msra.mxu1 %v6592_v10  ;;  %v6608_v10 = vld [vmem:[#allocation82_spill] sm:$0xff] }
 0x5d8   :  { %2627 = vmatprep.subr.bf16.mxu1 %v6593_v39  ;;  %v6609_v39 = vld [vmem:[#allocation42_spill] sm:$0xff] }
 0x5db   :  { %2628 = vmatpush1.bf16.msra.mxu1 %v6594_v47  ;;  %v6610_v47 = vld [vmem:[#allocation44_spill] sm:$0xff] }
 0x5dc   :  { %2629 = vmatprep.subr.bf16.mxu1 %v6595_v57  ;;  %v6611_v57 = vld [vmem:[#allocation46_spill] sm:$0xff] }
 0x5df   :  { %2630 = vmatpush1.bf16.msra.mxu1 %v6596_v59  ;;  %v6612_v59 = vld [vmem:[#allocation48_spill] sm:$0xff] }
 0x5e0   :  { %2631 = vmatprep.subr.bf16.mxu1 %v6597_v32  ;;  %v6613_v32 = vld [vmem:[#allocation50_spill] sm:$0xff] }
 0x5e3   :  { %2632 = vmatpush1.bf16.msra.mxu1 %v6598_v7  ;;  %v6614_v7 = vld [vmem:[#allocation52_spill] sm:$0xff] }
 0x5e4   :  { %2633 = vmatprep.subr.bf16.mxu1 %v6599_v46  ;;  %v6615_v46 = vld [vmem:[#allocation54_spill] sm:$0xff] }
 0x5e7   :  { %2634 = vmatpush1.bf16.msra.mxu1 %v6600_v48  ;;  %v6616_v48 = vld [vmem:[#allocation56_spill] sm:$0xff] }
 0x5e8   :  { %2635 = vmatprep.subr.bf16.mxu1 %v6601_v16  ;;  %v6617_v16 = vld [vmem:[#allocation58_spill] sm:$0xff] }
 0x5eb   :  { %2636 = vmatpush1.bf16.msra.mxu1 %v6602_v4  ;;  %v6625_v4 = vld [vmem:[#allocation17_spill] sm:$0xff] }
 0x5ec   :  { %2637 = vmatprep.subr.bf16.mxu1 %v6603_v8 }
 0x5ef   :  { %2638 = vmatpush1.bf16.msra.mxu1 %v6604_v44 }
 0x5f0   :  { %2639 = vmatprep.subr.bf16.mxu1 %v6605_v58 }
 0x5f3   :  { %2640 = vmatpush1.bf16.msra.mxu1 %v6606_v19 }
 0x5f4   :  { %2641 = vmatprep.subr.bf16.mxu1 %v6607_v0  ;;  %v6618_v0 = vld [vmem:[#allocation60_spill] sm:$0xff] }
 0x5f7   :  { %2642 = vmatpush1.bf16.msra.mxu1 %v6608_v10  ;;  %v6619_v10 = vld [vmem:[#allocation62_spill] sm:$0xff] }
 0x5f8   :  { %2643 = vmatprep.subr.bf16.mxu1 %v6609_v39  ;;  %v6620_v39 = vld [vmem:[#allocation64_spill] sm:$0xff] }
 0x5fb   :  { %2644 = vmatpush1.bf16.msra.mxu1 %v6610_v47  ;;  %v6621_v47 = vld [vmem:[#allocation66_spill] sm:$0xff] }
 0x5fc   :  { %2645 = vmatprep.subr.bf16.mxu1 %v6611_v57  ;;  %v6622_v57 = vld [vmem:[#allocation68_spill] sm:$0xff] }
 0x5ff   :  { %2646 = vmatpush1.bf16.msra.mxu1 %v6612_v59  ;;  %v5586_v59 = vld [vmem:[#allocation9 + $0x4] ss:$24 sps:$4 sm:$0xff]  }
 0x600   :  { %2647 = vmatprep.subr.bf16.mxu1 %v6613_v32  ;;  %6623 = vst [vmem:[#allocation70_spill] sm:$0xff] %v5586_v59  ;;  %v6624_v32 = vld [vmem:[#allocation23_spill] sm:$0xff] }
 0x603   :  { %2648 = vmatpush1.bf16.msra.mxu1 %v6614_v7 }
 0x604   :  { %2649 = vmatprep.subr.bf16.mxu1 %v6615_v46 }
 0x607   :  { %2650 = vmatpush1.bf16.msra.mxu1 %v6616_v48 }
 0x608   :  { %2651 = vmatprep.subr.bf16.mxu1 %v6617_v16 }
 0x60b   :  { %2652 = vmatpush1.bf16.msra.mxu1 %v6618_v0 }
 0x60c   :  { %2653 = vmatprep.subr.bf16.mxu1 %v6619_v10 }
 0x60f   :  { %2654 = vmatpush1.bf16.msra.mxu1 %v6620_v39 }
 0x610   :  { %2655 = vmatprep.subr.bf16.mxu1 %v6621_v47 }
 0x613   :  { %2656 = vmatpush1.bf16.msra.mxu1 %v6622_v57 }
 0x614   :  { %2785 = vmatprep.subr.bf16.mxu1 %v5586_v59 }
 0x669   :  { %v2421_v7 = vpop.f32.mrb[28].mxu1  ;;  %v2462_v46 = vpop.f32.mrb[32].mxu0 }
 0x66a   :  { %v2463_v48 = vadd.f32 %v2462_v46, %v6624_v32  ;;  %v2423_v19 = vpop.f32.mrb[29].mxu1  ;;  %v2464_v16 = vpop.f32.mrb[33].mxu0 }
 0x66b   :  { %v2465_v0 = vadd.f32 %v2464_v16, %v4855_v43  ;;  %v2425_v58 = vpop.f32.mrb[30].mxu1  ;;  %v2466_v10 = vpop.f32.mrb[34].mxu0 }
 0x66c   :  { %v2532_v44 = vrot.slane %v2463_v48, 4  ;;  %v2426_v39 = vpop.f32.mrb[31].mxu1  ;;  %v2467_v8 = vpop.f32.mrb[35].mxu0  ;;  %v2422_v58 = vadd.f32 %v2421_v7, %v6463_v17  ;;  %v6626_v10 = vld [vmem:[#allocation20_spill] sm:$0xff] }
 0x66d   :  { %v2533_v47 = vrot.slane %v2465_v0, 4  ;;  %v2424_v39 = vadd.f32 %v2423_v19, %v6626_v10 }
 0x66e   :  { %v2536_v57 = vadd.f32 %v2532_v44, %v4859_v26  ;;  %v2512_v8 = vrot.slane %v2422_v58, 4  ;;  %v2568_v44 = vrot.slane %v5454_v5, 7 }
 0x66f   :  { %v2537_v37 = vadd.f32 %v2533_v47, %v6625_v4  ;;  %v2513_v0 = vrot.slane %v2424_v39, 4  ;;  %v6627_v47 = vld [vmem:[#allocation21_spill] sm:$0xff] }
 0x670   :  { %v3461_v13 = vmul.f32 -1.442695, %v2536_v57  ;;  %v2516_v57 = vadd.f32 %v2512_v8, %v6627_v47  ;;  %v6629_v39 = vld [vmem:[#allocation25_spill] sm:$0xff] }
 0x671   :  { %v3462_v59 = vmul.f32 -1.442695, %v2537_v37  ;;  %v6628_v37 = vld [vmem:[#allocation22_spill] sm:$0xff] }
 0x672   :  { %3860 = vpow2.f32 %v3461_v13  ;;  %v2517_v13 = vadd.f32 %v2513_v0, %v6628_v37 }
 0x673   :  { %3862 = vpow2.f32 %v3462_v59  ;;  %v2569_v59 = vrot.slane %v5456_v25, 7 }
 0x674   :  { %v3460_v4 = vmul.f32 -1.442695, %v2517_v13 }
 0x67c   :  { %v3861_v62 = vpop.eup %3860 }
 0x67d   :  { %v2544_v46 = vadd.f32 1.0, %v3861_v62  ;;  %v3863_v32 = vpop.eup %3862 }
 0x67e   :  { %v2545_v53 = vadd.f32 1.0, %v3863_v32  ;;  %v3459_v32 = vmul.f32 -1.442695, %v2516_v57 }
 0x67f   :  { %3864 = vrcp.f32 %v2544_v46 }
 0x680   :  { %3866 = vrcp.f32 %v2545_v53 }
 0x681   :  { %3868 = vpow2.f32 %v3459_v32 }
 0x682   :  { %3870 = vpow2.f32 %v3460_v4 }
 0x689   :  { %v3865_v48 = vpop.eup %3864 }
 0x68a   :  { %v2572_v62 = vmul.f32 %v3865_v48, %v2568_v44  ;;  %v3867_v16 = vpop.eup %3866 }
 0x68b   :  { %v2573_v46 = vmul.f32 %v3867_v16, %v2569_v59  ;;  %v3869_v53 = vpop.eup %3868 }
 0x68c   :  { %v3871_v19 = vpop.eup %3870  ;;  %v2524_v7 = vadd.f32 1.0, %v3869_v53 }
 0x68d   :  { %v2525_v58 = vadd.f32 1.0, %v3871_v19  ;;  %v2562_v19 = vsub.f32 1.0, %v3865_v48 }
 0x68e   :  { %3872 = vrcp.f32 %v2524_v7 }
 0x68f   :  { %3874 = vrcp.f32 %v2525_v58  ;;  %v2563_v58 = vsub.f32 1.0, %v3867_v16 }
 0x698   :  { %v3873_v59 = vpop.eup %3872 }
 0x699   :  { %v3875_v13 = vpop.eup %3874 }
 0x6a9   :  { %v2503_v5 = vpop.f32.mrb[32].mxu1 }
 0x6aa   :  { %v2504_v8 = vadd.f32 %v2503_v5, %v6629_v39  ;;  %v2505_v47 = vpop.f32.mrb[33].mxu1 }
 0x6ab   :  { %v2506_v0 = vadd.f32 %v2505_v47, %v4857_v34  ;;  %v2507_v25 = vpop.f32.mrb[34].mxu1 }
 0x6ac   :  { %v2552_v44 = vrot.slane %v2504_v8, 4  ;;  %v2508_v37 = vpop.f32.mrb[35].mxu1 }
 0x6ad   :  { %v2553_v57 = vrot.slane %v2506_v0, 4 }
 0x6ae   :  { %v2556_v32 = vmul.f32 %v3873_v59, %v2552_v44  ;;  %v5745_v44 = vld [vmem:[#allocation9 + $0x3c] ss:$24 sps:$4 sm:$0xff]   ;;  %v5748_v59 = vld [vmem:[#allocation9 + $0x38] ss:$24 sps:$4 sm:$0xff]  }
 0x6af   :  { %v2557_v4 = vmul.f32 %v3875_v13, %v2553_v57  ;;  %6634 = vst [vmem:[#allocation72_spill] sm:$0xff] %v5745_v44  ;;  %6635 = vst [vmem:[#allocation74_spill] sm:$0xff] %v5748_v59  ;;  %v5751_v57 = vld [vmem:[#allocation9 + $0x6c] ss:$24 sps:$4 sm:$0xff]   ;;  %v5754_v13 = vld [vmem:[#allocation9 + $0x68] ss:$24 sps:$4 sm:$0xff]  }
 0x6b0   :  { %v2558_v10 = vadd.f32 %v2556_v32, %v4870_v11  ;;  %6636 = vst [vmem:[#allocation75_spill] sm:$0xff] %v5751_v57  ;;  %6637 = vst [vmem:[#allocation77_spill] sm:$0xff] %v5754_v13  ;;  %v5757_v32 = vld [vmem:[#allocation9 + $0x9c] ss:$24 sps:$4 sm:$0xff]  }
 0x6b1   :  { %v2559_v53 = vadd.f32 %v2557_v4, %v4874_v28  ;;  %6638 = vst [vmem:[#allocation79_spill] sm:$0xff] %v5757_v32  ;;  %v5760_v4 = vld [vmem:[#allocation9 + $0x98] ss:$24 sps:$4 sm:$0xff]  }
 0x6b2   :  { %3876 = vtanh.f32 %v2558_v10  ;;  %6639 = vst [vmem:[#allocation81_spill] sm:$0xff] %v5760_v4 }
 0x6b3   :  { %3878 = vtanh.f32 %v2559_v53  ;;  %v5763_v53 = vld [vmem:[#allocation9 + $0xcc] ss:$24 sps:$4 sm:$0xff]  }
 0x6b4   :  { %6640 = vst [vmem:[#allocation15_spill] sm:$0xff] %v5763_v53 }
 0x6bc   :  { %v3877_v7 = vpop.eup %3876 }
 0x6bd   :  { %v3879_v5 = vpop.eup %3878  ;;  %v2564_v39 = vmul.f32 %v3877_v7, %v2562_v19  ;;  %v5766_v19 = vld [vmem:[#allocation9 + $0xc8] ss:$24 sps:$4 sm:$0xff]   ;;  %v5769_v7 = vld [vmem:[#allocation9 + $0xfc] ss:$24 sps:$4 sm:$0xff]  }
 0x6be   :  { %v2565_v47 = vmul.f32 %v3879_v5, %v2563_v58  ;;  %6641 = vst [vmem:[#allocation65_spill] sm:$0xff] %v5766_v19  ;;  %6642 = vst [vmem:[#allocation24_spill] sm:$0xff] %v5769_v7  ;;  %v6643_v58 = vld [vmem:[#allocation40_spill] sm:$0xff]  ;;  %v6644_v5 = vld [vmem:[#allocation19_spill] sm:$0xff] }
 0x6bf   :  { %v5603_v25 = vadd.f32 %v2572_v62, %v2564_v39  ;;  %v5742_v39 = vld [vmem:[#allocation9 + $0x8] ss:$24 sps:$4 sm:$0xff]  }
 0x6c0   :  { %v5605_v37 = vadd.f32 %v2573_v46, %v2565_v47  ;;  %v5738_v46 = vld [vmem:[#allocation9 + $0x14] ss:$24 sps:$4 sm:$0xff]   ;;  %v6645_v47 = vld [vmem:[#allocation16_spill] sm:$0xff] }
 0x6c1   :  { %v2576_v8 = vpack.c.bf16 %v5603_v25, %v5603_v25  ;;  %v5612_v0 = vsel %vm256_vm3, %v5463_v12, %v5603_v25  ;;  %v5720_v12 = vld [vmem:[#allocation9 + $0x2a4] ss:$24 sps:$4 sm:$0xff]  }
 0x6c2   :  { %v2577_v10 = vpack.c.bf16 %v5605_v37, %v5605_v37  ;;  %v5619_v48 = vsel %vm256_vm3, %v5470_v21, %v5605_v37  ;;  %v6631_v21 = vld [vmem:[#allocation34_spill] sm:$0xff] }
 0x6c3   :  { %v5621_v16 = vrot.slane %v2576_v8, 2  ;;  %v6646_v8 = vld [vmem:[#allocation76_spill] sm:$0xff] }
 0x6c4   :  { %v2581_v62 = vrot.slane %v2577_v10, 2  ;;  %v6647_v10 = vld [vmem:[#allocation78_spill] sm:$0xff] }
 0x6c6   :  { %2616 = vmatprep.mubr.bf16.mxu0 %v2581_v62  ;;  %2657 = vmatprep.mubr.bf16.mxu1 %v2581_v62 }
 0x6c7   :  { %2617 = vmatmul.mubr.bf16.vlgmr.msra.gmra.mrb[36].mxu0 %v5621_v16  ;;  %2658 = vmatmul.mubr.bf16.vlgmr.msra.gmra.mrb[36].mxu1 %v5621_v16 }
 0x6c8   :  { %2667 = vmatpush1.bf16.msra.mxu0 %v5239_v30  ;;  %2698 = vmatprep.mubr.bf16.mxu0 %v2581_v62  ;;  %v5640_v30 = vld [vmem:[#allocation9 + $0xc4] ss:$24 sps:$4 sm:$0xff]  }
 0x6c9   :  { %2668 = vmatprep.subr.bf16.mxu0 %v5242_v31  ;;  %2786 = vmatpush1.bf16.msra.mxu1 %v5478_v23  ;;  %v5645_v31 = vld [vmem:[#allocation9 + $0xc0] ss:$24 sps:$4 sm:$0xff]  }
 0x6ca   :  { %2787 = vmatprep.subr.bf16.mxu1 %v5481_v29  ;;  %v6648_v62 = vld [vmem:[#allocation80_spill] sm:$0xff] }
 0x6cc   :  { %2669 = vmatpush1.bf16.msra.mxu0 %v5247_v33  ;;  %v5648_v33 = vld [vmem:[#allocation9 + $0xf4] ss:$24 sps:$4 sm:$0xff]  }
 0x6cd   :  { %2670 = vmatprep.subr.bf16.mxu0 %v5250_v35  ;;  %2788 = vmatpush1.bf16.msra.mxu1 %v5486_v6  ;;  %v5653_v35 = vld [vmem:[#allocation9 + $0xf0] ss:$24 sps:$4 sm:$0xff]  }
 0x6ce   :  { %2789 = vmatprep.subr.bf16.mxu1 %v5489_v3 }
 0x6d0   :  { %2671 = vmatpush1.bf16.msra.mxu0 %v5255_v54  ;;  %v5656_v54 = vld [vmem:[#allocation9 + $0x124] ss:$24 sps:$4 sm:$0xff]  }
 0x6d1   :  { %2672 = vmatprep.subr.bf16.mxu0 %v5258_v9  ;;  %2790 = vmatpush1.bf16.msra.mxu1 %v5494_v50  ;;  %v5661_v9 = vld [vmem:[#allocation9 + $0x120] ss:$24 sps:$4 sm:$0xff]  }
 0x6d2   :  { %2791 = vmatprep.subr.bf16.mxu1 %v5497_v2 }
 0x6d4   :  { %2673 = vmatpush1.bf16.msra.mxu0 %v5263_v20  ;;  %v5664_v20 = vld [vmem:[#allocation9 + $0x154] ss:$24 sps:$4 sm:$0xff]  }
 0x6d5   :  { %2674 = vmatprep.subr.bf16.mxu0 %v5266_v36  ;;  %2792 = vmatpush1.bf16.msra.mxu1 %v5502_v45  ;;  %v5669_v36 = vld [vmem:[#allocation9 + $0x150] ss:$24 sps:$4 sm:$0xff]  }
 0x6d6   :  { %2793 = vmatprep.subr.bf16.mxu1 %v5640_v30 }
 0x6d8   :  { %2675 = vmatpush1.bf16.msra.mxu0 %v5271_v24  ;;  %v5672_v24 = vld [vmem:[#allocation9 + $0x184] ss:$24 sps:$4 sm:$0xff]  }
 0x6d9   :  { %2676 = vmatprep.subr.bf16.mxu0 %v5274_v18  ;;  %2794 = vmatpush1.bf16.msra.mxu1 %v5645_v31  ;;  %v5677_v18 = vld [vmem:[#allocation9 + $0x180] ss:$24 sps:$4 sm:$0xff]  }
 0x6da   :  { %2795 = vmatprep.subr.bf16.mxu1 %v5648_v33 }
 0x6dc   :  { %2677 = vmatpush1.bf16.msra.mxu0 %v5279_v15  ;;  %v5680_v15 = vld [vmem:[#allocation9 + $0x1b4] ss:$24 sps:$4 sm:$0xff]  }
 0x6dd   :  { %2678 = vmatprep.subr.bf16.mxu0 %v5282_v41  ;;  %2796 = vmatpush1.bf16.msra.mxu1 %v5653_v35  ;;  %v5685_v41 = vld [vmem:[#allocation9 + $0x1b0] ss:$24 sps:$4 sm:$0xff]  }
 0x6de   :  { %2797 = vmatprep.subr.bf16.mxu1 %v5656_v54 }
 0x6e0   :  { %2679 = vmatpush1.bf16.msra.mxu0 %v5287_v38  ;;  %v5688_v38 = vld [vmem:[#allocation9 + $0x1e4] ss:$24 sps:$4 sm:$0xff]  }
 0x6e1   :  { %2680 = vmatprep.subr.bf16.mxu0 %v5290_v55  ;;  %2798 = vmatpush1.bf16.msra.mxu1 %v5661_v9  ;;  %v5693_v55 = vld [vmem:[#allocation9 + $0x1e0] ss:$24 sps:$4 sm:$0xff]  }
 0x6e2   :  { %2799 = vmatprep.subr.bf16.mxu1 %v5664_v20 }
 0x6e4   :  { %2681 = vmatpush1.bf16.msra.mxu0 %v5295_v51  ;;  %v5696_v51 = vld [vmem:[#allocation9 + $0x214] ss:$24 sps:$4 sm:$0xff]  }
 0x6e5   :  { %2682 = vmatprep.subr.bf16.mxu0 %v5298_v40  ;;  %2800 = vmatpush1.bf16.msra.mxu1 %v5669_v36  ;;  %v5701_v40 = vld [vmem:[#allocation9 + $0x210] ss:$24 sps:$4 sm:$0xff]  }
 0x6e6   :  { %2801 = vmatprep.subr.bf16.mxu1 %v5672_v24 }
 0x6e8   :  { %2683 = vmatpush1.bf16.msra.mxu0 %v5303_v63  ;;  %v5704_v63 = vld [vmem:[#allocation9 + $0x244] ss:$24 sps:$4 sm:$0xff]  }
 0x6e9   :  { %2684 = vmatprep.subr.bf16.mxu0 %v5306_v60  ;;  %2802 = vmatpush1.bf16.msra.mxu1 %v5677_v18  ;;  %v5709_v60 = vld [vmem:[#allocation9 + $0x240] ss:$24 sps:$4 sm:$0xff]  }
 0x6ea   :  { %2803 = vmatprep.subr.bf16.mxu1 %v5680_v15 }
 0x6ec   :  { %2685 = vmatpush1.bf16.msra.mxu0 %v5311_v42  ;;  %v5712_v42 = vld [vmem:[#allocation9 + $0x274] ss:$24 sps:$4 sm:$0xff]  }
 0x6ed   :  { %2686 = vmatprep.subr.bf16.mxu0 %v5314_v56  ;;  %2804 = vmatpush1.bf16.msra.mxu1 %v5685_v41  ;;  %v6630_v56 = vld [vmem:[#allocation32_spill] sm:$0xff] }
 0x6ee   :  { %2805 = vmatprep.subr.bf16.mxu1 %v5688_v38 }
 0x6f0   :  { %2687 = vmatpush1.bf16.msra.mxu0 %v5319_v27  ;;  %v5717_v27 = vld [vmem:[#allocation9 + $0x270] ss:$24 sps:$4 sm:$0xff]  }
 0x6f1   :  { %2688 = vmatprep.subr.bf16.mxu0 %v6569_v49  ;;  %2806 = vmatpush1.bf16.msra.mxu1 %v5693_v55  ;;  %v6632_v49 = vld [vmem:[#allocation36_spill] sm:$0xff] }
 0x6f2   :  { %2807 = vmatprep.subr.bf16.mxu1 %v5696_v51 }
 0x6f4   :  { %2689 = vmatpush1.bf16.msra.mxu0 %v6572_v14  ;;  %v5725_v14 = vld [vmem:[#allocation9 + $0x2a0] ss:$24 sps:$4 sm:$0xff]  }
 0x6f5   :  { %2690 = vmatprep.subr.bf16.mxu0 %v6573_v61  ;;  %2808 = vmatpush1.bf16.msra.mxu1 %v5701_v40  ;;  %v5728_v61 = vld [vmem:[#allocation9 + $0x2d4] ss:$24 sps:$4 sm:$0xff]  }
 0x6f6   :  { %2809 = vmatprep.subr.bf16.mxu1 %v5704_v63 }
 0x6f8   :  { %2691 = vmatpush1.bf16.msra.mxu0 %v6576_v22  ;;  %v6633_v22 = vld [vmem:[#allocation38_spill] sm:$0xff] }
 0x6f9   :  { %2692 = vmatprep.subr.bf16.mxu0 %v6577_v1  ;;  %2810 = vmatpush1.bf16.msra.mxu1 %v5709_v60  ;;  %v5732_v1 = vld [vmem:[#allocation9 + $0xc] ss:$24 sps:$4 sm:$0xff]  }
 0x6fa   :  { %2811 = vmatprep.subr.bf16.mxu1 %v5712_v42 }
 0x6fc   :  { %2693 = vmatpush1.bf16.msra.mxu0 %v6580_v52  ;;  %v5735_v52 = vld [vmem:[#allocation9 + $0x2d0] ss:$24 sps:$4 sm:$0xff]  }
 0x6fd   :  { %2694 = vmatprep.subr.bf16.mxu0 %v6630_v56  ;;  %2812 = vmatpush1.bf16.msra.mxu1 %v5717_v27  ;;  %v6650_v56 = vld [vmem:[#allocation42_spill] sm:$0xff] }
 0x6fe   :  { %2813 = vmatprep.subr.bf16.mxu1 %v5720_v12 }
 0x700   :  { %2695 = vmatpush1.bf16.msra.mxu0 %v6631_v21  ;;  %v6651_v21 = vld [vmem:[#allocation44_spill] sm:$0xff] }
 0x701   :  { %2696 = vmatprep.subr.bf16.mxu0 %v6632_v49  ;;  %2814 = vmatpush1.bf16.msra.mxu1 %v5725_v14  ;;  %v6652_v49 = vld [vmem:[#allocation46_spill] sm:$0xff] }
 0x702   :  { %2815 = vmatprep.subr.bf16.mxu1 %v5728_v61 }
 0x704   :  { %2697 = vmatpush1.bf16.msra.mxu0 %v6633_v22  ;;  %v6653_v22 = vld [vmem:[#allocation48_spill] sm:$0xff] }
 0x705   :  { %2826 = vmatprep.subr.bf16.mxu0 %v5732_v1  ;;  %2816 = vmatpush1.bf16.msra.mxu1 %v5735_v52 }
 0x706   :  { %2867 = vmatprep.subr.bf16.mxu1 %v5738_v46 }
 0x707   :  { %2699 = vmatmul.mubr.bf16.vlgmr.msra.gmra.mrb[40].mxu0 %v5621_v16  ;;  %v6649_v16 = vld [vmem:[#allocation82_spill] sm:$0xff] }
 0x708   :  { %2827 = vmatpush1.bf16.msra.mxu0 %v5742_v39 }
 0x709   :  { %2828 = vmatprep.subr.bf16.mxu0 %v5745_v44 }
 0x70c   :  { %2829 = vmatpush1.bf16.msra.mxu0 %v5748_v59 }
 0x70d   :  { %2830 = vmatprep.subr.bf16.mxu0 %v5751_v57 }
 0x710   :  { %2831 = vmatpush1.bf16.msra.mxu0 %v5754_v13  ;;  %v6666_v13 = vld [vmem:[#allocation17_spill] sm:$0xff] }
 0x711   :  { %2832 = vmatprep.subr.bf16.mxu0 %v5757_v32 }
 0x714   :  { %2833 = vmatpush1.bf16.msra.mxu0 %v5760_v4 }
 0x715   :  { %2834 = vmatprep.subr.bf16.mxu0 %v5763_v53 }
 0x718   :  { %2835 = vmatpush1.bf16.msra.mxu0 %v5766_v19 }
 0x719   :  { %2836 = vmatprep.subr.bf16.mxu0 %v5769_v7  ;;  %v6665_v7 = vld [vmem:[#allocation23_spill] sm:$0xff] }
 0x71c   :  { %2837 = vmatpush1.bf16.msra.mxu0 %v6643_v58  ;;  %v6654_v58 = vld [vmem:[#allocation50_spill] sm:$0xff] }
 0x71d   :  { %2838 = vmatprep.subr.bf16.mxu0 %v6644_v5  ;;  %v6655_v5 = vld [vmem:[#allocation52_spill] sm:$0xff] }
 0x720   :  { %2839 = vmatpush1.bf16.msra.mxu0 %v6645_v47  ;;  %v6656_v47 = vld [vmem:[#allocation54_spill] sm:$0xff] }
 0x721   :  { %2840 = vmatprep.subr.bf16.mxu0 %v6646_v8  ;;  %v6657_v8 = vld [vmem:[#allocation56_spill] sm:$0xff] }
 0x724   :  { %2841 = vmatpush1.bf16.msra.mxu0 %v6647_v10  ;;  %v6658_v10 = vld [vmem:[#allocation58_spill] sm:$0xff] }
 0x725   :  { %2842 = vmatprep.subr.bf16.mxu0 %v6648_v62  ;;  %v6659_v62 = vld [vmem:[#allocation60_spill] sm:$0xff] }
 0x728   :  { %2843 = vmatpush1.bf16.msra.mxu0 %v6649_v16  ;;  %v6660_v16 = vld [vmem:[#allocation62_spill] sm:$0xff] }
 0x729   :  { %2844 = vmatprep.subr.bf16.mxu0 %v6650_v56  ;;  %v6661_v56 = vld [vmem:[#allocation64_spill] sm:$0xff] }
 0x72c   :  { %2845 = vmatpush1.bf16.msra.mxu0 %v6651_v21  ;;  %v6662_v21 = vld [vmem:[#allocation66_spill] sm:$0xff] }
 0x72d   :  { %2846 = vmatprep.subr.bf16.mxu0 %v6652_v49  ;;  %v6663_v49 = vld [vmem:[#allocation68_spill] sm:$0xff] }
 0x730   :  { %2847 = vmatpush1.bf16.msra.mxu0 %v6653_v22  ;;  %v6664_v22 = vld [vmem:[#allocation70_spill] sm:$0xff] }
 0x731   :  { %2848 = vmatprep.subr.bf16.mxu0 %v6654_v58 }
 0x734   :  { %2849 = vmatpush1.bf16.msra.mxu0 %v6655_v5 }
 0x735   :  { %2850 = vmatprep.subr.bf16.mxu0 %v6656_v47 }
 0x738   :  { %2851 = vmatpush1.bf16.msra.mxu0 %v6657_v8 }
 0x739   :  { %2852 = vmatprep.subr.bf16.mxu0 %v6658_v10 }
 0x73c   :  { %2853 = vmatpush1.bf16.msra.mxu0 %v6659_v62 }
 0x73d   :  { %2854 = vmatprep.subr.bf16.mxu0 %v6660_v16 }
 0x740   :  { %2855 = vmatpush1.bf16.msra.mxu0 %v6661_v56 }
 0x741   :  { %2856 = vmatprep.subr.bf16.mxu0 %v6662_v21 }
 0x744   :  { %2857 = vmatpush1.bf16.msra.mxu0 %v6663_v49 }
 0x745   :  { %2982 = vmatprep.subr.bf16.mxu0 %v6664_v22 }
 0x79a   :  { %v2618_v58 = vpop.f32.mrb[36].mxu0  ;;  %v2659_v5 = vpop.f32.mrb[36].mxu1 }
 0x79b   :  { %v2660_v47 = vadd.f32 %v2659_v5, %v6665_v7  ;;  %v2620_v19 = vpop.f32.mrb[37].mxu0  ;;  %v2661_v8 = vpop.f32.mrb[37].mxu1 }
 0x79c   :  { %v2662_v10 = vadd.f32 %v2661_v8, %v4855_v43  ;;  %v2622_v53 = vpop.f32.mrb[38].mxu0  ;;  %v2663_v62 = vpop.f32.mrb[38].mxu1 }
 0x79d   :  { %v2729_v4 = vrot.slane %v2660_v47, 3  ;;  %v2623_v16 = vpop.f32.mrb[39].mxu0  ;;  %v2664_v32 = vpop.f32.mrb[39].mxu1  ;;  %v2619_v53 = vadd.f32 %v2618_v58, %v6463_v17  ;;  %v6667_v47 = vld [vmem:[#allocation20_spill] sm:$0xff] }
 0x79e   :  { %v2730_v56 = vrot.slane %v2662_v10, 3  ;;  %v2621_v8 = vadd.f32 %v2620_v19, %v6667_v47  ;;  %v6668_v16 = vld [vmem:[#allocation21_spill] sm:$0xff] }
 0x79f   :  { %v2733_v21 = vadd.f32 %v2729_v4, %v4859_v26  ;;  %v2709_v32 = vrot.slane %v2619_v53, 3  ;;  %v2765_v4 = vrot.slane %v5603_v25, 7 }
 0x7a0   :  { %v2734_v49 = vadd.f32 %v2730_v56, %v6666_v13  ;;  %v2710_v10 = vrot.slane %v2621_v8, 3  ;;  %v6670_v8 = vld [vmem:[#allocation25_spill] sm:$0xff] }
 0x7a1   :  { %v3465_v57 = vmul.f32 -1.442695, %v2733_v21  ;;  %v2713_v56 = vadd.f32 %v2709_v32, %v6668_v16  ;;  %v6669_v21 = vld [vmem:[#allocation22_spill] sm:$0xff] }
 0x7a2   :  { %v3466_v22 = vmul.f32 -1.442695, %v2734_v49  ;;  %v2766_v49 = vrot.slane %v5605_v37, 7 }
 0x7a3   :  { %3880 = vpow2.f32 %v3465_v57  ;;  %v2714_v57 = vadd.f32 %v2710_v10, %v6669_v21 }
 0x7a4   :  { %3882 = vpow2.f32 %v3466_v22 }
 0x7a5   :  { %v3464_v13 = vmul.f32 -1.442695, %v2714_v57 }
 0x7ad   :  { %v3881_v59 = vpop.eup %3880 }
 0x7ae   :  { %v2741_v5 = vadd.f32 1.0, %v3881_v59  ;;  %v3883_v7 = vpop.eup %3882 }
 0x7af   :  { %v2742_v44 = vadd.f32 1.0, %v3883_v7  ;;  %v3463_v7 = vmul.f32 -1.442695, %v2713_v56 }
 0x7b0   :  { %3884 = vrcp.f32 %v2741_v5 }
 0x7b1   :  { %3886 = vrcp.f32 %v2742_v44 }
 0x7b2   :  { %3888 = vpow2.f32 %v3463_v7 }
 0x7b3   :  { %3890 = vpow2.f32 %v3464_v13 }
 0x7ba   :  { %v3885_v62 = vpop.eup %3884 }
 0x7bb   :  { %v2769_v59 = vmul.f32 %v3885_v62, %v2765_v4  ;;  %v3887_v22 = vpop.eup %3886 }
 0x7bc   :  { %v2770_v5 = vmul.f32 %v3887_v22, %v2766_v49  ;;  %v3889_v44 = vpop.eup %3888 }
 0x7bd   :  { %v3891_v19 = vpop.eup %3890  ;;  %v2721_v58 = vadd.f32 1.0, %v3889_v44 }
 0x7be   :  { %v2722_v53 = vadd.f32 1.0, %v3891_v19  ;;  %v2759_v19 = vsub.f32 1.0, %v3885_v62 }
 0x7bf   :  { %3892 = vrcp.f32 %v2721_v58 }
 0x7c0   :  { %3894 = vrcp.f32 %v2722_v53  ;;  %v2760_v53 = vsub.f32 1.0, %v3887_v22 }
 0x7c9   :  { %v3893_v49 = vpop.eup %3892 }
 0x7ca   :  { %v3895_v57 = vpop.eup %3894 }
 0x7da   :  { %v2700_v25 = vpop.f32.mrb[40].mxu0 }
 0x7db   :  { %v2701_v32 = vadd.f32 %v2700_v25, %v6670_v8  ;;  %v2702_v16 = vpop.f32.mrb[41].mxu0 }
 0x7dc   :  { %v2703_v10 = vadd.f32 %v2702_v16, %v4857_v34  ;;  %v2704_v37 = vpop.f32.mrb[42].mxu0 }
 0x7dd   :  { %v2749_v4 = vrot.slane %v2701_v32, 3  ;;  %v2705_v21 = vpop.f32.mrb[43].mxu0 }
 0x7de   :  { %v2750_v56 = vrot.slane %v2703_v10, 3 }
 0x7df   :  { %v2753_v7 = vmul.f32 %v3893_v49, %v2749_v4  ;;  %v5833_v4 = vld [vmem:[#allocation9 + $0x44] ss:$24 sps:$4 sm:$0xff]   ;;  %v5841_v49 = vld [vmem:[#allocation9 + $0x74] ss:$24 sps:$4 sm:$0xff]  }
 0x7e0   :  { %v2754_v13 = vmul.f32 %v3895_v57, %v2750_v56  ;;  %v5846_v56 = vld [vmem:[#allocation9 + $0x70] ss:$24 sps:$4 sm:$0xff]   ;;  %v5849_v57 = vld [vmem:[#allocation9 + $0xa4] ss:$24 sps:$4 sm:$0xff]  }
 0x7e1   :  { %v2755_v47 = vadd.f32 %v2753_v7, %v4870_v11  ;;  %v6676_v7 = vld [vmem:[#allocation81_spill] sm:$0xff] }
 0x7e2   :  { %v2756_v44 = vadd.f32 %v2754_v13, %v4874_v28  ;;  %v4111_v13 = vld [vmem:[#allocation9 + $0xf8] ss:$24 sps:$4 sm:$0xff]  }
 0x7e3   :  { %3896 = vtanh.f32 %v2755_v47 }
 0x7e4   :  { %3898 = vtanh.f32 %v2756_v44  ;;  %v4113_v44 = vld [vmem:[#allocation9 + $0x128] ss:$24 sps:$4 sm:$0xff]  }
 0x7ed   :  { %v3897_v58 = vpop.eup %3896 }
 0x7ee   :  { %v3899_v25 = vpop.eup %3898  ;;  %v2761_v8 = vmul.f32 %v3897_v58, %v2759_v19  ;;  %v4114_v19 = vld [vmem:[#allocation9 + $0x15c] ss:$24 sps:$4 sm:$0xff]   ;;  %v4115_v58 = vld [vmem:[#allocation9 + $0x158] ss:$24 sps:$4 sm:$0xff]  }
 0x7ef   :  { %v2762_v16 = vmul.f32 %v3899_v25, %v2760_v53  ;;  %v4116_v53 = vld [vmem:[#allocation9 + $0x18c] ss:$24 sps:$4 sm:$0xff]   ;;  %v4117_v25 = vld [vmem:[#allocation9 + $0x188] ss:$24 sps:$4 sm:$0xff]  }
 0x7f0   :  { %v5808_v37 = vadd.f32 %v2769_v59, %v2761_v8 }
 0x7f1   :  { %v5810_v21 = vadd.f32 %v2770_v5, %v2762_v16  ;;  %v4118_v16 = vld [vmem:[#allocation9 + $0x1bc] ss:$24 sps:$4 sm:$0xff]  }
 0x7f2   :  { %v2773_v32 = vpack.c.bf16 %v5808_v37, %v5808_v37  ;;  %v5817_v10 = vsel %vm259_vm4, %v5612_v0, %v5808_v37  ;;  %v5830_v0 = vld [vmem:[#allocation9 + $0x10] ss:$24 sps:$4 sm:$0xff]  }
 0x7f3   :  { %v2774_v47 = vpack.c.bf16 %v5810_v21, %v5810_v21  ;;  %v5824_v62 = vsel %vm259_vm4, %v5619_v48, %v5810_v21  ;;  %v5838_v48 = vld [vmem:[#allocation9 + $0x40] ss:$24 sps:$4 sm:$0xff]  }
 0x7f4   :  { %v2776_v59 = vshrl.u32 %v2773_v32, 16  ;;  %v4119_v32 = vld [vmem:[#allocation9 + $0x1b8] ss:$24 sps:$4 sm:$0xff]  }
 0x7f5   :  { %v2780_v22 = vshrl.u32 %v2774_v47, 16  ;;  %v4120_v47 = vld [vmem:[#allocation9 + $0x1ec] ss:$24 sps:$4 sm:$0xff]  }
 0x7f6   :  { %v5826_v8 = vrot.slane %v2776_v59, 2  ;;  %v4121_v59 = vld [vmem:[#allocation9 + $0x1e8] ss:$24 sps:$4 sm:$0xff]  }
 0x7f7   :  { %v2782_v5 = vrot.slane %v2780_v22, 2  ;;  %v4122_v22 = vld [vmem:[#allocation9 + $0x21c] ss:$24 sps:$4 sm:$0xff]  }
 0x7f9   :  { %2817 = vmatprep.mubr.bf16.mxu1 %v2782_v5  ;;  %2858 = vmatprep.mubr.bf16.mxu0 %v2782_v5 }
 0x7fa   :  { %2818 = vmatmul.mubr.bf16.vlgmr.msra.gmra.mrb[40].mxu1 %v5826_v8  ;;  %2859 = vmatmul.mubr.bf16.vlgmr.msra.gmra.mrb[44].mxu0 %v5826_v8 }
 0x7fb   :  { %2868 = vmatpush1.bf16.msra.mxu1 %v5830_v0  ;;  %2899 = vmatprep.mubr.bf16.mxu1 %v2782_v5  ;;  %v4123_v5 = vld [vmem:[#allocation9 + $0x218] ss:$24 sps:$4 sm:$0xff]  }
 0x7fc   :  { %2869 = vmatprep.subr.bf16.mxu1 %v5833_v4  ;;  %2983 = vmatpush1.bf16.msra.mxu0 %v5478_v23  ;;  %v5854_v23 = vld [vmem:[#allocation9 + $0xa0] ss:$24 sps:$4 sm:$0xff]  }
 0x7fd   :  { %2984 = vmatprep.subr.bf16.mxu0 %v5481_v29  ;;  %v5857_v29 = vld [vmem:[#allocation9 + $0xd4] ss:$24 sps:$4 sm:$0xff]  }
 0x7ff   :  { %2870 = vmatpush1.bf16.msra.mxu1 %v5838_v48 }
 0x800   :  { %2871 = vmatprep.subr.bf16.mxu1 %v5841_v49  ;;  %2985 = vmatpush1.bf16.msra.mxu0 %v5486_v6  ;;  %v5862_v6 = vld [vmem:[#allocation9 + $0xd0] ss:$24 sps:$4 sm:$0xff]  }
 0x801   :  { %2986 = vmatprep.subr.bf16.mxu0 %v5489_v3  ;;  %v5865_v3 = vld [vmem:[#allocation9 + $0x104] ss:$24 sps:$4 sm:$0xff]  }
 0x803   :  { %2872 = vmatpush1.bf16.msra.mxu1 %v5846_v56 }
 0x804   :  { %2873 = vmatprep.subr.bf16.mxu1 %v5849_v57  ;;  %2987 = vmatpush1.bf16.msra.mxu0 %v5494_v50  ;;  %v5870_v50 = vld [vmem:[#allocation9 + $0x100] ss:$24 sps:$4 sm:$0xff]  }
 0x805   :  { %2988 = vmatprep.subr.bf16.mxu0 %v5497_v2  ;;  %v5873_v2 = vld [vmem:[#allocation9 + $0x134] ss:$24 sps:$4 sm:$0xff]  }
 0x807   :  { %2874 = vmatpush1.bf16.msra.mxu1 %v5854_v23 }
 0x808   :  { %2875 = vmatprep.subr.bf16.mxu1 %v5857_v29  ;;  %2989 = vmatpush1.bf16.msra.mxu0 %v5502_v45  ;;  %v5878_v45 = vld [vmem:[#allocation9 + $0x130] ss:$24 sps:$4 sm:$0xff]  }
 0x809   :  { %2990 = vmatprep.subr.bf16.mxu0 %v5640_v30  ;;  %v5881_v30 = vld [vmem:[#allocation9 + $0x164] ss:$24 sps:$4 sm:$0xff]  }
 0x80b   :  { %2876 = vmatpush1.bf16.msra.mxu1 %v5862_v6 }
 0x80c   :  { %2877 = vmatprep.subr.bf16.mxu1 %v5865_v3  ;;  %2991 = vmatpush1.bf16.msra.mxu0 %v5645_v31  ;;  %v5886_v31 = vld [vmem:[#allocation9 + $0x160] ss:$24 sps:$4 sm:$0xff]  }
 0x80d   :  { %2992 = vmatprep.subr.bf16.mxu0 %v5648_v33  ;;  %v5889_v33 = vld [vmem:[#allocation9 + $0x194] ss:$24 sps:$4 sm:$0xff]  }
 0x80f   :  { %2878 = vmatpush1.bf16.msra.mxu1 %v5870_v50 }
 0x810   :  { %2879 = vmatprep.subr.bf16.mxu1 %v5873_v2  ;;  %2993 = vmatpush1.bf16.msra.mxu0 %v5653_v35  ;;  %v5894_v35 = vld [vmem:[#allocation9 + $0x190] ss:$24 sps:$4 sm:$0xff]  }
 0x811   :  { %2994 = vmatprep.subr.bf16.mxu0 %v5656_v54  ;;  %v5897_v54 = vld [vmem:[#allocation9 + $0x1c4] ss:$24 sps:$4 sm:$0xff]  }
 0x813   :  { %2880 = vmatpush1.bf16.msra.mxu1 %v5878_v45 }
 0x814   :  { %2881 = vmatprep.subr.bf16.mxu1 %v5881_v30  ;;  %2995 = vmatpush1.bf16.msra.mxu0 %v5661_v9  ;;  %v5902_v9 = vld [vmem:[#allocation9 + $0x1c0] ss:$24 sps:$4 sm:$0xff]  }
 0x815   :  { %2996 = vmatprep.subr.bf16.mxu0 %v5664_v20  ;;  %v5905_v20 = vld [vmem:[#allocation9 + $0x1f4] ss:$24 sps:$4 sm:$0xff]  }
 0x817   :  { %2882 = vmatpush1.bf16.msra.mxu1 %v5886_v31 }
 0x818   :  { %2883 = vmatprep.subr.bf16.mxu1 %v5889_v33  ;;  %2997 = vmatpush1.bf16.msra.mxu0 %v5669_v36  ;;  %v5910_v36 = vld [vmem:[#allocation9 + $0x1f0] ss:$24 sps:$4 sm:$0xff]  }
 0x819   :  { %2998 = vmatprep.subr.bf16.mxu0 %v5672_v24  ;;  %v5913_v24 = vld [vmem:[#allocation9 + $0x224] ss:$24 sps:$4 sm:$0xff]  }
 0x81b   :  { %2884 = vmatpush1.bf16.msra.mxu1 %v5894_v35 }
 0x81c   :  { %2885 = vmatprep.subr.bf16.mxu1 %v5897_v54  ;;  %2999 = vmatpush1.bf16.msra.mxu0 %v5677_v18  ;;  %v5918_v18 = vld [vmem:[#allocation9 + $0x220] ss:$24 sps:$4 sm:$0xff]  }
 0x81d   :  { %3000 = vmatprep.subr.bf16.mxu0 %v5680_v15  ;;  %v5921_v15 = vld [vmem:[#allocation9 + $0x254] ss:$24 sps:$4 sm:$0xff]  }
 0x81f   :  { %2886 = vmatpush1.bf16.msra.mxu1 %v5902_v9 }
 0x820   :  { %2887 = vmatprep.subr.bf16.mxu1 %v5905_v20  ;;  %3001 = vmatpush1.bf16.msra.mxu0 %v5685_v41  ;;  %v5926_v41 = vld [vmem:[#allocation9 + $0x250] ss:$24 sps:$4 sm:$0xff]  }
 0x821   :  { %3002 = vmatprep.subr.bf16.mxu0 %v5688_v38  ;;  %v5929_v38 = vld [vmem:[#allocation9 + $0x284] ss:$24 sps:$4 sm:$0xff]  }
 0x823   :  { %2888 = vmatpush1.bf16.msra.mxu1 %v5910_v36 }
 0x824   :  { %2889 = vmatprep.subr.bf16.mxu1 %v5913_v24  ;;  %3003 = vmatpush1.bf16.msra.mxu0 %v5693_v55  ;;  %v5934_v55 = vld [vmem:[#allocation9 + $0x280] ss:$24 sps:$4 sm:$0xff]  }
 0x825   :  { %3004 = vmatprep.subr.bf16.mxu0 %v5696_v51  ;;  %v5937_v51 = vld [vmem:[#allocation9 + $0x2b4] ss:$24 sps:$4 sm:$0xff]  }
 0x827   :  { %2890 = vmatpush1.bf16.msra.mxu1 %v5918_v18 }
 0x828   :  { %2891 = vmatprep.subr.bf16.mxu1 %v5921_v15  ;;  %3005 = vmatpush1.bf16.msra.mxu0 %v5701_v40  ;;  %v5942_v40 = vld [vmem:[#allocation9 + $0x2b0] ss:$24 sps:$4 sm:$0xff]  }
 0x829   :  { %3006 = vmatprep.subr.bf16.mxu0 %v5704_v63  ;;  %v5945_v63 = vld [vmem:[#allocation9 + $0x2e4] ss:$24 sps:$4 sm:$0xff]  }
 0x82b   :  { %2892 = vmatpush1.bf16.msra.mxu1 %v5926_v41 }
 0x82c   :  { %2893 = vmatprep.subr.bf16.mxu1 %v5929_v38  ;;  %3007 = vmatpush1.bf16.msra.mxu0 %v5709_v60  ;;  %v5950_v60 = vld [vmem:[#allocation9 + $0x2e0] ss:$24 sps:$4 sm:$0xff]  }
 0x82d   :  { %3008 = vmatprep.subr.bf16.mxu0 %v5712_v42  ;;  %v6671_v42 = vld [vmem:[#allocation72_spill] sm:$0xff] }
 0x82f   :  { %2894 = vmatpush1.bf16.msra.mxu1 %v5934_v55 }
 0x830   :  { %2895 = vmatprep.subr.bf16.mxu1 %v5937_v51  ;;  %3009 = vmatpush1.bf16.msra.mxu0 %v5717_v27  ;;  %v6672_v27 = vld [vmem:[#allocation74_spill] sm:$0xff] }
 0x831   :  { %3010 = vmatprep.subr.bf16.mxu0 %v5720_v12  ;;  %v6673_v12 = vld [vmem:[#allocation75_spill] sm:$0xff] }
 0x833   :  { %2896 = vmatpush1.bf16.msra.mxu1 %v5942_v40 }
 0x834   :  { %2897 = vmatprep.subr.bf16.mxu1 %v5945_v63  ;;  %3011 = vmatpush1.bf16.msra.mxu0 %v5725_v14  ;;  %v6674_v14 = vld [vmem:[#allocation77_spill] sm:$0xff] }
 0x835   :  { %3012 = vmatprep.subr.bf16.mxu0 %v5728_v61  ;;  %v6675_v61 = vld [vmem:[#allocation79_spill] sm:$0xff] }
 0x837   :  { %2898 = vmatpush1.bf16.msra.mxu1 %v5950_v60 }
 0x838   :  { %3023 = vmatprep.subr.bf16.mxu1 %v5732_v1  ;;  %3013 = vmatpush1.bf16.msra.mxu0 %v5735_v52  ;;  %v6677_v1 = vld [vmem:[#allocation15_spill] sm:$0xff]  ;;  %v6678_v52 = vld [vmem:[#allocation65_spill] sm:$0xff] }
 0x839   :  { %3064 = vmatprep.subr.bf16.mxu0 %v5738_v46  ;;  %v6679_v46 = vld [vmem:[#allocation24_spill] sm:$0xff] }
 0x83a   :  { %2900 = vmatmul.mubr.bf16.vlgmr.msra.gmra.mrb[44].mxu1 %v5826_v8  ;;  %v4124_v8 = vld [vmem:[#allocation9 + $0x24c] ss:$24 sps:$4 sm:$0xff]  }
 0x83b   :  { %3024 = vmatpush1.bf16.msra.mxu1 %v5742_v39  ;;  %v4112_v39 = vld [vmem:[#allocation9 + $0x12c] ss:$24 sps:$4 sm:$0xff]  }
 0x83c   :  { %3025 = vmatprep.subr.bf16.mxu1 %v6671_v42  ;;  %v4125_v42 = vld [vmem:[#allocation9 + $0x248] ss:$24 sps:$4 sm:$0xff]  }
 0x83f   :  { %3026 = vmatpush1.bf16.msra.mxu1 %v6672_v27  ;;  %v4126_v27 = vld [vmem:[#allocation9 + $0x27c] ss:$24 sps:$4 sm:$0xff]  }
 0x840   :  { %3027 = vmatprep.subr.bf16.mxu1 %v6673_v12  ;;  %v4127_v12 = vld [vmem:[#allocation9 + $0x278] ss:$24 sps:$4 sm:$0xff]  }
 0x843   :  { %3028 = vmatpush1.bf16.msra.mxu1 %v6674_v14  ;;  %v4128_v14 = vld [vmem:[#allocation9 + $0x2ac] ss:$24 sps:$4 sm:$0xff]  }
 0x844   :  { %3029 = vmatprep.subr.bf16.mxu1 %v6675_v61  ;;  %v4129_v61 = vld [vmem:[#allocation9 + $0x2a8] ss:$24 sps:$4 sm:$0xff]  }
 0x847   :  { %3030 = vmatpush1.bf16.msra.mxu1 %v6676_v7  ;;  %v4130_v7 = vld [vmem:[#allocation9 + $0x2dc] ss:$24 sps:$4 sm:$0xff]  }
 0x848   :  { %3031 = vmatprep.subr.bf16.mxu1 %v6677_v1  ;;  %v4131_v1 = vld [vmem:[#allocation9 + $0x2d8] ss:$24 sps:$4 sm:$0xff]  }
 0x84b   :  { %3032 = vmatpush1.bf16.msra.mxu1 %v6678_v52 }
 0x84c   :  { %3033 = vmatprep.subr.bf16.mxu1 %v6679_v46 }
 0x84f   :  { %3034 = vmatpush1.bf16.msra.mxu1 %v4111_v13  ;;  %v6680_v13 = vld [vmem:[#allocation23_spill] sm:$0xff] }
 0x850   :  { %3035 = vmatprep.subr.bf16.mxu1 %v4112_v39 }
 0x853   :  { %3036 = vmatpush1.bf16.msra.mxu1 %v4113_v44 }
 0x854   :  { %3037 = vmatprep.subr.bf16.mxu1 %v4114_v19 }
 0x857   :  { %3038 = vmatpush1.bf16.msra.mxu1 %v4115_v58 }
 0x858   :  { %3039 = vmatprep.subr.bf16.mxu1 %v4116_v53 }
 0x85b   :  { %3040 = vmatpush1.bf16.msra.mxu1 %v4117_v25 }
 0x85c   :  { %3041 = vmatprep.subr.bf16.mxu1 %v4118_v16 }
 0x85f   :  { %3042 = vmatpush1.bf16.msra.mxu1 %v4119_v32 }
 0x860   :  { %3043 = vmatprep.subr.bf16.mxu1 %v4120_v47 }
 0x863   :  { %3044 = vmatpush1.bf16.msra.mxu1 %v4121_v59 }
 0x864   :  { %3045 = vmatprep.subr.bf16.mxu1 %v4122_v22 }
 0x867   :  { %3046 = vmatpush1.bf16.msra.mxu1 %v4123_v5  ;;  %v6681_v5 = vld [vmem:[#allocation17_spill] sm:$0xff] }
 0x868   :  { %3047 = vmatprep.subr.bf16.mxu1 %v4124_v8 }
 0x86b   :  { %3048 = vmatpush1.bf16.msra.mxu1 %v4125_v42 }
 0x86c   :  { %3049 = vmatprep.subr.bf16.mxu1 %v4126_v27 }
 0x86f   :  { %3050 = vmatpush1.bf16.msra.mxu1 %v4127_v12 }
 0x870   :  { %3051 = vmatprep.subr.bf16.mxu1 %v4128_v14 }
 0x873   :  { %3052 = vmatpush1.bf16.msra.mxu1 %v4129_v61 }
 0x874   :  { %3053 = vmatprep.subr.bf16.mxu1 %v4130_v7 }
 0x877   :  { %3054 = vmatpush1.bf16.msra.mxu1 %v4131_v1 }
 0x8cd   :  { %v2819_v52 = vpop.f32.mrb[40].mxu1  ;;  %v2860_v46 = vpop.f32.mrb[44].mxu0 }
 0x8ce   :  { %v2861_v39 = vadd.f32 %v2860_v46, %v6680_v13  ;;  %v2821_v44 = vpop.f32.mrb[41].mxu1  ;;  %v2862_v19 = vpop.f32.mrb[45].mxu0  ;;  %v2820_v1 = vadd.f32 %v2819_v52, %v6463_v17  ;;  %v6682_v46 = vld [vmem:[#allocation20_spill] sm:$0xff] }
 0x8cf   :  { %v2863_v58 = vadd.f32 %v2862_v19, %v4855_v43  ;;  %v2823_v53 = vpop.f32.mrb[42].mxu1  ;;  %v2864_v25 = vpop.f32.mrb[46].mxu0 }
 0x8d0   :  { %v2930_v16 = vrot.slane %v2861_v39, 2  ;;  %v2824_v32 = vpop.f32.mrb[43].mxu1  ;;  %v2865_v47 = vpop.f32.mrb[47].mxu0  ;;  %v2822_v39 = vadd.f32 %v2821_v44, %v6682_v46  ;;  %v2910_v19 = vrot.slane %v2820_v1, 2  ;;  %v2966_v53 = vrot.slane %v5808_v37, 7  ;;  %v6685_v1 = vld [vmem:[#allocation25_spill] sm:$0xff] }
 0x8d1   :  { %v2931_v59 = vrot.slane %v2863_v58, 2  ;;  %v6684_v47 = vld [vmem:[#allocation22_spill] sm:$0xff] }
 0x8d2   :  { %v2934_v22 = vadd.f32 %v2930_v16, %v4859_v26  ;;  %v2911_v58 = vrot.slane %v2822_v39, 2  ;;  %v6683_v16 = vld [vmem:[#allocation21_spill] sm:$0xff] }
 0x8d3   :  { %v2935_v8 = vadd.f32 %v2931_v59, %v6681_v5  ;;  %v2914_v32 = vadd.f32 %v2910_v19, %v6683_v16 }
 0x8d4   :  { %v3469_v42 = vmul.f32 -1.442695, %v2934_v22  ;;  %v2915_v59 = vadd.f32 %v2911_v58, %v6684_v47  ;;  %v2967_v22 = vrot.slane %v5810_v21, 7 }
 0x8d5   :  { %v3470_v27 = vmul.f32 -1.442695, %v2935_v8 }
 0x8d6   :  { %3900 = vpow2.f32 %v3469_v42 }
 0x8d7   :  { %3902 = vpow2.f32 %v3470_v27 }
 0x8e0   :  { %v3901_v12 = vpop.eup %3900 }
 0x8e1   :  { %v2942_v14 = vadd.f32 1.0, %v3901_v12  ;;  %v3903_v61 = vpop.eup %3902  ;;  %v3467_v12 = vmul.f32 -1.442695, %v2914_v32 }
 0x8e2   :  { %v2943_v7 = vadd.f32 1.0, %v3903_v61 }
 0x8e3   :  { %3904 = vrcp.f32 %v2942_v14  ;;  %v3468_v14 = vmul.f32 -1.442695, %v2915_v59 }
 0x8e4   :  { %3906 = vrcp.f32 %v2943_v7 }
 0x8e5   :  { %3908 = vpow2.f32 %v3467_v12 }
 0x8e6   :  { %3910 = vpow2.f32 %v3468_v14 }
 0x8ed   :  { %v3905_v25 = vpop.eup %3904 }
 0x8ee   :  { %v2970_v8 = vmul.f32 %v3905_v25, %v2966_v53  ;;  %v3907_v42 = vpop.eup %3906 }
 0x8ef   :  { %v2971_v27 = vmul.f32 %v3907_v42, %v2967_v22  ;;  %v3909_v52 = vpop.eup %3908 }
 0x8f0   :  { %v3911_v44 = vpop.eup %3910  ;;  %v2922_v61 = vadd.f32 1.0, %v3909_v52 }
 0x8f1   :  { %v2923_v7 = vadd.f32 1.0, %v3911_v44  ;;  %v2960_v44 = vsub.f32 1.0, %v3905_v25 }
 0x8f2   :  { %3912 = vrcp.f32 %v2922_v61 }
 0x8f3   :  { %3914 = vrcp.f32 %v2923_v7  ;;  %v2961_v7 = vsub.f32 1.0, %v3907_v42 }
 0x8fc   :  { %v3913_v22 = vpop.eup %3912 }
 0x8fd   :  { %v3915_v59 = vpop.eup %3914 }
 0x90d   :  { %v2901_v37 = vpop.f32.mrb[44].mxu1 }
 0x90e   :  { %v2902_v39 = vadd.f32 %v2901_v37, %v6685_v1  ;;  %v2903_v19 = vpop.f32.mrb[45].mxu1 }
 0x90f   :  { %v2904_v58 = vadd.f32 %v2903_v19, %v4857_v34  ;;  %v2905_v21 = vpop.f32.mrb[46].mxu1 }
 0x910   :  { %v2950_v53 = vrot.slane %v2902_v39, 2  ;;  %v2906_v47 = vpop.f32.mrb[47].mxu1 }
 0x911   :  { %v2951_v32 = vrot.slane %v2904_v58, 2 }
 0x912   :  { %v2954_v12 = vmul.f32 %v3913_v22, %v2950_v53  ;;  %v6688_v53 = vld [vmem:[#allocation25_spill] sm:$0xff] }
 0x913   :  { %v2955_v14 = vmul.f32 %v3915_v59, %v2951_v32 }
 0x914   :  { %v2956_v16 = vadd.f32 %v2954_v12, %v4870_v11 }
 0x915   :  { %v2957_v52 = vadd.f32 %v2955_v14, %v4874_v28 }
 0x916   :  { %3916 = vtanh.f32 %v2956_v16 }
 0x917   :  { %3918 = vtanh.f32 %v2957_v52 }
 0x920   :  { %v3917_v61 = vpop.eup %3916 }
 0x921   :  { %v3919_v37 = vpop.eup %3918  ;;  %v2962_v1 = vmul.f32 %v3917_v61, %v2960_v44 }
 0x922   :  { %v2963_v19 = vmul.f32 %v3919_v37, %v2961_v7 }
 0x923   :  { %v5981_v21 = vadd.f32 %v2970_v8, %v2962_v1 }
 0x924   :  { %v5983_v47 = vadd.f32 %v2971_v27, %v2963_v19 }
 0x925   :  { %v2974_v39 = vpack.c.bf16 %v5981_v21, %v5981_v21  ;;  %v5990_v58 = vsel %vm262_vm5, %v5817_v10, %v5981_v21 }
 0x926   :  { %v2975_v25 = vpack.c.bf16 %v5983_v47, %v5983_v47  ;;  %v5997_v16 = vsel %vm262_vm5, %v5824_v62, %v5983_v47 }
 0x927   :  { %v2978_v42 = vrot.slane %v2974_v39, 3 }
 0x928   :  { %v2979_v8 = vrot.slane %v2975_v25, 3 }
 0x92a   :  { %3014 = vmatprep.mubr.bf16.mxu0 %v2979_v8  ;;  %3055 = vmatprep.mubr.bf16.mxu1 %v2979_v8 }
 0x92b   :  { %3015 = vmatmul.mubr.bf16.vlgmr.msra.gmra.mrb[48].mxu0 %v2978_v42  ;;  %3056 = vmatmul.mubr.bf16.vlgmr.msra.gmra.mrb[48].mxu1 %v2978_v42 }
 0x92c   :  { %3065 = vmatpush1.bf16.msra.mxu0 %v5830_v0  ;;  %3096 = vmatprep.mubr.bf16.mxu0 %v2979_v8 }
 0x92d   :  { %3066 = vmatprep.subr.bf16.mxu0 %v5833_v4 }
 0x930   :  { %3067 = vmatpush1.bf16.msra.mxu0 %v5838_v48 }
 0x931   :  { %3068 = vmatprep.subr.bf16.mxu0 %v5841_v49 }
 0x934   :  { %3069 = vmatpush1.bf16.msra.mxu0 %v5846_v56 }
 0x935   :  { %3070 = vmatprep.subr.bf16.mxu0 %v5849_v57 }
 0x938   :  { %3071 = vmatpush1.bf16.msra.mxu0 %v5854_v23 }
 0x939   :  { %3072 = vmatprep.subr.bf16.mxu0 %v5857_v29 }
 0x93c   :  { %3073 = vmatpush1.bf16.msra.mxu0 %v5862_v6 }
 0x93d   :  { %3074 = vmatprep.subr.bf16.mxu0 %v5865_v3 }
 0x940   :  { %3075 = vmatpush1.bf16.msra.mxu0 %v5870_v50 }
 0x941   :  { %3076 = vmatprep.subr.bf16.mxu0 %v5873_v2 }
 0x944   :  { %3077 = vmatpush1.bf16.msra.mxu0 %v5878_v45 }
 0x945   :  { %3078 = vmatprep.subr.bf16.mxu0 %v5881_v30 }
 0x948   :  { %3079 = vmatpush1.bf16.msra.mxu0 %v5886_v31 }
 0x949   :  { %3080 = vmatprep.subr.bf16.mxu0 %v5889_v33 }
 0x94c   :  { %3081 = vmatpush1.bf16.msra.mxu0 %v5894_v35 }
 0x94d   :  { %3082 = vmatprep.subr.bf16.mxu0 %v5897_v54 }
 0x950   :  { %3083 = vmatpush1.bf16.msra.mxu0 %v5902_v9 }
 0x951   :  { %3084 = vmatprep.subr.bf16.mxu0 %v5905_v20 }
 0x954   :  { %3085 = vmatpush1.bf16.msra.mxu0 %v5910_v36 }
 0x955   :  { %3086 = vmatprep.subr.bf16.mxu0 %v5913_v24 }
 0x958   :  { %3087 = vmatpush1.bf16.msra.mxu0 %v5918_v18  ;;  %v6686_v18 = vld [vmem:[#allocation21_spill] sm:$0xff] }
 0x959   :  { %3088 = vmatprep.subr.bf16.mxu0 %v5921_v15 }
 0x95c   :  { %3089 = vmatpush1.bf16.msra.mxu0 %v5926_v41  ;;  %v6687_v41 = vld [vmem:[#allocation22_spill] sm:$0xff] }
 0x95d   :  { %3090 = vmatprep.subr.bf16.mxu0 %v5929_v38 }
 0x960   :  { %3091 = vmatpush1.bf16.msra.mxu0 %v5934_v55  ;;  %v3164_v55 = vrot.slane %v5983_v47, 7 }
 0x961   :  { %3092 = vmatprep.subr.bf16.mxu0 %v5937_v51 }
 0x964   :  { %3093 = vmatpush1.bf16.msra.mxu0 %v5942_v40 }
 0x965   :  { %3094 = vmatprep.subr.bf16.mxu0 %v5945_v63 }
 0x968   :  { %3095 = vmatpush1.bf16.msra.mxu0 %v5950_v60 }
 0x96b   :  { %3097 = vmatmul.mubr.bf16.vlgmr.msra.gmra.mrb[52].mxu0 %v2978_v42 }
 0x9fe   :  { %v3016_v10 = vpop.f32.mrb[48].mxu0  ;;  %v3057_v62 = vpop.f32.mrb[48].mxu1 }
 0x9ff   :  { %v3058_v0 = vadd.f32 %v3057_v62, %v6680_v13  ;;  %v3018_v4 = vpop.f32.mrb[49].mxu0  ;;  %v3059_v48 = vpop.f32.mrb[49].mxu1 }
 0xa00   :  { %v3060_v49 = vadd.f32 %v3059_v48, %v4855_v43  ;;  %v3020_v56 = vpop.f32.mrb[50].mxu0  ;;  %v3061_v57 = vpop.f32.mrb[50].mxu1  ;;  %v3017_v43 = vadd.f32 %v3016_v10, %v6463_v17  ;;  %v3019_v9 = vadd.f32 %v3018_v4, %v6682_v46 }
 0xa01   :  { %v3127_v23 = vrot.slane %v3058_v0, 1  ;;  %v3021_v29 = vpop.f32.mrb[51].mxu0  ;;  %v3062_v6 = vpop.f32.mrb[51].mxu1 }
 0xa02   :  { %v3128_v3 = vrot.slane %v3060_v49, 1  ;;  %v3107_v20 = vrot.slane %v3017_v43, 1  ;;  %v3108_v36 = vrot.slane %v3019_v9, 1 }
 0xa03   :  { %v3131_v50 = vadd.f32 %v3127_v23, %v4859_v26  ;;  %v3163_v26 = vrot.slane %v5981_v21, 7 }
 0xa04   :  { %v3132_v2 = vadd.f32 %v3128_v3, %v6681_v5  ;;  %v3111_v15 = vadd.f32 %v3107_v20, %v6686_v18  ;;  %v3112_v38 = vadd.f32 %v3108_v36, %v6687_v41 }
 0xa05   :  { %v3473_v45 = vmul.f32 -1.442695, %v3131_v50 }
 0xa06   :  { %v3474_v30 = vmul.f32 -1.442695, %v3132_v2  ;;  %v3471_v60 = vmul.f32 -1.442695, %v3111_v15  ;;  %v3472_v13 = vmul.f32 -1.442695, %v3112_v38 }
 0xa07   :  { %3920 = vpow2.f32 %v3473_v45 }
 0xa08   :  { %3922 = vpow2.f32 %v3474_v30 }
 0xa11   :  { %v3921_v31 = vpop.eup %3920 }
 0xa12   :  { %v3139_v33 = vadd.f32 1.0, %v3921_v31  ;;  %v3923_v35 = vpop.eup %3922 }
 0xa13   :  { %v3140_v54 = vadd.f32 1.0, %v3923_v35 }
 0xa14   :  { %3924 = vrcp.f32 %v3139_v33 }
 0xa15   :  { %3926 = vrcp.f32 %v3140_v54 }
 0xa16   :  { %3928 = vpow2.f32 %v3471_v60 }
 0xa17   :  { %3930 = vpow2.f32 %v3472_v13 }
 0xa1e   :  { %v3925_v24 = vpop.eup %3924 }
 0xa1f   :  { %v3167_v51 = vmul.f32 %v3925_v24, %v3163_v26  ;;  %v3927_v40 = vpop.eup %3926  ;;  %v3157_v39 = vsub.f32 1.0, %v3925_v24 }
 0xa20   :  { %v3168_v63 = vmul.f32 %v3927_v40, %v3164_v55  ;;  %v3929_v17 = vpop.eup %3928  ;;  %v3158_v8 = vsub.f32 1.0, %v3927_v40 }
 0xa21   :  { %v3931_v5 = vpop.eup %3930  ;;  %v3119_v46 = vadd.f32 1.0, %v3929_v17 }
 0xa22   :  { %v3120_v27 = vadd.f32 1.0, %v3931_v5 }
 0xa23   :  { %3932 = vrcp.f32 %v3119_v46 }
 0xa24   :  { %3934 = vrcp.f32 %v3120_v27 }
 0xa2d   :  { %v3933_v44 = vpop.eup %3932 }
 0xa2e   :  { %v3935_v7 = vpop.eup %3934 }
 0xa3e   :  { %v3098_v1 = vpop.f32.mrb[52].mxu0 }
 0xa3f   :  { %v3099_v22 = vadd.f32 %v3098_v1, %v6688_v53  ;;  %v3100_v32 = vpop.f32.mrb[53].mxu0 }
 0xa40   :  { %v3101_v59 = vadd.f32 %v3100_v32, %v4857_v34  ;;  %v3102_v12 = vpop.f32.mrb[54].mxu0 }
 0xa41   :  { %v3147_v14 = vrot.slane %v3099_v22, 1  ;;  %v3103_v52 = vpop.f32.mrb[55].mxu0 }
 0xa42   :  { %v3148_v61 = vrot.slane %v3101_v59, 1 }
 0xa43   :  { %v3151_v37 = vmul.f32 %v3933_v44, %v3147_v14 }
 0xa44   :  { %v3152_v19 = vmul.f32 %v3935_v7, %v3148_v61 }
 0xa45   :  { %v3153_v21 = vadd.f32 %v3151_v37, %v4870_v11 }
 0xa46   :  { %v3154_v47 = vadd.f32 %v3152_v19, %v4874_v28 }
 0xa47   :  { %3936 = vtanh.f32 %v3153_v21 }
 0xa48   :  { %3938 = vtanh.f32 %v3154_v47 }
 0xa51   :  { %v3937_v25 = vpop.eup %3936 }
 0xa52   :  { %v3939_v42 = vpop.eup %3938  ;;  %v3159_v10 = vmul.f32 %v3937_v25, %v3157_v39 }
 0xa53   :  { %v3160_v34 = vmul.f32 %v3939_v42, %v3158_v8 }
 0xa54   :  { %v3169_v62 = vadd.f32 %v3167_v51, %v3159_v10 }
 0xa55   :  { %v3170_v0 = vadd.f32 %v3168_v63, %v3160_v34 }
 0xa56   :  { %v3183_v4 = vsel %vm265_vm6, %v5990_v58, %v3169_v62 }
 0xa57   :  { %v3184_v11 = vsel %vm265_vm6, %v5997_v16, %v3170_v0  ;;  %3185 = vst [vmem:[#allocation10] sm:$0xff] %v3183_v4 }
 0xa58   :  { %3186 = vst [vmem:[#allocation10 + $0x8] sm:$0xff] %v3184_v11 }
 0xa59   :  { %4219 = shalt.err (!%p4216_p3)
}
 0xa5a   :  { %s4220_s12 = scalar_lea.hbm %s6067_s7, 256 }
 0xa5b   :  { %p4221_p4 = scmp.ne.s32.totalorder %s6067_s7, %s4220_s12  ;;  %p4224_p5 = scmp.lt.u32.totalorder %s4220_s12, %s6067_s7 }
 0xa5d   :  { %p4226_p6 = pnand %p4224_p5, %p4221_p4 }
 0xa5f   :  { %4229 = shalt.err (!%p4226_p6)
}
 0xa60   :  { %3196 = dma.vmem_to_hbm [thread:$0]  %s3194_s5, 256, %s6067_s7, [#allocation4]  }
 0xa61   :  { %4236 = dma.done.wait [#allocation4], 256  }
 0xa62   :  { %4237 = vsyncadd [#allocation4], 4294967040 }
 0xa63   :  { %3200 = vsyncpa [#allocation3], 1 }
 0xa64   :  { %3201 = vsyncpa [#allocation8], 1 }
 0xa65   :  { %3202 = vsyncpa [#allocation4], 1 }
 0xa66   :  { %3203 = vsyncpa [#allocation5], 1 }

</bundles_post_ra>
